<compile_context>
chip_gen: v7x
topology: tpu7x:2x2x1
jax: 0.10.0
libtpu: 0.0.40
codegen_flags: <defaults>
</compile_context>

<pallas_src>
import functools

import jax
import jax.numpy as jnp
from jax.experimental import pallas as pl
from jax.experimental.pallas import tpu as pltpu

# ---------------- synthetic (small) model configuration ----------------
B = 2            # batch
C_IN = 3         # image channels (PPNet uses RGB)
H = W = 16       # spatial
S = H * W        # flattened spatial positions per image
C_FEAT = 256     # channels produced by the `features` stand-in
D = 128          # prototype_shape[1]
P = 256          # num_prototypes            (original: 2000)
NC = 16          # num_classes               (original: 200)
NC_PAD = 128     # lane-dense logits width (sliced back to NC in the wrapper)
EPS = 1e-4       # self.epsilon

# packed-constants layout:  [ bf | b1 | b2 | ||p||^2 ]   (all lane-128-aligned)
_OFF_BF = 0
_OFF_B1 = _OFF_BF + C_FEAT
_OFF_B2 = _OFF_B1 + D
_OFF_P2 = _OFF_B2 + D
NCONST = _OFF_P2 + P          # 256 + 128 + 128 + 256 = 768


# --------------------------- device gating -----------------------------
def _device_kind():
    try:
        return jax.devices()[0].device_kind.lower()
    except Exception:  # pragma: no cover - defensive
        return ""


def _bf16_exp_ok():
    """bf16 EUP exists on v6e/v7x only; keep f32 transcendentals on v5e/older."""
    kind = _device_kind()
    return any(t in kind for t in ("v6", "v7", "7x"))


def _images_per_grid_step(batch, s):
    """Images per grid step.

    v7x has 2 TensorCores/chip: split the batch into two fat "parallel" blocks
    (one per core) — but never drop the per-core M below 256 rows (MXU fill).
    v5e/v6e have a single TC: collapse the whole batch into one step.
    """
    kind = _device_kind()
    two_core = ("v7" in kind) or ("7x" in kind)
    if two_core and batch >= 2 and batch % 2 == 0 and (batch // 2) * s >= 256:
        return batch // 2
    return batch


# ---------------------------- Pallas kernel ----------------------------
def ppnet_kernel(x_ref, wfT_ref, consts_ref, w1_ref, w2_ref, proto_ref, wl_ref,
                 logits_ref, mind_ref, *, bb, s, bf16_exp):
    # Unpack the packed row constants (single DMA; static, lane-aligned slices).
    bf = consts_ref[:, _OFF_BF:_OFF_BF + C_FEAT]      # (1, C_FEAT)
    b1 = consts_ref[:, _OFF_B1:_OFF_B1 + D]           # (1, D)
    b2 = consts_ref[:, _OFF_B2:_OFF_B2 + D]           # (1, D)
    p2 = consts_ref[:, _OFF_P2:_OFF_P2 + P]           # (1, P)  precomputed ||p||^2

    # features stand-in: 1x1 conv + ReLU, fed directly from the NCHW block.
    # Per image: fT = wfT(256,3) @ x_b(3,s)  (K=3 f32 matmul, negligible), then
    # one fully aligned (256,256) f32 transpose in VMEM (XLU slot, free-ish).
    wfT = wfT_ref[...]                                             # (C_FEAT, C_IN) f32
    parts = []
    for img in range(bb):                                          # static unroll, bb <= 2
        fT = jnp.dot(wfT, x_ref[img], preferred_element_type=jnp.float32)   # (C_FEAT, s)
        fb = jnp.maximum(jnp.transpose(fT) + bf, 0.0).astype(jnp.bfloat16)  # (s, C_FEAT)
        parts.append(fb)
    f = parts[0] if bb == 1 else jnp.concatenate(parts, axis=0)    # (M, C_FEAT) bf16

    # add-on bottleneck: conv 1x1 (C_FEAT->D) + ReLU, fused with bf16 downcast.
    a1 = jnp.maximum(
        jnp.dot(f, w1_ref[...], preferred_element_type=jnp.float32) + b1,
        0.0).astype(jnp.bfloat16)                                  # (M, D) bf16
    # add-on: conv 1x1 (D->D) + Sigmoid.  sigmoid = 1 / (1 + exp(-z)); exp and
    # the approximate reciprocal both run on the EUP slot (no VALU divide).
    z2 = jnp.dot(a1, w2_ref[...], preferred_element_type=jnp.float32) + b2  # (M, D) f32
    if bf16_exp:
        ez = jnp.exp((-z2).astype(jnp.bfloat16)).astype(jnp.float32)
    else:
        ez = jnp.exp(-z2)
    a2 = pl.reciprocal(1.0 + ez, approx=True)                      # (M, D) f32

    # _l2_convolution with 1x1 prototypes:
    #   dist = relu(sum_c x^2 - 2 x.p + ||p||^2);  ||p||^2 precomputed (p2).
    x2sum = jnp.sum(a2 * a2, axis=-1, keepdims=True)               # (M, 1) f32
    xp = jnp.dot(a2.astype(jnp.bfloat16), proto_ref[...],
                 preferred_element_type=jnp.float32)               # (M, P)
    dist = jnp.maximum(x2sum - 2.0 * xp + p2, 0.0)                 # (M, P)

    # per-image spatial min  (== -max_pool2d(-dist, full window))
    min_d = jnp.min(dist.reshape(bb, s, P), axis=1)                # (bb, P)

    # distance_2_similarity: log((d+1)/(d+eps)) = log(d+1) - log(d+eps),
    # then last layer (Linear, no bias, lane-padded to 128 output columns).
    act = jnp.log(min_d + 1.0) - jnp.log(min_d + EPS)              # (bb, P)
    logits = jnp.dot(act.astype(jnp.bfloat16), wl_ref[...],
                     preferred_element_type=jnp.float32)           # (bb, NC_PAD)

    mind_ref[0] = min_d
    logits_ref[0] = logits


# ------------------------------ wrapper --------------------------------
@jax.jit
def ppnet_forward(x_nchw, params):
    """Returns (logits (B, NC), min_distances (B, P)) — same as PPNet.forward."""
    b, c, h, w = x_nchw.shape
    s = h * w
    bb = _images_per_grid_step(b, s)   # images per grid step (static, trace-time)
    g = b // bb                        # grid length

    # Pure metadata reshape of NCHW — no wrapper-side HBM relayout pass.
    x3 = x_nchw.reshape(b, c, s)       # (B, C_IN, S)

    kernel = functools.partial(ppnet_kernel, bb=bb, s=s, bf16_exp=_bf16_exp_ok())

    # Advisory cost estimate so XLA schedules surrounding ops sensibly.
    flops = (2 * b * s * (C_IN * C_FEAT + C_FEAT * D + D * D + D * P + D)
             + 2 * b * P * NC_PAD)
    transcendentals = 2 * b * s * D + 2 * b * P          # exp + recip + 2 logs
    bytes_accessed = (b * C_IN * s * 4 + C_FEAT * C_IN * 4 + NCONST * 4
                      + (C_FEAT * D + D * D + D * P + P * NC_PAD) * 2
                      + b * NC_PAD * 4 + b * P * 4)

    grid_spec = pltpu.PrefetchScalarGridSpec(
        num_scalar_prefetch=0,
        grid=(g,),
        in_specs=[
            pl.BlockSpec((bb, C_IN, s), lambda i: (i, 0, 0)),   # x (NCHW, no relayout)
            pl.BlockSpec((C_FEAT, C_IN), lambda i: (0, 0)),     # wfT (f32)
            pl.BlockSpec((1, NCONST), lambda i: (0, 0)),        # packed bf|b1|b2|p2 (f32)
            pl.BlockSpec((C_FEAT, D), lambda i: (0, 0)),        # w1 (bf16)
            pl.BlockSpec((D, D), lambda i: (0, 0)),             # w2 (bf16)
            pl.BlockSpec((D, P), lambda i: (0, 0)),             # prototypes (bf16)
            pl.BlockSpec((P, NC_PAD), lambda i: (0, 0)),        # last layer (bf16, lane-padded)
        ],
        out_specs=[
            pl.BlockSpec((1, bb, NC_PAD), lambda i: (i, 0, 0)), # logits (lane-dense 128)
            pl.BlockSpec((1, bb, P), lambda i: (i, 0, 0)),      # min_distances
        ],
    )

    logits3, mind3 = pl.pallas_call(
        kernel,
        out_shape=(jax.ShapeDtypeStruct((g, bb, NC_PAD), jnp.float32),
                   jax.ShapeDtypeStruct((g, bb, P), jnp.float32)),
        grid_spec=grid_spec,
        compiler_params=pltpu.CompilerParams(dimension_semantics=("parallel",)),
        cost_estimate=pl.CostEstimate(flops=flops,
                                      transcendentals=transcendentals,
                                      bytes_accessed=bytes_accessed),
    )(x3, params["wfT"], params["consts"], params["w1"], params["w2"],
      params["protoT"], params["wlT_pad"])

    logits = logits3.reshape(b, NC_PAD)[:, :NC]
    min_distances = mind3.reshape(b, P)
    return logits, min_distances


# ------------------------ deterministic parameters ----------------------
def make_params(key):
    ks = jax.random.split(key, 5)
    # features stand-in: 1x1 conv C_IN -> C_FEAT (kaiming-normal-ish), bias 0.
    # Stored transposed (C_FEAT, C_IN) f32 so the kernel computes wfT @ x_b.
    wf = jax.random.normal(ks[0], (C_IN, C_FEAT), jnp.float32) * (2.0 / C_FEAT) ** 0.5
    wfT = jnp.transpose(wf)
    bf = jnp.zeros((1, C_FEAT), jnp.float32)
    # add-on conv1: C_FEAT -> D, kaiming_normal fan_out, bias 0
    w1 = (jax.random.normal(ks[1], (C_FEAT, D), jnp.float32)
          * (2.0 / D) ** 0.5).astype(jnp.bfloat16)
    b1 = jnp.zeros((1, D), jnp.float32)
    # add-on conv2: D -> D, kaiming_normal fan_out, bias 0
    w2 = (jax.random.normal(ks[2], (D, D), jnp.float32)
          * (2.0 / D) ** 0.5).astype(jnp.bfloat16)
    b2 = jnp.zeros((1, D), jnp.float32)
    # prototype_vectors ~ U[0,1), (P, D, 1, 1) -> stored transposed (D, P), bf16
    protoT = jax.random.uniform(ks[3], (D, P), jnp.float32).astype(jnp.bfloat16)
    # ||p||^2 precomputed once (loop-invariant)
    p2 = jnp.sum(protoT.astype(jnp.float32) ** 2, axis=0, keepdims=True)   # (1, P)
    # last layer Linear(P -> NC, bias=False), torch default U(-1/sqrt(P), 1/sqrt(P)),
    # zero-padded to 128 output columns for lane-dense stores.
    bound = 1.0 / (P ** 0.5)
    wl = jax.random.uniform(ks[4], (P, NC), jnp.float32, minval=-bound, maxval=bound)
    wlT_pad = jnp.pad(wl, ((0, 0), (0, NC_PAD - NC))).astype(jnp.bfloat16)
    # small row constants packed into one buffer (single DMA in the kernel)
    consts = jnp.concatenate([bf, b1, b2, p2], axis=1)                     # (1, NCONST)
    return dict(wfT=wfT, bf=bf, b1=b1, b2=b2, p2=p2, consts=consts,
                w1=w1, w2=w2, protoT=protoT, wlT_pad=wlT_pad)


# --------------------------- pure-JAX reference --------------------------
def ppnet_reference(x_nchw, p):
    """Mirrors the kernel math (including the bf16 casts) in plain JAX."""
    b, c, h, w = x_nchw.shape
    x3 = x_nchw.reshape(b, c, h * w)
    f = jax.nn.relu(
        jnp.einsum("fc,bcs->bsf", p["wfT"], x3,
                   precision=jax.lax.Precision.HIGHEST) + p["bf"]).astype(jnp.bfloat16)
    a1 = jax.nn.relu(
        jnp.einsum("bsf,fd->bsd", f, p["w1"],
                   preferred_element_type=jnp.float32) + p["b1"]).astype(jnp.bfloat16)
    z2 = jnp.einsum("bsd,de->bse", a1, p["w2"],
                    preferred_element_type=jnp.float32) + p["b2"]
    if _bf16_exp_ok():
        ez = jnp.exp((-z2).astype(jnp.bfloat16)).astype(jnp.float32)
    else:
        ez = jnp.exp(-z2)
    a2 = 1.0 / (1.0 + ez)
    x2 = jnp.sum(a2 * a2, axis=-1, keepdims=True)
    xp = jnp.einsum("bsd,dp->bsp", a2.astype(jnp.bfloat16), p["protoT"],
                    preferred_element_type=jnp.float32)
    dist = jax.nn.relu(x2 - 2.0 * xp + p["p2"])
    mind = jnp.min(dist, axis=1)                                   # (B, P)
    act = jnp.log(mind + 1.0) - jnp.log(mind + EPS)
    logits = jnp.einsum("bp,pn->bn", act.astype(jnp.bfloat16), p["wlT_pad"],
                        preferred_element_type=jnp.float32)[:, :NC]
    return logits, mind


if __name__ == "__main__":
    key = jax.random.PRNGKey(0)
    kx, kp = jax.random.split(key)
    x = jax.random.normal(kx, (B, C_IN, H, W), jnp.float32)   # NCHW, like PyTorch
    params = make_params(kp)

    logits, min_distances = ppnet_forward(x, params)
    logits, min_distances = jax.block_until_ready((logits, min_distances))

    ref_logits, ref_mind = ppnet_reference(x, params)
    assert logits.shape == (B, NC) and min_distances.shape == (B, P)
    assert jnp.allclose(logits, ref_logits, rtol=1e-2, atol=1e-2)
    assert jnp.allclose(min_distances, ref_mind, rtol=1e-2, atol=1e-2)

    print("KERNEL_OK")
</pallas_src>

<mosaic_0001>
module attributes {stable_mosaic.version = 11 : i64} {
  func.func @ppnet_kernel(%arg0: i32, %arg1: memref<2x3x256xf32, #tpu.memory_space<vmem>>, %arg2: memref<256x3xf32, #tpu.memory_space<vmem>>, %arg3: memref<1x768xf32, #tpu.memory_space<vmem>>, %arg4: memref<256x128xbf16, #tpu.memory_space<vmem>>, %arg5: memref<128x128xbf16, #tpu.memory_space<vmem>>, %arg6: memref<128x256xbf16, #tpu.memory_space<vmem>>, %arg7: memref<256x128xbf16, #tpu.memory_space<vmem>>, %arg8: memref<1x2x128xf32, #tpu.memory_space<vmem>>, %arg9: memref<1x2x256xf32, #tpu.memory_space<vmem>>) attributes {dimension_semantics = [#tpu.dimension_semantics<parallel>], iteration_bounds = array<i64: 1>, scalar_prefetch = 0 : i64, scratch_operands = 0 : i64, tpu.core_type = #tpu.core_type<tc>, window_params = [{transform_indices = @transform_0, window_bounds = array<i64: 2, 3, 256>}, {pipeline_mode = #tpu.pipeline_mode<synchronous>, transform_indices = @transform_1, window_bounds = array<i64: 256, 3>}, {pipeline_mode = #tpu.pipeline_mode<synchronous>, transform_indices = @transform_2, window_bounds = array<i64: 1, 768>}, {pipeline_mode = #tpu.pipeline_mode<synchronous>, transform_indices = @transform_3, window_bounds = array<i64: 256, 128>}, {pipeline_mode = #tpu.pipeline_mode<synchronous>, transform_indices = @transform_4, window_bounds = array<i64: 128, 128>}, {pipeline_mode = #tpu.pipeline_mode<synchronous>, transform_indices = @transform_5, window_bounds = array<i64: 128, 256>}, {pipeline_mode = #tpu.pipeline_mode<synchronous>, transform_indices = @transform_6, window_bounds = array<i64: 256, 128>}, {transform_indices = @transform_7, window_bounds = array<i64: 1, 2, 128>}, {transform_indices = @transform_8, window_bounds = array<i64: 1, 2, 256>}]} {
    %c0 = arith.constant 0 : index
    %c0_0 = arith.constant 0 : index
    %0 = vector.load %arg3[%c0, %c0_0] : memref<1x768xf32, #tpu.memory_space<vmem>>, vector<1x256xf32>
    %c0_1 = arith.constant 0 : index
    %c256 = arith.constant 256 : index
    %1 = vector.load %arg3[%c0_1, %c256] : memref<1x768xf32, #tpu.memory_space<vmem>>, vector<1x128xf32>
    %c0_2 = arith.constant 0 : index
    %c384 = arith.constant 384 : index
    %2 = vector.load %arg3[%c0_2, %c384] : memref<1x768xf32, #tpu.memory_space<vmem>>, vector<1x128xf32>
    %c0_3 = arith.constant 0 : index
    %c512 = arith.constant 512 : index
    %3 = vector.load %arg3[%c0_3, %c512] : memref<1x768xf32, #tpu.memory_space<vmem>>, vector<1x256xf32>
    %c0_4 = arith.constant 0 : index
    %c0_5 = arith.constant 0 : index
    %4 = vector.load %arg2[%c0_4, %c0_5] : memref<256x3xf32, #tpu.memory_space<vmem>>, vector<256x3xf32>
    %c0_6 = arith.constant 0 : index
    %c0_7 = arith.constant 0 : index
    %c0_8 = arith.constant 0 : index
    %5 = vector.load %arg1[%c0_6, %c0_7, %c0_8] : memref<2x3x256xf32, #tpu.memory_space<vmem>>, vector<1x3x256xf32>
    %6 = vector.shape_cast %5 : vector<1x3x256xf32> to vector<3x256xf32>
    %cst = arith.constant dense<0.000000e+00> : vector<256x256xf32>
    %7 = tpu.matmul %4, %6, %cst {dimension_numbers = #tpu.dot_dimension_numbers<[1], [0], [0], [1], [0, 0, 1, 1], [], []>} : vector<256x3xf32>, vector<3x256xf32>, vector<256x256xf32> -> vector<256x256xf32>
    %8 = tpu.transpose %7, [1, 0] : vector<256x256xf32> -> vector<256x256xf32>
    %9 = vector.broadcast %0 : vector<1x256xf32> to vector<256x256xf32>
    %10 = arith.addf %8, %9 : vector<256x256xf32>
    %cst_9 = arith.constant 0.000000e+00 : f32
    %11 = vector.broadcast %cst_9 : f32 to vector<256x256xf32>
    %12 = arith.maximumf %10, %11 : vector<256x256xf32>
    %13 = arith.truncf %12 : vector<256x256xf32> to vector<256x256xbf16>
    %c1 = arith.constant 1 : index
    %c0_10 = arith.constant 0 : index
    %c0_11 = arith.constant 0 : index
    %14 = vector.load %arg1[%c1, %c0_10, %c0_11] : memref<2x3x256xf32, #tpu.memory_space<vmem>>, vector<1x3x256xf32>
    %15 = vector.shape_cast %14 : vector<1x3x256xf32> to vector<3x256xf32>
    %cst_12 = arith.constant dense<0.000000e+00> : vector<256x256xf32>
    %16 = tpu.matmul %4, %15, %cst_12 {dimension_numbers = #tpu.dot_dimension_numbers<[1], [0], [0], [1], [0, 0, 1, 1], [], []>} : vector<256x3xf32>, vector<3x256xf32>, vector<256x256xf32> -> vector<256x256xf32>
    %17 = tpu.transpose %16, [1, 0] : vector<256x256xf32> -> vector<256x256xf32>
    %18 = vector.broadcast %0 : vector<1x256xf32> to vector<256x256xf32>
    %19 = arith.addf %17, %18 : vector<256x256xf32>
    %cst_13 = arith.constant 0.000000e+00 : f32
    %20 = vector.broadcast %cst_13 : f32 to vector<256x256xf32>
    %21 = arith.maximumf %19, %20 : vector<256x256xf32>
    %22 = arith.truncf %21 : vector<256x256xf32> to vector<256x256xbf16>
    %23 = tpu.concatenate %13, %22 in 0 : vector<256x256xbf16>, vector<256x256xbf16> -> vector<512x256xbf16>
    %c0_14 = arith.constant 0 : index
    %c0_15 = arith.constant 0 : index
    %24 = vector.load %arg4[%c0_14, %c0_15] : memref<256x128xbf16, #tpu.memory_space<vmem>>, vector<256x128xbf16>
    %cst_16 = arith.constant dense<0.000000e+00> : vector<512x128xf32>
    %25 = tpu.matmul %23, %24, %cst_16 {dimension_numbers = #tpu.dot_dimension_numbers<[1], [0], [0], [1], [0, 0, 1, 1], [], []>} : vector<512x256xbf16>, vector<256x128xbf16>, vector<512x128xf32> -> vector<512x128xf32>
    %26 = vector.broadcast %1 : vector<1x128xf32> to vector<512x128xf32>
    %27 = arith.addf %25, %26 : vector<512x128xf32>
    %cst_17 = arith.constant 0.000000e+00 : f32
    %28 = vector.broadcast %cst_17 : f32 to vector<512x128xf32>
    %29 = arith.maximumf %27, %28 : vector<512x128xf32>
    %30 = arith.truncf %29 : vector<512x128xf32> to vector<512x128xbf16>
    %c0_18 = arith.constant 0 : index
    %c0_19 = arith.constant 0 : index
    %31 = vector.load %arg5[%c0_18, %c0_19] : memref<128x128xbf16, #tpu.memory_space<vmem>>, vector<128x128xbf16>
    %cst_20 = arith.constant dense<0.000000e+00> : vector<512x128xf32>
    %32 = tpu.matmul %30, %31, %cst_20 {dimension_numbers = #tpu.dot_dimension_numbers<[1], [0], [0], [1], [0, 0, 1, 1], [], []>} : vector<512x128xbf16>, vector<128x128xbf16>, vector<512x128xf32> -> vector<512x128xf32>
    %33 = vector.broadcast %2 : vector<1x128xf32> to vector<512x128xf32>
    %34 = arith.addf %32, %33 : vector<512x128xf32>
    %cst_21 = arith.constant 0.000000e+00 : f32
    %35 = vector.broadcast %cst_21 : f32 to vector<512x128xf32>
    %36 = arith.subf %35, %34 : vector<512x128xf32>
    %37 = math.exp %36 : vector<512x128xf32>
    %cst_22 = arith.constant 1.000000e+00 : f32
    %38 = vector.broadcast %cst_22 : f32 to vector<512x128xf32>
    %39 = arith.addf %38, %37 : vector<512x128xf32>
    %40 = tpu.reciprocal %39 {approx = true} : vector<512x128xf32> -> vector<512x128xf32>
    %41 = arith.mulf %40, %40 : vector<512x128xf32>
    %cst_23 = arith.constant dense<0.000000e+00> : vector<512xf32>
    %42 = vector.multi_reduction <add>, %41, %cst_23 [1] : vector<512x128xf32> to vector<512xf32>
    %43 = vector.shape_cast %42 : vector<512xf32> to vector<512x1xf32>
    %44 = arith.truncf %40 : vector<512x128xf32> to vector<512x128xbf16>
    %c0_24 = arith.constant 0 : index
    %c0_25 = arith.constant 0 : index
    %45 = vector.load %arg6[%c0_24, %c0_25] : memref<128x256xbf16, #tpu.memory_space<vmem>>, vector<128x256xbf16>
    %cst_26 = arith.constant dense<0.000000e+00> : vector<512x256xf32>
    %46 = tpu.matmul %44, %45, %cst_26 {dimension_numbers = #tpu.dot_dimension_numbers<[1], [0], [0], [1], [0, 0, 1, 1], [], []>} : vector<512x128xbf16>, vector<128x256xbf16>, vector<512x256xf32> -> vector<512x256xf32>
    %cst_27 = arith.constant 2.000000e+00 : f32
    %47 = vector.broadcast %cst_27 : f32 to vector<512x256xf32>
    %48 = arith.mulf %47, %46 : vector<512x256xf32>
    %49 = vector.broadcast %43 : vector<512x1xf32> to vector<512x256xf32>
    %50 = arith.subf %49, %48 : vector<512x256xf32>
    %51 = vector.broadcast %3 : vector<1x256xf32> to vector<512x256xf32>
    %52 = arith.addf %50, %51 : vector<512x256xf32>
    %cst_28 = arith.constant 0.000000e+00 : f32
    %53 = vector.broadcast %cst_28 : f32 to vector<512x256xf32>
    %54 = arith.maximumf %52, %53 : vector<512x256xf32>
    %55 = vector.shape_cast %54 : vector<512x256xf32> to vector<2x256x256xf32>
    %cst_29 = arith.constant dense<0x7F800000> : vector<2x256xf32>
    %56 = vector.multi_reduction <minimumf>, %55, %cst_29 [1] : vector<2x256x256xf32> to vector<2x256xf32>
    %cst_30 = arith.constant 1.000000e+00 : f32
    %57 = vector.broadcast %cst_30 : f32 to vector<2x256xf32>
    %58 = arith.addf %56, %57 : vector<2x256xf32>
    %59 = math.log %58 : vector<2x256xf32>
    %cst_31 = arith.constant 9.99999974E-5 : f32
    %60 = vector.broadcast %cst_31 : f32 to vector<2x256xf32>
    %61 = arith.addf %56, %60 : vector<2x256xf32>
    %62 = math.log %61 : vector<2x256xf32>
    %63 = arith.subf %59, %62 : vector<2x256xf32>
    %64 = arith.truncf %63 : vector<2x256xf32> to vector<2x256xbf16>
    %c0_32 = arith.constant 0 : index
    %c0_33 = arith.constant 0 : index
    %65 = vector.load %arg7[%c0_32, %c0_33] : memref<256x128xbf16, #tpu.memory_space<vmem>>, vector<256x128xbf16>
    %cst_34 = arith.constant dense<0.000000e+00> : vector<2x128xf32>
    %66 = tpu.matmul %64, %65, %cst_34 {dimension_numbers = #tpu.dot_dimension_numbers<[1], [0], [0], [1], [0, 0, 1, 1], [], []>} : vector<2x256xbf16>, vector<256x128xbf16>, vector<2x128xf32> -> vector<2x128xf32>
    %c0_35 = arith.constant 0 : index
    %c0_36 = arith.constant 0 : index
    %c0_37 = arith.constant 0 : index
    %67 = vector.load %arg9[%c0_35, %c0_36, %c0_37] : memref<1x2x256xf32, #tpu.memory_space<vmem>>, vector<1x2x256xf32>
    %68 = vector.shape_cast %67 : vector<1x2x256xf32> to vector<2x256xf32>
    %69 = vector.shape_cast %56 : vector<2x256xf32> to vector<1x2x256xf32>
    tpu.vector_store %arg9[%c0_35, %c0_36, %c0_37], %69 {strides = array<i32>} : memref<1x2x256xf32, #tpu.memory_space<vmem>>, vector<1x2x256xf32>,
    %c0_38 = arith.constant 0 : index
    %c0_39 = arith.constant 0 : index
    %c0_40 = arith.constant 0 : index
    %70 = vector.load %arg8[%c0_38, %c0_39, %c0_40] : memref<1x2x128xf32, #tpu.memory_space<vmem>>, vector<1x2x128xf32>
    %71 = vector.shape_cast %70 : vector<1x2x128xf32> to vector<2x128xf32>
    %72 = vector.shape_cast %66 : vector<2x128xf32> to vector<1x2x128xf32>
    tpu.vector_store %arg8[%c0_38, %c0_39, %c0_40], %72 {strides = array<i32>} : memref<1x2x128xf32, #tpu.memory_space<vmem>>, vector<1x2x128xf32>,
    return
  }
  func.func @transform_0(%arg0: i32) -> (i32, i32, i32) {
    %c0_i32 = arith.constant 0 : i32
    %c0_i32_0 = arith.constant 0 : i32
    %c0_i32_1 = arith.constant 0 : i32
    return %arg0, %c0_i32, %c0_i32_0 : i32, i32, i32
  }
  func.func @transform_1(%arg0: i32) -> (i32, i32) {
    %c0_i32 = arith.constant 0 : i32
    %c0_i32_0 = arith.constant 0 : i32
    %c0_i32_1 = arith.constant 0 : i32
    return %c0_i32, %c0_i32_0 : i32, i32
  }
  func.func @transform_2(%arg0: i32) -> (i32, i32) {
    %c0_i32 = arith.constant 0 : i32
    %c0_i32_0 = arith.constant 0 : i32
    %c0_i32_1 = arith.constant 0 : i32
    return %c0_i32, %c0_i32_0 : i32, i32
  }
  func.func @transform_3(%arg0: i32) -> (i32, i32) {
    %c0_i32 = arith.constant 0 : i32
    %c0_i32_0 = arith.constant 0 : i32
    %c0_i32_1 = arith.constant 0 : i32
    return %c0_i32, %c0_i32_0 : i32, i32
  }
  func.func @transform_4(%arg0: i32) -> (i32, i32) {
    %c0_i32 = arith.constant 0 : i32
    %c0_i32_0 = arith.constant 0 : i32
    %c0_i32_1 = arith.constant 0 : i32
    return %c0_i32, %c0_i32_0 : i32, i32
  }
  func.func @transform_5(%arg0: i32) -> (i32, i32) {
    %c0_i32 = arith.constant 0 : i32
    %c0_i32_0 = arith.constant 0 : i32
    %c0_i32_1 = arith.constant 0 : i32
    return %c0_i32, %c0_i32_0 : i32, i32
  }
  func.func @transform_6(%arg0: i32) -> (i32, i32) {
    %c0_i32 = arith.constant 0 : i32
    %c0_i32_0 = arith.constant 0 : i32
    %c0_i32_1 = arith.constant 0 : i32
    return %c0_i32, %c0_i32_0 : i32, i32
  }
  func.func @transform_7(%arg0: i32) -> (i32, i32, i32) {
    %c0_i32 = arith.constant 0 : i32
    %c0_i32_0 = arith.constant 0 : i32
    %c0_i32_1 = arith.constant 0 : i32
    return %arg0, %c0_i32, %c0_i32_0 : i32, i32, i32
  }
  func.func @transform_8(%arg0: i32) -> (i32, i32, i32) {
    %c0_i32 = arith.constant 0 : i32
    %c0_i32_0 = arith.constant 0 : i32
    %c0_i32_1 = arith.constant 0 : i32
    return %arg0, %c0_i32, %c0_i32_0 : i32, i32, i32
  }
}

</mosaic_0001>

<bundles_post_ra>
// kernel: ppnet_forward.1
= control target key start
LH: loop header
LB: loop body
LE: loop exit
PB: predicated region body
PF: predicated region fallthrough
CT: control target
= control target key end

     0   :  { %14 = vsyncpa [#allocation3], 0  ;;  %s6866_s0 = inlined_call_operand.vmem [shape: f32[2,3,256], index: 0, kind: input, shape index: {}]   ;;  %s6867_s1 = inlined_call_operand.vmem [shape: f32[256,3], index: 1, kind: input, shape index: {}]   ;;  %s6868_s2 = inlined_call_operand.hbm [shape: f32[1,768], index: 2, kind: input, shape index: {}]   ;;  %s6869_s3 = inlined_call_operand.vmem [shape: bf16[256,128], index: 3, kind: input, shape index: {}]   ;;  %s6870_s4 = inlined_call_operand.hbm [shape: bf16[128,128], index: 4, kind: input, shape index: {}]   ;;  %s6871_s5 = inlined_call_operand.vmem [shape: bf16[128,256], index: 5, kind: input, shape index: {}]   ;;  %s6872_s6 = inlined_call_operand.vmem [shape: bf16[256,128], index: 6, kind: input, shape index: {}]   ;;  %s6873_s7 = inlined_call_operand.hbm [shape: f32[1,2,128], index: 7, kind: output, shape index: {0}]   ;;  %s6874_s8 = inlined_call_operand.hbm [shape: f32[1,2,256], index: 8, kind: output, shape index: {1}]  }
   0x1   :  { %15 = vsyncpa [#allocation6], 0 }
   0x2   :  { %16 = vsyncpa [#allocation4], 0 }
   0x3   :  { %17 = vsyncpa [#allocation9], 0  ;;  %s4858_s27 = smov [#allocation2]   ;;  %s4859_s29 = smov [#allocation5]  }
   0x4   :  { %s28_s28 = sshll.u32 %s4858_s27, 4  ;;  %s39_s30 = sshll.u32 %s4859_s29, 4  ;;  %s29_s28 = int_to_ptr.vmem [resolvable:$true] %s28_s28  ;;  %s4912_s30 = int_to_ptr.vmem [resolvable:$true] %s39_s30 }
   0x5   :  { %s4762_s11 = scalar_lea.hbm %s6868_s2, 96 }
   0x6   :  { %p4763_p0 = scmp.ne.s32.totalorder %s6868_s2, %s4762_s11  ;;  %p4766_p1 = scmp.lt.u32.totalorder %s4762_s11, %s6868_s2 }
   0x8   :  { %p4768_p2 = pnand %p4766_p1, %p4763_p0 }
   0xa   :  { %4771 = shalt.err (!%p4768_p2)
}
   0xb   :  { %s4772_s16 = scalar_lea.vmem %s29_s28, 96  ;;  %p4777_p4 = scmp.lt.s32.totalorder %s29_s28, %s29_s28 }
   0xc   :  { %p4773_p3 = scmp.ne.s32.totalorder %s29_s28, %s4772_s16  ;;  %p4778_p5 = scmp.lt.s32.totalorder %s4772_s16, %s4772_s16 }
   0xe   :  { %p4779_p6 = por %p4778_p5, %p4777_p4 }
  0x10   :  { %p4780_p7 = pnand %p4779_p6, %p4773_p3 }
  0x12   :  { %4783 = shalt.err (!%p4780_p7)
}
  0x13   :  { %31 = dma.hbm_to_vmem [thread:$0]  %s6868_s2, 96, %s29_s28, [#allocation3]  }
  0x14   :  { %s4784_s21 = scalar_lea.hbm %s6870_s4, 1024 }
  0x15   :  { %p4785_p8 = scmp.ne.s32.totalorder %s6870_s4, %s4784_s21  ;;  %p4788_p9 = scmp.lt.u32.totalorder %s4784_s21, %s6870_s4 }
  0x17   :  { %p4790_p10 = pnand %p4788_p9, %p4785_p8 }
  0x19   :  { %4793 = shalt.err (!%p4790_p10)
}
  0x1a   :  { %s4794_s26 = scalar_lea.vmem %s4912_s30, 1024  ;;  %p4799_p12 = scmp.lt.s32.totalorder %s4912_s30, %s4912_s30 }
  0x1b   :  { %p4795_p11 = scmp.ne.s32.totalorder %s4912_s30, %s4794_s26  ;;  %p4800_p13 = scmp.lt.s32.totalorder %s4794_s26, %s4794_s26 }
  0x1d   :  { %p4801_p0 = por %p4800_p13, %p4799_p12 }
  0x1f   :  { %p4802_p1 = pnand %p4801_p0, %p4795_p11 }
  0x21   :  { %4805 = shalt.err (!%p4802_p1)
}
  0x22   :  { %s4860_s2 = smov 64   ;;  %s4861_s27 = smov 4  }
  0x23   :  { %45 = dma.hbm_to_vmem [thread:$0]  %s6870_s4, 1024, %s4912_s30, [#allocation6], %s4860_s2, %s4860_s2, %s4861_s27  }
  0x24   :  { %4850 = dma.done.wait [#allocation3], 96  }
  0x25   :  { %4851 = vsyncadd [#allocation3], 4294967200 }
  0x26   :  { %4852 = dma.done.wait [#allocation6], 1024  }
  0x27   :  { %4853 = vsyncadd [#allocation6], 4294966272  ;;  %v4862_v0 = vmov 0.0   ;;  %v93_v1 = vld [vmem:[%s6866_s0] sm:$0x77]  ;;  %vm193_vm0 = vcmask 1042432  }
  0x28   :  { %262 = vmatprep.mubr.f32.mxu0 %v4862_v0  ;;  %826 = vmatprep.mubr.f32.mxu1 %v4862_v0  ;;  %v95_v2 = vcombine.high %v93_v1, %v93_v1  ;;  %v61_v3 = vld [vmem:[%s6867_s1] sm:$0xff]  ;;  %vm96_vm1 = vcmask 23552   ;;  %v62_v4 = vld [vmem:[%s6867_s1 + $0x8] sm:$0xff]  ;;  %v63_v5 = vld [vmem:[%s6867_s1 + $0x10] sm:$0xff]  ;;  %v6875_v38 = vmov 0   ;;  %vm3921_vm2 = vcmask 1041409  }
  0x29   :  { %v4163_v6 = vld [vmem:[%s6866_s0 + $0x8] sm:$0x77]  ;;  %v64_v7 = vld [vmem:[%s6867_s1 + $0x18] sm:$0xff]  ;;  %v65_v9 = vld [vmem:[%s6867_s1 + $0x20] sm:$0xff]  ;;  %vm4090_vm3 = vcmask 1043459   ;;  %vm4092_vm4 = vcmask 1045509  }
  0x2a   :  { %4129 = vmatprep.subr.msk.mxu0 %vm193_vm0, %v95_v2  ;;  %v757_v8 = vcombine.high %v4163_v6, %v4163_v6  ;;  %v66_v10 = vld [vmem:[%s6867_s1 + $0x28] sm:$0xff]  ;;  %v67_v11 = vld [vmem:[%s6867_s1 + $0x30] sm:$0xff]  ;;  %v68_v12 = vld [vmem:[%s6867_s1 + $0x38] sm:$0xff]  ;;  %vm4094_vm5 = vcmask 1047559  }
  0x2b   :  { %4130 = vmatpush1.msk.msra.mxu0 %vm193_vm0, %v93_v1  ;;  %v69_v13 = vld [vmem:[%s6867_s1 + $0x40] sm:$0xff]  ;;  %v70_v14 = vld [vmem:[%s6867_s1 + $0x48] sm:$0xff]  ;;  %v71_v15 = vld [vmem:[%s6867_s1 + $0x50] sm:$0xff] }
  0x2c   :  { %4131 = vmatmul.mubr.msk.f32.vlgmr.msra.gmra.mrb[0].mxu0 %vm96_vm1, %v61_v3  ;;  %4164 = vmatprep.subr.msk.mxu1 %vm193_vm0, %v757_v8  ;;  %v72_v16 = vld [vmem:[%s6867_s1 + $0x58] sm:$0xff]  ;;  %v73_v17 = vld [vmem:[%s6867_s1 + $0x60] sm:$0xff]  ;;  %v74_v18 = vld [vmem:[%s6867_s1 + $0x68] sm:$0xff] }
  0x2d   :  { %268 = vmatprep.mubr.f32.mxu0 %v4862_v0  ;;  %4165 = vmatpush1.msk.msra.mxu1 %vm193_vm0, %v4163_v6  ;;  %v75_v19 = vld [vmem:[%s6867_s1 + $0x70] sm:$0xff]  ;;  %v76_v20 = vld [vmem:[%s6867_s1 + $0x78] sm:$0xff]  ;;  %v77_v21 = vld [vmem:[%s6867_s1 + $0x80] sm:$0xff] }
  0x2e   :  { %4166 = vmatmul.mubr.msk.f32.vlgmr.msra.gmra.mrb[0].mxu1 %vm96_vm1, %v61_v3  ;;  %v78_v22 = vld [vmem:[%s6867_s1 + $0x88] sm:$0xff]  ;;  %v79_v23 = vld [vmem:[%s6867_s1 + $0x90] sm:$0xff]  ;;  %v80_v24 = vld [vmem:[%s6867_s1 + $0x98] sm:$0xff]  ;;  %1441 = vmatprep.subr.bf16.mxu0 %v6875_v38 }
  0x2f   :  { %832 = vmatprep.mubr.f32.mxu1 %v4862_v0  ;;  %v81_v25 = vld [vmem:[%s6867_s1 + $0xa0] sm:$0xff]  ;;  %v82_v26 = vld [vmem:[%s6867_s1 + $0xa8] sm:$0xff]  ;;  %v83_v27 = vld [vmem:[%s6867_s1 + $0xb0] sm:$0xff] }
  0x30   :  { %4132 = vmatmul.mubr.msk.f32.gmra.mrb[2].mxu0 %vm96_vm1, %v62_v4  ;;  %v84_v28 = vld [vmem:[%s6867_s1 + $0xb8] sm:$0xff]  ;;  %v85_v29 = vld [vmem:[%s6867_s1 + $0xc0] sm:$0xff]  ;;  %v86_v30 = vld [vmem:[%s6867_s1 + $0xc8] sm:$0xff] }
  0x31   :  { %274 = vmatprep.mubr.f32.mxu0 %v4862_v0  ;;  %v87_v31 = vld [vmem:[%s6867_s1 + $0xd0] sm:$0xff]  ;;  %v88_v32 = vld [vmem:[%s6867_s1 + $0xd8] sm:$0xff]  ;;  %v89_v33 = vld [vmem:[%s6867_s1 + $0xe0] sm:$0xff] }
  0x32   :  { %4167 = vmatmul.mubr.msk.f32.gmra.mrb[2].mxu1 %vm96_vm1, %v62_v4  ;;  %v90_v34 = vld [vmem:[%s6867_s1 + $0xe8] sm:$0xff]  ;;  %v91_v35 = vld [vmem:[%s6867_s1 + $0xf0] sm:$0xff]  ;;  %v92_v36 = vld [vmem:[%s6867_s1 + $0xf8] sm:$0xff] }
  0x33   :  { %838 = vmatprep.mubr.f32.mxu1 %v4862_v0  ;;  %v4425_v37 = vld [vmem:[%s6869_s3] sm:$0xff]   ;;  %v4426_v39 = vld [vmem:[%s6869_s3 + $0x8] sm:$0xff]   ;;  %v4427_v40 = vld [vmem:[%s6869_s3 + $0x10] sm:$0xff]  }
  0x34   :  { %4133 = vmatmul.mubr.msk.f32.gmra.mrb[4].mxu0 %vm96_vm1, %v63_v5  ;;  %v4428_v41 = vld [vmem:[%s6869_s3 + $0x18] sm:$0xff]   ;;  %v4429_v42 = vld [vmem:[%s6869_s3 + $0x20] sm:$0xff]   ;;  %v4430_v43 = vld [vmem:[%s6869_s3 + $0x28] sm:$0xff]  }
  0x35   :  { %280 = vmatprep.mubr.f32.mxu0 %v4862_v0  ;;  %1442 = vmatpush1.bf16.msra.mxu0 %v4425_v37  ;;  %v4431_v44 = vld [vmem:[%s6869_s3 + $0x30] sm:$0xff]   ;;  %v4432_v47 = vld [vmem:[%s6869_s3 + $0x38] sm:$0xff]   ;;  %v4433_v52 = vld [vmem:[%s6869_s3 + $0x40] sm:$0xff]  }
  0x36   :  { %4168 = vmatmul.mubr.msk.f32.gmra.mrb[4].mxu1 %vm96_vm1, %v63_v5  ;;  %1443 = vmatprep.subr.bf16.mxu0 %v6875_v38  ;;  %v4434_v61 = vld [vmem:[%s6869_s3 + $0x48] sm:$0xff]   ;;  %v4435_v6 = vld [vmem:[%s6869_s3 + $0x50] sm:$0xff]  }
  0x37   :  { %844 = vmatprep.mubr.f32.mxu1 %v4862_v0 }
  0x38   :  { %4134 = vmatmul.mubr.msk.f32.gmra.mrb[6].mxu0 %vm96_vm1, %v64_v7 }
  0x39   :  { %286 = vmatprep.mubr.f32.mxu0 %v4862_v0  ;;  %1444 = vmatpush1.bf16.msra.mxu0 %v4426_v39 }
  0x3a   :  { %4169 = vmatmul.mubr.msk.f32.gmra.mrb[6].mxu1 %vm96_vm1, %v64_v7  ;;  %1445 = vmatprep.subr.bf16.mxu0 %v6875_v38 }
  0x3b   :  { %850 = vmatprep.mubr.f32.mxu1 %v4862_v0 }
  0x3c   :  { %4135 = vmatmul.mubr.msk.f32.gmra.mrb[8].mxu0 %vm96_vm1, %v65_v9 }
  0x3d   :  { %292 = vmatprep.mubr.f32.mxu0 %v4862_v0  ;;  %1446 = vmatpush1.bf16.msra.mxu0 %v4427_v40 }
  0x3e   :  { %4170 = vmatmul.mubr.msk.f32.gmra.mrb[8].mxu1 %vm96_vm1, %v65_v9  ;;  %1447 = vmatprep.subr.bf16.mxu0 %v6875_v38 }
  0x3f   :  { %856 = vmatprep.mubr.f32.mxu1 %v4862_v0 }
  0x40   :  { %4136 = vmatmul.mubr.msk.f32.gmra.mrb[10].mxu0 %vm96_vm1, %v66_v10 }
  0x41   :  { %298 = vmatprep.mubr.f32.mxu0 %v4862_v0  ;;  %1448 = vmatpush1.bf16.msra.mxu0 %v4428_v41 }
  0x42   :  { %4171 = vmatmul.mubr.msk.f32.gmra.mrb[10].mxu1 %vm96_vm1, %v66_v10  ;;  %1449 = vmatprep.subr.bf16.mxu0 %v6875_v38 }
  0x43   :  { %862 = vmatprep.mubr.f32.mxu1 %v4862_v0 }
  0x44   :  { %4137 = vmatmul.mubr.msk.f32.gmra.mrb[12].mxu0 %vm96_vm1, %v67_v11 }
  0x45   :  { %304 = vmatprep.mubr.f32.mxu0 %v4862_v0  ;;  %1450 = vmatpush1.bf16.msra.mxu0 %v4429_v42 }
  0x46   :  { %4172 = vmatmul.mubr.msk.f32.gmra.mrb[12].mxu1 %vm96_vm1, %v67_v11  ;;  %1451 = vmatprep.subr.bf16.mxu0 %v6875_v38 }
  0x47   :  { %868 = vmatprep.mubr.f32.mxu1 %v4862_v0 }
  0x48   :  { %4138 = vmatmul.mubr.msk.f32.gmra.mrb[14].mxu0 %vm96_vm1, %v68_v12 }
  0x49   :  { %310 = vmatprep.mubr.f32.mxu0 %v4862_v0  ;;  %1452 = vmatpush1.bf16.msra.mxu0 %v4430_v43  ;;  %v4439_v43 = vld [vmem:[%s6869_s3 + $0x70] sm:$0xff]  }
  0x4a   :  { %4173 = vmatmul.mubr.msk.f32.gmra.mrb[14].mxu1 %vm96_vm1, %v68_v12  ;;  %1453 = vmatprep.subr.bf16.mxu0 %v6875_v38 }
  0x4b   :  { %874 = vmatprep.mubr.f32.mxu1 %v4862_v0 }
  0x4c   :  { %4139 = vmatmul.mubr.msk.f32.gmra.mrb[16].mxu0 %vm96_vm1, %v69_v13 }
  0x4d   :  { %316 = vmatprep.mubr.f32.mxu0 %v4862_v0  ;;  %1454 = vmatpush1.bf16.msra.mxu0 %v4431_v44 }
  0x4e   :  { %4174 = vmatmul.mubr.msk.f32.gmra.mrb[16].mxu1 %vm96_vm1, %v69_v13  ;;  %1455 = vmatprep.subr.bf16.mxu0 %v6875_v38 }
  0x4f   :  { %880 = vmatprep.mubr.f32.mxu1 %v4862_v0 }
  0x50   :  { %4140 = vmatmul.mubr.msk.f32.gmra.mrb[18].mxu0 %vm96_vm1, %v70_v14 }
  0x51   :  { %322 = vmatprep.mubr.f32.mxu0 %v4862_v0  ;;  %1456 = vmatpush1.bf16.msra.mxu0 %v4432_v47 }
  0x52   :  { %4175 = vmatmul.mubr.msk.f32.gmra.mrb[18].mxu1 %vm96_vm1, %v70_v14  ;;  %1457 = vmatprep.subr.bf16.mxu0 %v6875_v38 }
  0x53   :  { %886 = vmatprep.mubr.f32.mxu1 %v4862_v0 }
  0x54   :  { %4141 = vmatmul.mubr.msk.f32.gmra.mrb[20].mxu0 %vm96_vm1, %v71_v15 }
  0x55   :  { %328 = vmatprep.mubr.f32.mxu0 %v4862_v0  ;;  %1458 = vmatpush1.bf16.msra.mxu0 %v4433_v52 }
  0x56   :  { %4176 = vmatmul.mubr.msk.f32.gmra.mrb[20].mxu1 %vm96_vm1, %v71_v15  ;;  %1459 = vmatprep.subr.bf16.mxu0 %v6875_v38  ;;  %v4436_v15 = vld [vmem:[%s6869_s3 + $0x58] sm:$0xff]  }
  0x57   :  { %892 = vmatprep.mubr.f32.mxu1 %v4862_v0 }
  0x58   :  { %4142 = vmatmul.mubr.msk.f32.gmra.mrb[22].mxu0 %vm96_vm1, %v72_v16 }
  0x59   :  { %334 = vmatprep.mubr.f32.mxu0 %v4862_v0  ;;  %1460 = vmatpush1.bf16.msra.mxu0 %v4434_v61 }
  0x5a   :  { %4177 = vmatmul.mubr.msk.f32.gmra.mrb[22].mxu1 %vm96_vm1, %v72_v16  ;;  %1461 = vmatprep.subr.bf16.mxu0 %v6875_v38 }
  0x5b   :  { %898 = vmatprep.mubr.f32.mxu1 %v4862_v0 }
  0x5c   :  { %4143 = vmatmul.mubr.msk.f32.gmra.mrb[24].mxu0 %vm96_vm1, %v73_v17 }
  0x5d   :  { %340 = vmatprep.mubr.f32.mxu0 %v4862_v0  ;;  %1462 = vmatpush1.bf16.msra.mxu0 %v4435_v6  ;;  %v4440_v6 = vld [vmem:[%s6869_s3 + $0x78] sm:$0xff]  }
  0x5e   :  { %4178 = vmatmul.mubr.msk.f32.gmra.mrb[24].mxu1 %vm96_vm1, %v73_v17  ;;  %1463 = vmatprep.subr.bf16.mxu0 %v6875_v38 }
  0x5f   :  { %904 = vmatprep.mubr.f32.mxu1 %v4862_v0 }
  0x60   :  { %4144 = vmatmul.mubr.msk.f32.gmra.mrb[26].mxu0 %vm96_vm1, %v74_v18 }
  0x61   :  { %346 = vmatprep.mubr.f32.mxu0 %v4862_v0  ;;  %1464 = vmatpush1.bf16.msra.mxu0 %v4436_v15 }
  0x62   :  { %4179 = vmatmul.mubr.msk.f32.gmra.mrb[26].mxu1 %vm96_vm1, %v74_v18  ;;  %1465 = vmatprep.subr.bf16.mxu0 %v6875_v38 }
  0x63   :  { %910 = vmatprep.mubr.f32.mxu1 %v4862_v0 }
  0x64   :  { %4145 = vmatmul.mubr.msk.f32.gmra.mrb[28].mxu0 %vm96_vm1, %v75_v19 }
  0x65   :  { %352 = vmatprep.mubr.f32.mxu0 %v4862_v0 }
  0x66   :  { %4180 = vmatmul.mubr.msk.f32.gmra.mrb[28].mxu1 %vm96_vm1, %v75_v19 }
  0x67   :  { %916 = vmatprep.mubr.f32.mxu1 %v4862_v0 }
  0x68   :  { %4146 = vmatmul.mubr.msk.f32.gmra.mrb[30].mxu0 %vm96_vm1, %v76_v20 }
  0x69   :  { %358 = vmatprep.mubr.f32.mxu0 %v4862_v0 }
  0x6a   :  { %4181 = vmatmul.mubr.msk.f32.gmra.mrb[30].mxu1 %vm96_vm1, %v76_v20 }
  0x6b   :  { %922 = vmatprep.mubr.f32.mxu1 %v4862_v0 }
  0x6c   :  { %4147 = vmatmul.mubr.msk.f32.gmra.mrb[32].mxu0 %vm96_vm1, %v77_v21 }
  0x6d   :  { %364 = vmatprep.mubr.f32.mxu0 %v4862_v0 }
  0x6e   :  { %4182 = vmatmul.mubr.msk.f32.gmra.mrb[32].mxu1 %vm96_vm1, %v77_v21 }
  0x6f   :  { %928 = vmatprep.mubr.f32.mxu1 %v4862_v0 }
  0x70   :  { %4148 = vmatmul.mubr.msk.f32.gmra.mrb[34].mxu0 %vm96_vm1, %v78_v22 }
  0x71   :  { %370 = vmatprep.mubr.f32.mxu0 %v4862_v0 }
  0x72   :  { %4183 = vmatmul.mubr.msk.f32.gmra.mrb[34].mxu1 %vm96_vm1, %v78_v22 }
  0x73   :  { %934 = vmatprep.mubr.f32.mxu1 %v4862_v0 }
  0x74   :  { %4149 = vmatmul.mubr.msk.f32.gmra.mrb[36].mxu0 %vm96_vm1, %v79_v23 }
  0x75   :  { %376 = vmatprep.mubr.f32.mxu0 %v4862_v0 }
  0x76   :  { %4184 = vmatmul.mubr.msk.f32.gmra.mrb[36].mxu1 %vm96_vm1, %v79_v23 }
  0x77   :  { %940 = vmatprep.mubr.f32.mxu1 %v4862_v0 }
  0x78   :  { %4150 = vmatmul.mubr.msk.f32.gmra.mrb[38].mxu0 %vm96_vm1, %v80_v24 }
  0x79   :  { %382 = vmatprep.mubr.f32.mxu0 %v4862_v0 }
  0x7a   :  { %4185 = vmatmul.mubr.msk.f32.gmra.mrb[38].mxu1 %vm96_vm1, %v80_v24  ;;  %v4437_v24 = vld [vmem:[%s6869_s3 + $0x60] sm:$0xff]  }
  0x7b   :  { %946 = vmatprep.mubr.f32.mxu1 %v4862_v0  ;;  %1466 = vmatpush1.bf16.msra.mxu0 %v4437_v24 }
  0x7c   :  { %4151 = vmatmul.mubr.msk.f32.gmra.mrb[40].mxu0 %vm96_vm1, %v81_v25  ;;  %1467 = vmatprep.subr.bf16.mxu0 %v6875_v38 }
  0x7d   :  { %388 = vmatprep.mubr.f32.mxu0 %v4862_v0 }
  0x7e   :  { %4186 = vmatmul.mubr.msk.f32.gmra.mrb[40].mxu1 %vm96_vm1, %v81_v25 }
  0x7f   :  { %952 = vmatprep.mubr.f32.mxu1 %v4862_v0 }
  0x80   :  { %4152 = vmatmul.mubr.msk.f32.gmra.mrb[42].mxu0 %vm96_vm1, %v82_v26 }
  0x81   :  { %394 = vmatprep.mubr.f32.mxu0 %v4862_v0 }
  0x82   :  { %4187 = vmatmul.mubr.msk.f32.gmra.mrb[42].mxu1 %vm96_vm1, %v82_v26 }
  0x83   :  { %958 = vmatprep.mubr.f32.mxu1 %v4862_v0 }
  0x84   :  { %4153 = vmatmul.mubr.msk.f32.gmra.mrb[44].mxu0 %vm96_vm1, %v83_v27 }
  0x85   :  { %400 = vmatprep.mubr.f32.mxu0 %v4862_v0 }
  0x86   :  { %4188 = vmatmul.mubr.msk.f32.gmra.mrb[44].mxu1 %vm96_vm1, %v83_v27 }
  0x87   :  { %964 = vmatprep.mubr.f32.mxu1 %v4862_v0 }
  0x88   :  { %4154 = vmatmul.mubr.msk.f32.gmra.mrb[46].mxu0 %vm96_vm1, %v84_v28 }
  0x89   :  { %406 = vmatprep.mubr.f32.mxu0 %v4862_v0 }
  0x8a   :  { %4189 = vmatmul.mubr.msk.f32.gmra.mrb[46].mxu1 %vm96_vm1, %v84_v28 }
  0x8b   :  { %970 = vmatprep.mubr.f32.mxu1 %v4862_v0 }
  0x8c   :  { %4155 = vmatmul.mubr.msk.f32.gmra.mrb[48].mxu0 %vm96_vm1, %v85_v29 }
  0x8d   :  { %412 = vmatprep.mubr.f32.mxu0 %v4862_v0 }
  0x8e   :  { %4190 = vmatmul.mubr.msk.f32.gmra.mrb[48].mxu1 %vm96_vm1, %v85_v29 }
  0x8f   :  { %976 = vmatprep.mubr.f32.mxu1 %v4862_v0 }
  0x90   :  { %4156 = vmatmul.mubr.msk.f32.gmra.mrb[50].mxu0 %vm96_vm1, %v86_v30 }
  0x91   :  { %418 = vmatprep.mubr.f32.mxu0 %v4862_v0 }
  0x92   :  { %4191 = vmatmul.mubr.msk.f32.gmra.mrb[50].mxu1 %vm96_vm1, %v86_v30 }
  0x93   :  { %982 = vmatprep.mubr.f32.mxu1 %v4862_v0 }
  0x94   :  { %4157 = vmatmul.mubr.msk.f32.gmra.mrb[52].mxu0 %vm96_vm1, %v87_v31 }
  0x95   :  { %424 = vmatprep.mubr.f32.mxu0 %v4862_v0 }
  0x96   :  { %4192 = vmatmul.mubr.msk.f32.gmra.mrb[52].mxu1 %vm96_vm1, %v87_v31 }
  0x97   :  { %988 = vmatprep.mubr.f32.mxu1 %v4862_v0 }
  0x98   :  { %4158 = vmatmul.mubr.msk.f32.gmra.mrb[54].mxu0 %vm96_vm1, %v88_v32 }
  0x99   :  { %430 = vmatprep.mubr.f32.mxu0 %v4862_v0 }
  0x9a   :  { %4193 = vmatmul.mubr.msk.f32.gmra.mrb[54].mxu1 %vm96_vm1, %v88_v32 }
  0x9b   :  { %994 = vmatprep.mubr.f32.mxu1 %v4862_v0 }
  0x9c   :  { %4159 = vmatmul.mubr.msk.f32.gmra.mrb[56].mxu0 %vm96_vm1, %v89_v33 }
  0x9d   :  { %436 = vmatprep.mubr.f32.mxu0 %v4862_v0 }
  0x9e   :  { %4194 = vmatmul.mubr.msk.f32.gmra.mrb[56].mxu1 %vm96_vm1, %v89_v33  ;;  %v4438_v33 = vld [vmem:[%s6869_s3 + $0x68] sm:$0xff]  }
  0x9f   :  { %1000 = vmatprep.mubr.f32.mxu1 %v4862_v0  ;;  %1468 = vmatpush1.bf16.msra.mxu0 %v4438_v33 }
  0xa0   :  { %4160 = vmatmul.mubr.msk.f32.gmra.mrb[58].mxu0 %vm96_vm1, %v90_v34  ;;  %1469 = vmatprep.subr.bf16.mxu0 %v6875_v38 }
  0xa1   :  { %442 = vmatprep.mubr.f32.mxu0 %v4862_v0 }
  0xa2   :  { %4195 = vmatmul.mubr.msk.f32.gmra.mrb[58].mxu1 %vm96_vm1, %v90_v34 }
  0xa3   :  { %1006 = vmatprep.mubr.f32.mxu1 %v4862_v0  ;;  %1470 = vmatpush1.bf16.msra.mxu0 %v4439_v43 }
  0xa4   :  { %4161 = vmatmul.mubr.msk.f32.gmra.mrb[60].mxu0 %vm96_vm1, %v91_v35  ;;  %1471 = vmatprep.subr.bf16.mxu0 %v6875_v38 }
  0xa5   :  { %448 = vmatprep.mubr.f32.mxu0 %v4862_v0 }
  0xa6   :  { %4196 = vmatmul.mubr.msk.f32.gmra.mrb[60].mxu1 %vm96_vm1, %v91_v35 }
  0xa7   :  { %1012 = vmatprep.mubr.f32.mxu1 %v4862_v0  ;;  %1472 = vmatpush1.bf16.msra.mxu0 %v4440_v6 }
  0xa8   :  { %4162 = vmatmul.mubr.msk.f32.gmra.mrb[62].mxu0 %vm96_vm1, %v92_v36 }
  0xaa   :  { %4197 = vmatmul.mubr.msk.f32.gmra.mrb[62].mxu1 %vm96_vm1, %v92_v36 }
  0xff   :  { %v264_v45 = vpop.f32.mrb[0].mxu0 }
 0x100   :  { %455 = vxpose.xlu1.b32.start [1/16] %v264_v45, 128  ;;  %v5206_v46 = vpop.f32.mrb[1].mxu0 }
 0x101   :  { %v5219_v53 = vpop.f32.mrb[0].mxu1 }
 0x102   :  { %v5221_v55 = vpop.f32.mrb[1].mxu1 }
 0x103   :  { %v270_v48 = vpop.f32.mrb[2].mxu0 }
 0x104   :  { %456 = vxpose.xlu1.b32.cont [2/16] %v270_v48, 128  ;;  %v5212_v49 = vpop.f32.mrb[3].mxu0 }
 0x105   :  { %v5226_v57 = vpop.f32.mrb[2].mxu1 }
 0x106   :  { %v5228_v59 = vpop.f32.mrb[3].mxu1 }
 0x107   :  { %v276_v50 = vpop.f32.mrb[4].mxu0 }
 0x108   :  { %457 = vxpose.xlu1.b32.cont [3/16] %v276_v50, 128  ;;  %v5214_v51 = vpop.f32.mrb[5].mxu0 }
 0x109   :  { %v5235_v62 = vpop.f32.mrb[4].mxu1 }
 0x10a   :  { %v5237_v0 = vpop.f32.mrb[5].mxu1 }
 0x10b   :  { %v282_v54 = vpop.f32.mrb[6].mxu0 }
 0x10c   :  { %458 = vxpose.xlu1.b32.cont [4/16] %v282_v54, 128  ;;  %v5224_v56 = vpop.f32.mrb[7].mxu0 }
 0x10d   :  { %v5242_v2 = vpop.f32.mrb[6].mxu1 }
 0x10e   :  { %v5244_v4 = vpop.f32.mrb[7].mxu1 }
 0x10f   :  { %v288_v58 = vpop.f32.mrb[8].mxu0 }
 0x110   :  { %459 = vxpose.xlu1.b32.cont [5/16] %v288_v58, 128  ;;  %v5230_v60 = vpop.f32.mrb[9].mxu0 }
 0x111   :  { %v5251_v7 = vpop.f32.mrb[8].mxu1 }
 0x112   :  { %v5253_v9 = vpop.f32.mrb[9].mxu1 }
 0x113   :  { %v294_v63 = vpop.f32.mrb[10].mxu0 }
 0x114   :  { %460 = vxpose.xlu1.b32.cont [6/16] %v294_v63, 128  ;;  %v5240_v1 = vpop.f32.mrb[11].mxu0 }
 0x115   :  { %v5258_v11 = vpop.f32.mrb[10].mxu1 }
 0x116   :  { %v5260_v13 = vpop.f32.mrb[11].mxu1 }
 0x117   :  { %v300_v3 = vpop.f32.mrb[12].mxu0 }
 0x118   :  { %461 = vxpose.xlu1.b32.cont [7/16] %v300_v3, 128  ;;  %v5246_v5 = vpop.f32.mrb[13].mxu0 }
 0x119   :  { %v5267_v16 = vpop.f32.mrb[12].mxu1 }
 0x11a   :  { %v5269_v18 = vpop.f32.mrb[13].mxu1 }
 0x11b   :  { %v306_v8 = vpop.f32.mrb[14].mxu0 }
 0x11c   :  { %462 = vxpose.xlu1.b32.cont [8/16] %v306_v8, 128  ;;  %v5256_v10 = vpop.f32.mrb[15].mxu0 }
 0x11d   :  { %v5274_v20 = vpop.f32.mrb[14].mxu1 }
 0x11e   :  { %v5276_v22 = vpop.f32.mrb[15].mxu1 }
 0x11f   :  { %v312_v12 = vpop.f32.mrb[16].mxu0 }
 0x120   :  { %463 = vxpose.xlu1.b32.cont [9/16] %v312_v12, 128  ;;  %v5262_v14 = vpop.f32.mrb[17].mxu0 }
 0x121   :  { %v5283_v25 = vpop.f32.mrb[16].mxu1 }
 0x122   :  { %v5285_v27 = vpop.f32.mrb[17].mxu1 }
 0x123   :  { %v318_v17 = vpop.f32.mrb[18].mxu0 }
 0x124   :  { %464 = vxpose.xlu1.b32.cont [10/16] %v318_v17, 128  ;;  %v5272_v19 = vpop.f32.mrb[19].mxu0 }
 0x125   :  { %v5290_v29 = vpop.f32.mrb[18].mxu1 }
 0x126   :  { %v5292_v31 = vpop.f32.mrb[19].mxu1 }
 0x127   :  { %v324_v21 = vpop.f32.mrb[20].mxu0 }
 0x128   :  { %465 = vxpose.xlu1.b32.cont [11/16] %v324_v21, 128  ;;  %v5278_v23 = vpop.f32.mrb[21].mxu0 }
 0x129   :  { %v5299_v34 = vpop.f32.mrb[20].mxu1 }
 0x12a   :  { %v5301_v36 = vpop.f32.mrb[21].mxu1 }
 0x12b   :  { %v330_v26 = vpop.f32.mrb[22].mxu0  ;;  %6877 = vst [vmem:[#allocation14_spill] sm:$0xff] %v5301_v36 }
 0x12c   :  { %466 = vxpose.xlu1.b32.cont [12/16] %v330_v26, 128  ;;  %v5288_v28 = vpop.f32.mrb[23].mxu0 }
 0x12d   :  { %v5306_v39 = vpop.f32.mrb[22].mxu1 }
 0x12e   :  { %v5308_v41 = vpop.f32.mrb[23].mxu1 }
 0x12f   :  { %v336_v30 = vpop.f32.mrb[24].mxu0  ;;  %6878 = vst [vmem:[#allocation15_spill] sm:$0xff] %v5308_v41 }
 0x130   :  { %467 = vxpose.xlu1.b32.cont [13/16] %v336_v30, 128  ;;  %v5294_v32 = vpop.f32.mrb[25].mxu0 }
 0x131   :  { %v5315_v44 = vpop.f32.mrb[24].mxu1 }
 0x132   :  { %v5317_v47 = vpop.f32.mrb[25].mxu1 }
 0x133   :  { %v342_v35 = vpop.f32.mrb[26].mxu0  ;;  %6879 = vst [vmem:[#allocation16_spill] sm:$0xff] %v5317_v47 }
 0x134   :  { %468 = vxpose.xlu1.b32.cont [14/16] %v342_v35, 128  ;;  %v5304_v37 = vpop.f32.mrb[27].mxu0 }
 0x135   :  { %v5322_v50 = vpop.f32.mrb[26].mxu1 }
 0x136   :  { %v5324_v54 = vpop.f32.mrb[27].mxu1 }
 0x137   :  { %v348_v40 = vpop.f32.mrb[28].mxu0  ;;  %6880 = vst [vmem:[#allocation17_spill] sm:$0xff] %v5324_v54 }
 0x138   :  { %469 = vxpose.xlu1.b32.cont [15/16] %v348_v40, 128  ;;  %v5310_v42 = vpop.f32.mrb[29].mxu0 }
 0x139   :  { %v5329_v61 = vpop.f32.mrb[28].mxu1 }
 0x13a   :  { %v5331_v3 = vpop.f32.mrb[29].mxu1 }
 0x13b   :  { %v354_v45 = vpop.f32.mrb[30].mxu0  ;;  %6881 = vst [vmem:[#allocation18_spill] sm:$0xff] %v5331_v3 }
 0x13c   :  { %470 = vxpose.xlu1.b32.end [16/16] %v354_v45, 128  ;;  %v5320_v48 = vpop.f32.mrb[31].mxu0 }
 0x13d   :  { %v5339_v12 = vpop.f32.mrb[30].mxu1 }
 0x13e   :  { %v5341_v15 = vpop.f32.mrb[31].mxu1 }
 0x13f   :  { %v360_v52 = vpop.f32.mrb[32].mxu0  ;;  %6882 = vst [vmem:[#allocation19_spill] sm:$0xff] %v5341_v15 }
 0x140   :  { %487 = vxpose.xlu1.b32.start [1/16] %v5206_v46, 128  ;;  %519 = vxpose.xlu0.b32.start [1/16] %v360_v52, 128  ;;  %v5327_v58 = vpop.f32.mrb[33].mxu0 }
 0x141   :  { %v5346_v21 = vpop.f32.mrb[32].mxu1 }
 0x142   :  { %v5348_v26 = vpop.f32.mrb[33].mxu1 }
 0x143   :  { %v366_v63 = vpop.f32.mrb[34].mxu0  ;;  %6883 = vst [vmem:[#allocation20_spill] sm:$0xff] %v5348_v26 }
 0x144   :  { %488 = vxpose.xlu1.b32.cont [2/16] %v5212_v49, 128  ;;  %520 = vxpose.xlu0.b32.cont [2/16] %v366_v63, 128  ;;  %v5337_v8 = vpop.f32.mrb[35].mxu0  ;;  %v5350_v49 = vld [vmem:[#allocation5] sm:$0xff]  }
 0x145   :  { %4318 = vmatprep.subr.bf16.mxu0 %v5350_v49  ;;  %4398 = vmatprep.subr.bf16.mxu1 %v5350_v49 }
 0x146   :  { %4406 = vmatpush3.bf16.msra.mxu1 %v5350_v49 }
 0x147   :  { %v372_v46 = vpop.f32.mrb[36].mxu0 }
 0x148   :  { %489 = vxpose.xlu1.b32.cont [3/16] %v5214_v51, 128  ;;  %521 = vxpose.xlu0.b32.cont [3/16] %v372_v46, 128  ;;  %v5344_v17 = vpop.f32.mrb[37].mxu0  ;;  %v5357_v51 = vpop.f32.mrb[34].mxu1 }
 0x149   :  { %v5360_v35 = vpop.f32.mrb[35].mxu1 }
 0x14a   :  { %6884 = vst [vmem:[#allocation21_spill] sm:$0xff] %v5360_v35 }
 0x14b   :  { %v378_v24 = vpop.f32.mrb[38].mxu0 }
 0x14c   :  { %490 = vxpose.xlu1.b32.cont [4/16] %v5224_v56, 128  ;;  %522 = vxpose.xlu0.b32.cont [4/16] %v378_v24, 128  ;;  %v5353_v30 = vpop.f32.mrb[39].mxu0  ;;  %v5365_v56 = vpop.f32.mrb[36].mxu1 }
 0x14d   :  { %v5367_v45 = vpop.f32.mrb[37].mxu1 }
 0x14e   :  { %6885 = vst [vmem:[#allocation22_spill] sm:$0xff] %v5367_v45  ;;  %v5372_v63 = vpop.f32.mrb[38].mxu1 }
 0x14f   :  { %v384_v33 = vpop.f32.mrb[40].mxu0  ;;  %v5374_v46 = vpop.f32.mrb[39].mxu1 }
 0x150   :  { %491 = vxpose.xlu1.b32.cont [5/16] %v5230_v60, 128  ;;  %523 = vxpose.xlu0.b32.cont [5/16] %v384_v33, 128  ;;  %v5363_v40 = vpop.f32.mrb[41].mxu0  ;;  %6886 = vst [vmem:[#allocation23_spill] sm:$0xff] %v5374_v46 }
 0x151   :  { %v5379_v24 = vpop.f32.mrb[40].mxu1 }
 0x152   :  { %v5381_v38 = vpop.f32.mrb[41].mxu1 }
 0x153   :  { %v390_v43 = vpop.f32.mrb[42].mxu0  ;;  %6887 = vst [vmem:[#allocation24_spill] sm:$0xff] %v5381_v38 }
 0x154   :  { %492 = vxpose.xlu1.b32.cont [6/16] %v5240_v1, 128  ;;  %524 = vxpose.xlu0.b32.cont [6/16] %v390_v43, 128  ;;  %v5370_v52 = vpop.f32.mrb[43].mxu0 }
 0x155   :  { %v5386_v43 = vpop.f32.mrb[42].mxu1 }
 0x156   :  { %v5388_v35 = vpop.f32.mrb[43].mxu1 }
 0x157   :  { %v396_v6 = vpop.f32.mrb[44].mxu0  ;;  %6888 = vst [vmem:[#allocation25_spill] sm:$0xff] %v5388_v35 }
 0x158   :  { %493 = vxpose.xlu1.b32.cont [7/16] %v5246_v5, 128  ;;  %525 = vxpose.xlu0.b32.cont [7/16] %v396_v6, 128  ;;  %v5377_v60 = vpop.f32.mrb[45].mxu0 }
 0x159   :  { %v5393_v6 = vpop.f32.mrb[44].mxu1 }
 0x15a   :  { %v5395_v26 = vpop.f32.mrb[45].mxu1 }
 0x15b   :  { %v402_v33 = vpop.f32.mrb[46].mxu0  ;;  %6889 = vst [vmem:[#allocation26_spill] sm:$0xff] %v5395_v26  ;;  %v5411_v26 = vld [vmem:[#allocation5 + $0x8] sm:$0xff]  }
 0x15c   :  { %494 = vxpose.xlu1.b32.cont [8/16] %v5256_v10, 128  ;;  %526 = vxpose.xlu0.b32.cont [8/16] %v402_v33, 128  ;;  %v5384_v1 = vpop.f32.mrb[47].mxu0 }
 0x15d   :  { %v5400_v33 = vpop.f32.mrb[46].mxu1  ;;  %4399 = vmatprep.subr.bf16.mxu1 %v5411_v26 }
 0x15e   :  { %v5402_v15 = vpop.f32.mrb[47].mxu1  ;;  %4407 = vmatpush3.bf16.msra.mxu1 %v5411_v26 }
 0x15f   :  { %v408_v45 = vpop.f32.mrb[48].mxu0  ;;  %6890 = vst [vmem:[#allocation27_spill] sm:$0xff] %v5402_v15 }
 0x160   :  { %495 = vxpose.xlu1.b32.cont [9/16] %v5262_v14, 128  ;;  %527 = vxpose.xlu0.b32.cont [9/16] %v408_v45, 128  ;;  %v5391_v5 = vpop.f32.mrb[49].mxu0 }
 0x161   :  { %v5407_v45 = vpop.f32.mrb[48].mxu1 }
 0x162   :  { %v5409_v3 = vpop.f32.mrb[49].mxu1 }
 0x163   :  { %v414_v46 = vpop.f32.mrb[50].mxu0  ;;  %6891 = vst [vmem:[#allocation28_spill] sm:$0xff] %v5409_v3 }
 0x164   :  { %496 = vxpose.xlu1.b32.cont [10/16] %v5272_v19, 128  ;;  %528 = vxpose.xlu0.b32.cont [10/16] %v414_v46, 128  ;;  %v5398_v10 = vpop.f32.mrb[51].mxu0 }
 0x165   :  { %v5417_v46 = vpop.f32.mrb[50].mxu1 }
 0x167   :  { %v420_v38 = vpop.f32.mrb[52].mxu0 }
 0x168   :  { %497 = vxpose.xlu1.b32.cont [11/16] %v5278_v23, 128  ;;  %529 = vxpose.xlu0.b32.cont [11/16] %v420_v38, 128  ;;  %v5405_v14 = vpop.f32.mrb[53].mxu0  ;;  %v5420_v23 = vpop.f32.mrb[51].mxu1 }
 0x169   :  { %6892 = vst [vmem:[#allocation29_spill] sm:$0xff] %v5420_v23  ;;  %v5425_v15 = vpop.f32.mrb[52].mxu1 }
 0x16a   :  { %6893 = vst [vmem:[#allocation30_spill] sm:$0xff] %v5425_v15 }
 0x16b   :  { %v426_v35 = vpop.f32.mrb[54].mxu0 }
 0x16c   :  { %498 = vxpose.xlu1.b32.cont [12/16] %v5288_v28, 128  ;;  %530 = vxpose.xlu0.b32.cont [12/16] %v426_v35, 128  ;;  %v5414_v19 = vpop.f32.mrb[55].mxu0  ;;  %v5427_v35 = vpop.f32.mrb[53].mxu1 }
 0x16d   :  { %6894 = vst [vmem:[#allocation31_spill] sm:$0xff] %v5427_v35  ;;  %v5432_v47 = vpop.f32.mrb[54].mxu1 }
 0x16e   :  { %v5434_v36 = vpop.f32.mrb[55].mxu1 }
 0x16f   :  { %v432_v38 = vpop.f32.mrb[56].mxu0  ;;  %6895 = vst [vmem:[#allocation32_spill] sm:$0xff] %v5434_v36 }
 0x170   :  { %499 = vxpose.xlu1.b32.cont [13/16] %v5294_v32, 128  ;;  %531 = vxpose.xlu0.b32.cont [13/16] %v432_v38, 128  ;;  %v5423_v3 = vpop.f32.mrb[57].mxu0 }
 0x171   :  { %v5439_v38 = vpop.f32.mrb[56].mxu1 }
 0x172   :  { %v5441_v15 = vpop.f32.mrb[57].mxu1 }
 0x173   :  { %v438_v28 = vpop.f32.mrb[58].mxu0  ;;  %6896 = vst [vmem:[#allocation33_spill] sm:$0xff] %v5441_v15 }
 0x174   :  { %500 = vxpose.xlu1.b32.cont [14/16] %v5304_v37, 128  ;;  %532 = vxpose.xlu0.b32.cont [14/16] %v438_v28, 128  ;;  %v5430_v54 = vpop.f32.mrb[59].mxu0 }
 0x175   :  { %v5446_v28 = vpop.f32.mrb[58].mxu1 }
 0x176   :  { %v5448_v35 = vpop.f32.mrb[59].mxu1 }
 0x177   :  { %v444_v41 = vpop.f32.mrb[60].mxu0 }
 0x178   :  { %501 = vxpose.xlu1.b32.cont [15/16] %v5310_v42, 128  ;;  %533 = vxpose.xlu0.b32.cont [15/16] %v444_v41, 128  ;;  %v5437_v32 = vpop.f32.mrb[61].mxu0 }
 0x179   :  { %v5454_v42 = vpop.f32.mrb[60].mxu1 }
 0x17a   :  { %v5456_v36 = vpop.f32.mrb[61].mxu1 }
 0x17b   :  { %v450_v23 = vpop.f32.mrb[62].mxu0 }
 0x17c   :  { %502 = vxpose.xlu1.b32.end [16/16] %v5320_v48, 128  ;;  %534 = vxpose.xlu0.b32.end [16/16] %v450_v23, 128  ;;  %v5444_v37 = vpop.f32.mrb[63].mxu0 }
 0x17d   :  { %v5462_v23 = vpop.f32.mrb[62].mxu1 }
 0x17e   :  { %v5464_v15 = vpop.f32.mrb[63].mxu1 }
 0x180   :  { %1019 = vxpose.xlu1.b32.start [1/16] %v5219_v53, 128  ;;  %551 = vxpose.xlu0.b32.start [1/16] %v5327_v58, 128  ;;  %v5452_v41 = vpop.trf.xlu1  ;;  %v5470_v58 = vld [vmem:[#allocation5 + $0x10] sm:$0xff]  }
 0x181   :  { %4400 = vmatprep.subr.bf16.mxu1 %v5470_v58 }
 0x182   :  { %4408 = vmatpush3.bf16.msra.mxu1 %v5470_v58 }
 0x184   :  { %1020 = vxpose.xlu1.b32.cont [2/16] %v5226_v57, 128  ;;  %552 = vxpose.xlu0.b32.cont [2/16] %v5337_v8, 128  ;;  %v5460_v48 = vpop.trf.xlu1 }
 0x188   :  { %1021 = vxpose.xlu1.b32.cont [3/16] %v5235_v62, 128  ;;  %553 = vxpose.xlu0.b32.cont [3/16] %v5344_v17, 128  ;;  %v5468_v53 = vpop.trf.xlu1  ;;  %v5506_v17 = vld [vmem:[#allocation5 + $0x18] sm:$0xff]  }
 0x189   :  { %4401 = vmatprep.subr.bf16.mxu1 %v5506_v17 }
 0x18a   :  { %4409 = vmatpush3.bf16.msra.mxu1 %v5506_v17 }
 0x18c   :  { %1022 = vxpose.xlu1.b32.cont [4/16] %v5242_v2, 128  ;;  %554 = vxpose.xlu0.b32.cont [4/16] %v5353_v30, 128  ;;  %v5474_v57 = vpop.trf.xlu1 }
 0x190   :  { %1023 = vxpose.xlu1.b32.cont [5/16] %v5251_v7, 128  ;;  %555 = vxpose.xlu0.b32.cont [5/16] %v5363_v40, 128  ;;  %v5480_v62 = vpop.trf.xlu1 }
 0x194   :  { %1024 = vxpose.xlu1.b32.cont [6/16] %v5258_v11, 128  ;;  %556 = vxpose.xlu0.b32.cont [6/16] %v5370_v52, 128  ;;  %v5484_v8 = vpop.trf.xlu1  ;;  %v57_v52 = vld [vmem:[#allocation2] sm:$0x3] }
 0x198   :  { %1025 = vxpose.xlu1.b32.cont [7/16] %v5267_v16, 128  ;;  %557 = vxpose.xlu0.b32.cont [7/16] %v5377_v60, 128  ;;  %v5488_v2 = vpop.trf.xlu1 }
 0x19c   :  { %1026 = vxpose.xlu1.b32.cont [8/16] %v5274_v20, 128  ;;  %558 = vxpose.xlu0.b32.cont [8/16] %v5384_v1, 128  ;;  %v5492_v7 = vpop.trf.xlu1 }
 0x1a0   :  { %1027 = vxpose.xlu1.b32.cont [9/16] %v5283_v25, 128  ;;  %559 = vxpose.xlu0.b32.cont [9/16] %v5391_v5, 128  ;;  %v5496_v11 = vpop.trf.xlu1 }
 0x1a4   :  { %1028 = vxpose.xlu1.b32.cont [10/16] %v5290_v29, 128  ;;  %560 = vxpose.xlu0.b32.cont [10/16] %v5398_v10, 128  ;;  %v5500_v16 = vpop.trf.xlu1 }
 0x1a8   :  { %1029 = vxpose.xlu1.b32.cont [11/16] %v5299_v34, 128  ;;  %561 = vxpose.xlu0.b32.cont [11/16] %v5405_v14, 128  ;;  %v5504_v20 = vpop.trf.xlu1  ;;  %v584_v34 = vlaneseq }
 0x1aa   :  { %v5522_v30 = vshrl.u32 %v584_v34, 7 }
 0x1ac   :  { %1030 = vxpose.xlu1.b32.cont [12/16] %v5306_v39, 128  ;;  %562 = vxpose.xlu0.b32.cont [12/16] %v5414_v19, 128  ;;  %v5510_v25 = vpop.trf.xlu1 }
 0x1b0   :  { %1031 = vxpose.xlu1.b32.cont [13/16] %v5315_v44, 128  ;;  %563 = vxpose.xlu0.b32.cont [13/16] %v5423_v3, 128  ;;  %v5516_v29 = vpop.trf.xlu1  ;;  %v586_v44 = vsub.s32 0, %v5522_v30  ;;  %v590_v3 = vsub.s32 1, %v5522_v30 }
 0x1b4   :  { %1032 = vxpose.xlu1.b32.cont [14/16] %v5322_v50, 128  ;;  %564 = vxpose.xlu0.b32.cont [14/16] %v5430_v54, 128  ;;  %v5520_v39 = vpop.trf.xlu1  ;;  %v5536_v54 = vrot.slane %v57_v52, %v586_v44 }
 0x1b6   :  { %v596_v5 = vadd.f32 %v5536_v54, %v5460_v48 }
 0x1b8   :  { %1033 = vxpose.xlu1.b32.cont [15/16] %v5329_v61, 128  ;;  %565 = vxpose.xlu0.b32.cont [15/16] %v5437_v32, 128  ;;  %v5526_v40 = vpop.trf.xlu1  ;;  %v5540_v61 = vrot.slane %v57_v52, %v590_v3  ;;  %v660_v32 = vmax.f32 %v596_v5, 0.0  ;;  %v4445_v5 = vld [vmem:[#allocation5 + $0x20] sm:$0xff]  }
 0x1b9   :  { %4402 = vmatprep.subr.bf16.mxu1 %v4445_v5 }
 0x1ba   :  { %4410 = vmatpush3.bf16.msra.mxu1 %v4445_v5 }
 0x1bc   :  { %1034 = vxpose.xlu1.b32.end [16/16] %v5339_v12, 128  ;;  %566 = vxpose.xlu0.b32.end [16/16] %v5444_v37, 128  ;;  %v5532_v50 = vpop.trf.xlu1  ;;  %v594_v12 = vadd.f32 %v5536_v54, %v5452_v41 }
 0x1c0   :  { %1051 = vxpose.xlu1.b32.start [1/16] %v5221_v55, 128  ;;  %v535_v60 = vpop.trf.xlu0  ;;  %1083 = vxpose.xlu0.b32.start [1/16] %v5346_v21, 128  ;;  %v5544_v1 = vpop.trf.xlu1  ;;  %v658_v21 = vmax.f32 %v594_v12, 0.0 }
 0x1c1   :  { %v595_v10 = vadd.f32 %v5540_v61, %v535_v60  ;;  %v600_v60 = vadd.f32 %v5536_v54, %v5474_v57 }
 0x1c3   :  { %v659_v37 = vmax.f32 %v595_v10, 0.0  ;;  %v664_v57 = vmax.f32 %v600_v60, 0.0  ;;  %v606_v60 = vadd.f32 %v5536_v54, %v5488_v2 }
 0x1c4   :  { %1052 = vxpose.xlu1.b32.cont [2/16] %v5228_v59, 128  ;;  %v536_v14 = vpop.trf.xlu0  ;;  %1084 = vxpose.xlu0.b32.cont [2/16] %v5357_v51, 128  ;;  %v5553_v19 = vpop.trf.xlu1  ;;  %v722_v59 = vpack.c.bf16 %v660_v32, %v658_v21  ;;  %v598_v51 = vadd.f32 %v5536_v54, %v5468_v53  ;;  %v602_v32 = vadd.f32 %v5536_v54, %v5480_v62 }
 0x1c5   :  { %v597_v55 = vadd.f32 %v5540_v61, %v536_v14 }
 0x1c6   :  { %v662_v53 = vmax.f32 %v598_v51, 0.0 }
 0x1c7   :  { %v661_v34 = vmax.f32 %v597_v55, 0.0 }
 0x1c8   :  { %1053 = vxpose.xlu1.b32.cont [3/16] %v5237_v0, 128  ;;  %v537_v41 = vpop.trf.xlu0  ;;  %1085 = vxpose.xlu0.b32.cont [3/16] %v5365_v56, 128  ;;  %v5558_v48 = vpop.trf.xlu1 }
 0x1c9   :  { %v723_v52 = vpack.c.bf16 %v661_v34, %v659_v37  ;;  %v599_v12 = vadd.f32 %v5540_v61, %v537_v41  ;;  %v724_v37 = vpack.c.bf16 %v664_v57, %v662_v53  ;;  %v666_v41 = vmax.f32 %v602_v32, 0.0 }
 0x1cb   :  { %1473 = vmatprep.mubr.bf16.mxu0 %v723_v52  ;;  %v663_v14 = vmax.f32 %v599_v12, 0.0 }
 0x1cc   :  { %1054 = vxpose.xlu1.b32.cont [4/16] %v5244_v4, 128  ;;  %v538_v0 = vpop.trf.xlu0  ;;  %1086 = vxpose.xlu0.b32.cont [4/16] %v5372_v63, 128  ;;  %v5567_v56 = vpop.trf.xlu1 }
 0x1cd   :  { %v601_v10 = vadd.f32 %v5540_v61, %v538_v0  ;;  %1474 = vmatmul.mubr.bf16.vlgmr.msra.gmra.mrb[64].mxu0 %v722_v59 }
 0x1ce   :  { %4319 = vmatpush3.bf16.msra.mxu0 %v5350_v49  ;;  %v604_v49 = vadd.f32 %v5536_v54, %v5484_v8 }
 0x1cf   :  { %v665_v55 = vmax.f32 %v601_v10, 0.0  ;;  %4320 = vmatprep.subr.bf16.mxu0 %v5411_v26 }
 0x1d0   :  { %1055 = vxpose.xlu1.b32.cont [5/16] %v5253_v9, 128  ;;  %v539_v4 = vpop.trf.xlu0  ;;  %1087 = vxpose.xlu0.b32.cont [5/16] %v5379_v24, 128  ;;  %v5574_v63 = vpop.trf.xlu1  ;;  %v668_v8 = vmax.f32 %v604_v49, 0.0 }
 0x1d1   :  { %v725_v21 = vpack.c.bf16 %v665_v55, %v663_v14  ;;  %v603_v34 = vadd.f32 %v5540_v61, %v539_v4  ;;  %v612_v55 = vadd.f32 %v5536_v54, %v5500_v16 }
 0x1d2   :  { %4321 = vmatpush3.bf16.msra.mxu0 %v5411_v26  ;;  %v726_v51 = vpack.c.bf16 %v668_v8, %v666_v41  ;;  %v616_v41 = vadd.f32 %v5536_v54, %v5510_v25 }
 0x1d3   :  { %1481 = vmatprep.mubr.bf16.mxu0 %v725_v21  ;;  %4322 = vmatprep.subr.bf16.mxu0 %v5470_v58  ;;  %v667_v26 = vmax.f32 %v603_v34, 0.0  ;;  %v676_v32 = vmax.f32 %v612_v55, 0.0  ;;  %v6898_v34 = vld [vmem:[#allocation30_spill] sm:$0xff] }
 0x1d4   :  { %1056 = vxpose.xlu1.b32.cont [6/16] %v5260_v13, 128  ;;  %v540_v9 = vpop.trf.xlu0  ;;  %1088 = vxpose.xlu0.b32.cont [6/16] %v5386_v43, 128  ;;  %v5585_v24 = vpop.trf.xlu1 }
 0x1d5   :  { %v605_v62 = vadd.f32 %v5540_v61, %v540_v9  ;;  %1482 = vmatmul.mubr.bf16.gmra.mrb[68].mxu0 %v724_v37  ;;  %v6897_v37 = vld [vmem:[#allocation14_spill] sm:$0xff] }
 0x1d6   :  { %4323 = vmatpush3.bf16.msra.mxu0 %v5470_v58  ;;  %v608_v58 = vadd.f32 %v5536_v54, %v5492_v7 }
 0x1d7   :  { %v669_v52 = vmax.f32 %v605_v62, 0.0  ;;  %4324 = vmatprep.subr.bf16.mxu0 %v5506_v17 }
 0x1d8   :  { %1057 = vxpose.xlu1.b32.cont [7/16] %v5269_v18, 128  ;;  %v541_v59 = vpop.trf.xlu0  ;;  %1089 = vxpose.xlu0.b32.cont [7/16] %v5393_v6, 128  ;;  %v5592_v13 = vpop.trf.xlu1  ;;  %v672_v2 = vmax.f32 %v608_v58, 0.0 }
 0x1d9   :  { %v727_v43 = vpack.c.bf16 %v669_v52, %v667_v26  ;;  %v607_v12 = vadd.f32 %v5540_v61, %v541_v59  ;;  %v4446_v26 = vld [vmem:[#allocation5 + $0x28] sm:$0xff]  }
 0x1da   :  { %4325 = vmatpush3.bf16.msra.mxu0 %v5506_v17  ;;  %v670_v17 = vmax.f32 %v606_v60, 0.0  ;;  %v6899_v52 = vld [vmem:[#allocation15_spill] sm:$0xff]  ;;  %4403 = vmatprep.subr.bf16.mxu1 %v4446_v26  ;;  %v680_v60 = vmax.f32 %v616_v41, 0.0  ;;  %v6904_v41 = vld [vmem:[#allocation20_spill] sm:$0xff] }
 0x1db   :  { %1489 = vmatprep.mubr.bf16.mxu0 %v727_v43  ;;  %4326 = vmatprep.subr.bf16.mxu0 %v4445_v5  ;;  %v671_v10 = vmax.f32 %v607_v12, 0.0  ;;  %v6900_v12 = vld [vmem:[#allocation16_spill] sm:$0xff] }
 0x1dc   :  { %1058 = vxpose.xlu1.b32.cont [8/16] %v5276_v22, 128  ;;  %v542_v18 = vpop.trf.xlu0  ;;  %1090 = vxpose.xlu0.b32.cont [8/16] %v5400_v33, 128  ;;  %v5602_v6 = vpop.trf.xlu1  ;;  %v728_v14 = vpack.c.bf16 %v672_v2, %v670_v17  ;;  %v610_v33 = vadd.f32 %v5536_v54, %v5496_v11  ;;  %v618_v2 = vadd.f32 %v5536_v54, %v5516_v29 }
 0x1dd   :  { %v609_v0 = vadd.f32 %v5540_v61, %v542_v18  ;;  %1490 = vmatmul.mubr.bf16.gmra.mrb[72].mxu0 %v726_v51  ;;  %4411 = vmatpush3.bf16.msra.mxu1 %v4446_v26 }
 0x1de   :  { %4327 = vmatpush3.bf16.msra.mxu0 %v4445_v5  ;;  %v674_v21 = vmax.f32 %v610_v33, 0.0  ;;  %v682_v33 = vmax.f32 %v618_v2, 0.0 }
 0x1df   :  { %v673_v53 = vmax.f32 %v609_v0, 0.0  ;;  %4328 = vmatprep.subr.bf16.mxu0 %v4446_v26 }
 0x1e0   :  { %1059 = vxpose.xlu1.b32.cont [9/16] %v5285_v27, 128  ;;  %v543_v7 = vpop.trf.xlu0  ;;  %1091 = vxpose.xlu0.b32.cont [9/16] %v5407_v45, 128  ;;  %v5607_v57 = vpop.trf.xlu1  ;;  %v730_v62 = vpack.c.bf16 %v676_v32, %v674_v21 }
 0x1e1   :  { %v729_v22 = vpack.c.bf16 %v673_v53, %v671_v10  ;;  %v611_v5 = vadd.f32 %v5540_v61, %v543_v7  ;;  %v620_v10 = vadd.f32 %v5536_v54, %v5520_v39  ;;  %v6901_v7 = vld [vmem:[#allocation17_spill] sm:$0xff] }
 0x1e2   :  { %4329 = vmatpush3.bf16.msra.mxu0 %v4446_v26 }
 0x1e3   :  { %1497 = vmatprep.mubr.bf16.mxu0 %v729_v22  ;;  %v675_v49 = vmax.f32 %v611_v5, 0.0  ;;  %v684_v55 = vmax.f32 %v620_v10, 0.0 }
 0x1e4   :  { %1060 = vxpose.xlu1.b32.cont [10/16] %v5292_v31, 128  ;;  %v544_v4 = vpop.trf.xlu0  ;;  %1092 = vxpose.xlu0.b32.cont [10/16] %v5417_v46, 128  ;;  %v5616_v27 = vpop.trf.xlu1  ;;  %v614_v46 = vadd.f32 %v5536_v54, %v5504_v20 }
 0x1e5   :  { %v613_v45 = vadd.f32 %v5540_v61, %v544_v4  ;;  %1498 = vmatmul.mubr.bf16.gmra.mrb[76].mxu0 %v728_v14  ;;  %v6902_v4 = vld [vmem:[#allocation18_spill] sm:$0xff]  ;;  %v734_v32 = vpack.c.bf16 %v684_v55, %v682_v33  ;;  %v4447_v33 = vld [vmem:[#allocation5 + $0x30] sm:$0xff]  }
 0x1e6   :  { %v678_v20 = vmax.f32 %v614_v46, 0.0  ;;  %v6907_v55 = vld [vmem:[#allocation23_spill] sm:$0xff]  ;;  %4330 = vmatprep.subr.bf16.mxu0 %v4447_v33  ;;  %4404 = vmatprep.subr.bf16.mxu1 %v4447_v33 }
 0x1e7   :  { %v677_v11 = vmax.f32 %v613_v45, 0.0  ;;  %4331 = vmatpush3.bf16.msra.mxu0 %v4447_v33  ;;  %4412 = vmatpush3.bf16.msra.mxu1 %v4447_v33  ;;  %v644_v33 = vadd.f32 %v5536_v54, %v5616_v27 }
 0x1e8   :  { %1061 = vxpose.xlu1.b32.cont [11/16] %v6897_v37, 128  ;;  %v545_v16 = vpop.trf.xlu0  ;;  %1093 = vxpose.xlu0.b32.cont [11/16] %v6898_v34, 128  ;;  %v5621_v9 = vpop.trf.xlu1  ;;  %v732_v17 = vpack.c.bf16 %v680_v60, %v678_v20  ;;  %v6903_v37 = vld [vmem:[#allocation19_spill] sm:$0xff]  ;;  %v6905_v20 = vld [vmem:[#allocation21_spill] sm:$0xff] }
 0x1e9   :  { %v731_v31 = vpack.c.bf16 %v677_v11, %v675_v49  ;;  %v615_v8 = vadd.f32 %v5540_v61, %v545_v16  ;;  %v624_v11 = vadd.f32 %v5536_v54, %v5532_v50  ;;  %v646_v27 = vadd.f32 %v5536_v54, %v5621_v9  ;;  %v4448_v9 = vld [vmem:[#allocation5 + $0x38] sm:$0xff]  }
 0x1ea   :  { %4332 = vmatprep.subr.bf16.mxu0 %v4448_v9  ;;  %4405 = vmatprep.subr.bf16.mxu1 %v4448_v9 }
 0x1eb   :  { %1505 = vmatprep.mubr.bf16.mxu0 %v731_v31  ;;  %v679_v25 = vmax.f32 %v615_v8, 0.0  ;;  %v688_v46 = vmax.f32 %v624_v11, 0.0  ;;  %v634_v11 = vadd.f32 %v5536_v54, %v5574_v63  ;;  %v6910_v63 = vld [vmem:[#allocation26_spill] sm:$0xff]  ;;  %4333 = vmatpush3.bf16.msra.mxu0 %v4448_v9 }
 0x1ec   :  { %1062 = vxpose.xlu1.b32.cont [12/16] %v6899_v52, 128  ;;  %v546_v59 = vpop.trf.xlu0  ;;  %1094 = vxpose.xlu0.b32.cont [12/16] %v5432_v47, 128  ;;  %v5630_v43 = vpop.trf.xlu1  ;;  %v626_v52 = vadd.f32 %v5536_v54, %v5544_v1  ;;  %v6906_v1 = vld [vmem:[#allocation22_spill] sm:$0xff] }
 0x1ed   :  { %v617_v51 = vadd.f32 %v5540_v61, %v546_v59  ;;  %1506 = vmatmul.mubr.bf16.gmra.mrb[80].mxu0 %v730_v62  ;;  %v628_v59 = vadd.f32 %v5536_v54, %v5553_v19  ;;  %v630_v19 = vadd.f32 %v5536_v54, %v5558_v48  ;;  %4413 = vmatpush3.bf16.msra.mxu1 %v4448_v9 }
 0x1ef   :  { %v681_v58 = vmax.f32 %v617_v51, 0.0 }
 0x1f0   :  { %1063 = vxpose.xlu1.b32.cont [13/16] %v6900_v12, 128  ;;  %v547_v18 = vpop.trf.xlu0  ;;  %1095 = vxpose.xlu0.b32.cont [13/16] %v5439_v38, 128  ;;  %v5635_v0 = vpop.trf.xlu1  ;;  %v690_v12 = vmax.f32 %v626_v52, 0.0 }
 0x1f1   :  { %v733_v47 = vpack.c.bf16 %v681_v58, %v679_v25  ;;  %v619_v53 = vadd.f32 %v5540_v61, %v547_v18 }
 0x1f3   :  { %1513 = vmatprep.mubr.bf16.mxu0 %v733_v47  ;;  %v683_v5 = vmax.f32 %v619_v53, 0.0  ;;  %v692_v47 = vmax.f32 %v628_v59, 0.0 }
 0x1f4   :  { %1064 = vxpose.xlu1.b32.cont [14/16] %v6901_v7, 128  ;;  %v548_v22 = vpop.trf.xlu0  ;;  %1096 = vxpose.xlu0.b32.cont [14/16] %v5446_v28, 128  ;;  %v5644_v14 = vpop.trf.xlu1  ;;  %v622_v28 = vadd.f32 %v5536_v54, %v5526_v40 }
 0x1f5   :  { %v621_v38 = vadd.f32 %v5540_v61, %v548_v22  ;;  %1514 = vmatmul.mubr.bf16.gmra.mrb[84].mxu0 %v732_v17  ;;  %v632_v22 = vadd.f32 %v5536_v54, %v5567_v56  ;;  %v6908_v56 = vld [vmem:[#allocation24_spill] sm:$0xff] }
 0x1f6   :  { %v686_v31 = vmax.f32 %v622_v28, 0.0 }
 0x1f7   :  { %v685_v29 = vmax.f32 %v621_v38, 0.0  ;;  %v738_v38 = vpack.c.bf16 %v692_v47, %v690_v12  ;;  %v696_v48 = vmax.f32 %v632_v22, 0.0  ;;  %v6911_v12 = vld [vmem:[#allocation27_spill] sm:$0xff] }
 0x1f8   :  { %1065 = vxpose.xlu1.b32.cont [15/16] %v6902_v4, 128  ;;  %v549_v39 = vpop.trf.xlu0  ;;  %1097 = vxpose.xlu0.b32.cont [15/16] %v5454_v42, 128  ;;  %v5649_v45 = vpop.trf.xlu1  ;;  %v736_v51 = vpack.c.bf16 %v688_v46, %v686_v31  ;;  %v694_v4 = vmax.f32 %v630_v19, 0.0  ;;  %v6909_v31 = vld [vmem:[#allocation25_spill] sm:$0xff] }
 0x1f9   :  { %v735_v21 = vpack.c.bf16 %v685_v29, %v683_v5  ;;  %v623_v49 = vadd.f32 %v5540_v61, %v549_v39 }
 0x1fb   :  { %1521 = vmatprep.mubr.bf16.mxu0 %v735_v21  ;;  %v687_v62 = vmax.f32 %v623_v49, 0.0 }
 0x1fc   :  { %1066 = vxpose.xlu1.b32.end [16/16] %v6903_v37, 128  ;;  %v550_v16 = vpop.trf.xlu0  ;;  %1098 = vxpose.xlu0.b32.end [16/16] %v5462_v23, 128  ;;  %v5658_v34 = vpop.trf.xlu1 }
 0x1fd   :  { %v625_v42 = vadd.f32 %v5540_v61, %v550_v16  ;;  %1522 = vmatmul.mubr.bf16.gmra.mrb[88].mxu0 %v734_v32  ;;  %v636_v16 = vadd.f32 %v5536_v54, %v5585_v24  ;;  %v638_v24 = vadd.f32 %v5536_v54, %v5592_v13  ;;  %v6912_v13 = vld [vmem:[#allocation28_spill] sm:$0xff] }
 0x1ff   :  { %v689_v40 = vmax.f32 %v625_v42, 0.0  ;;  %v740_v42 = vpack.c.bf16 %v696_v48, %v694_v4 }
 0x200   :  { %1115 = vxpose.xlu0.b32.start [1/16] %v6904_v41, 128  ;;  %v567_v8 = vpop.trf.xlu0  ;;  %v5662_v26 = vpop.trf.xlu1  ;;  %v698_v41 = vmax.f32 %v634_v11, 0.0 }
 0x201   :  { %v737_v50 = vpack.c.bf16 %v689_v40, %v687_v62  ;;  %v627_v23 = vadd.f32 %v5540_v61, %v567_v8 }
 0x203   :  { %1529 = vmatprep.mubr.bf16.mxu0 %v737_v50  ;;  %v691_v18 = vmax.f32 %v627_v23, 0.0  ;;  %v700_v50 = vmax.f32 %v636_v16, 0.0  ;;  %v648_v16 = vadd.f32 %v5536_v54, %v5630_v43  ;;  %v650_v43 = vadd.f32 %v5536_v54, %v5635_v0 }
 0x204   :  { %1116 = vxpose.xlu0.b32.cont [2/16] %v6905_v20, 128  ;;  %v568_v60 = vpop.trf.xlu0  ;;  %v5670_v25 = vpop.trf.xlu1  ;;  %v640_v20 = vadd.f32 %v5536_v54, %v5602_v6  ;;  %v642_v6 = vadd.f32 %v5536_v54, %v5607_v57  ;;  %v6914_v57 = vld [vmem:[#allocation31_spill] sm:$0xff] }
 0x205   :  { %v629_v58 = vadd.f32 %v5540_v61, %v568_v60  ;;  %1530 = vmatmul.mubr.bf16.gmra.mrb[92].mxu0 %v736_v51  ;;  %v742_v60 = vpack.c.bf16 %v700_v50, %v698_v41 }
 0x207   :  { %v693_v17 = vmax.f32 %v629_v58, 0.0 }
 0x208   :  { %1117 = vxpose.xlu0.b32.cont [3/16] %v6906_v1, 128  ;;  %v569_v2 = vpop.trf.xlu0  ;;  %v5674_v53 = vpop.trf.xlu1 }
 0x209   :  { %v739_v10 = vpack.c.bf16 %v693_v17, %v691_v18  ;;  %v631_v7 = vadd.f32 %v5540_v61, %v569_v2  ;;  %v702_v17 = vmax.f32 %v638_v24, 0.0  ;;  %v704_v2 = vmax.f32 %v640_v20, 0.0 }
 0x20a   :  { %v652_v20 = vadd.f32 %v5536_v54, %v5644_v14 }
 0x20b   :  { %1537 = vmatprep.mubr.bf16.mxu0 %v739_v10  ;;  %v695_v39 = vmax.f32 %v631_v7, 0.0 }
 0x20c   :  { %1118 = vxpose.xlu0.b32.cont [4/16] %v6907_v55, 128  ;;  %v570_v5 = vpop.trf.xlu0  ;;  %v5683_v32 = vpop.trf.xlu1  ;;  %v744_v55 = vpack.c.bf16 %v704_v2, %v702_v17  ;;  %v714_v17 = vmax.f32 %v650_v43, 0.0 }
 0x20d   :  { %v633_v29 = vadd.f32 %v5540_v61, %v570_v5  ;;  %1538 = vmatmul.mubr.bf16.gmra.mrb[96].mxu0 %v738_v38  ;;  %v6913_v5 = vld [vmem:[#allocation29_spill] sm:$0xff] }
 0x20f   :  { %v697_v21 = vmax.f32 %v633_v29, 0.0 }
 0x210   :  { %1119 = vxpose.xlu0.b32.cont [5/16] %v6908_v56, 128  ;;  %v571_v28 = vpop.trf.xlu0  ;;  %v5693_v40 = vpop.trf.xlu1 }
 0x211   :  { %v741_v49 = vpack.c.bf16 %v697_v21, %v695_v39  ;;  %v635_v37 = vadd.f32 %v5540_v61, %v571_v28  ;;  %v706_v39 = vmax.f32 %v642_v6, 0.0  ;;  %v708_v21 = vmax.f32 %v644_v33, 0.0 }
 0x213   :  { %1545 = vmatprep.mubr.bf16.mxu0 %v741_v49  ;;  %v699_v8 = vmax.f32 %v635_v37, 0.0 }
 0x214   :  { %1120 = vxpose.xlu0.b32.cont [6/16] %v6909_v31, 128  ;;  %v572_v62 = vpop.trf.xlu0  ;;  %v5701_v58 = vpop.trf.xlu1  ;;  %v6915_v31 = vld [vmem:[#allocation32_spill] sm:$0xff] }
 0x215   :  { %v637_v46 = vadd.f32 %v5540_v61, %v572_v62  ;;  %1546 = vmatmul.mubr.bf16.gmra.mrb[100].mxu0 %v740_v42  ;;  %v746_v42 = vpack.c.bf16 %v708_v21, %v706_v39 }
 0x217   :  { %v701_v52 = vmax.f32 %v637_v46, 0.0 }
 0x218   :  { %1121 = vxpose.xlu0.b32.cont [7/16] %v6910_v63, 128  ;;  %v573_v23 = vpop.trf.xlu0  ;;  %v5706_v22 = vpop.trf.xlu1 }
 0x219   :  { %v743_v59 = vpack.c.bf16 %v701_v52, %v699_v8  ;;  %v639_v51 = vadd.f32 %v5540_v61, %v573_v23  ;;  %v710_v8 = vmax.f32 %v646_v27, 0.0  ;;  %v712_v52 = vmax.f32 %v648_v16, 0.0  ;;  %v6916_v23 = vld [vmem:[#allocation33_spill] sm:$0xff] }
 0x21b   :  { %1553 = vmatprep.mubr.bf16.mxu0 %v743_v59  ;;  %v703_v1 = vmax.f32 %v639_v51, 0.0 }
 0x21c   :  { %1122 = vxpose.xlu0.b32.cont [8/16] %v6911_v12, 128  ;;  %v574_v18 = vpop.trf.xlu0  ;;  %v5715_v28 = vpop.trf.xlu1 }
 0x21d   :  { %v641_v47 = vadd.f32 %v5540_v61, %v574_v18  ;;  %1554 = vmatmul.mubr.bf16.gmra.mrb[104].mxu0 %v742_v60  ;;  %v748_v60 = vpack.c.bf16 %v712_v52, %v710_v8 }
 0x21f   :  { %v705_v10 = vmax.f32 %v641_v47, 0.0 }
 0x220   :  { %1123 = vxpose.xlu0.b32.cont [9/16] %v6912_v13, 128  ;;  %v575_v19 = vpop.trf.xlu0  ;;  %v5725_v41 = vpop.trf.xlu1 }
 0x221   :  { %v745_v7 = vpack.c.bf16 %v705_v10, %v703_v1  ;;  %v643_v38 = vadd.f32 %v5540_v61, %v575_v19  ;;  %v716_v1 = vmax.f32 %v652_v20, 0.0  ;;  %v654_v19 = vadd.f32 %v5536_v54, %v5649_v45 }
 0x222   :  { %v1157_v20 = vadd.f32 %v5701_v58, %v5536_v54  ;;  %v1161_v58 = vadd.f32 %v5715_v28, %v5536_v54 }
 0x223   :  { %1561 = vmatprep.mubr.bf16.mxu0 %v745_v7  ;;  %v707_v48 = vmax.f32 %v643_v38, 0.0  ;;  %v750_v6 = vpack.c.bf16 %v716_v1, %v714_v17 }
 0x224   :  { %1124 = vxpose.xlu0.b32.cont [10/16] %v6913_v5, 128  ;;  %v576_v29 = vpop.trf.xlu0  ;;  %v5733_v12 = vpop.trf.xlu1  ;;  %v1221_v1 = vmax.f32 %v1157_v20, 0.0 }
 0x225   :  { %v645_v4 = vadd.f32 %v5540_v61, %v576_v29  ;;  %1562 = vmatmul.mubr.bf16.gmra.mrb[108].mxu0 %v744_v55  ;;  %v1165_v28 = vadd.f32 %v5733_v12, %v5536_v54 }
 0x227   :  { %v709_v56 = vmax.f32 %v645_v4, 0.0 }
 0x228   :  { %1125 = vxpose.xlu0.b32.cont [11/16] %v6914_v57, 128  ;;  %v577_v49 = vpop.trf.xlu0  ;;  %v5738_v14 = vpop.trf.xlu1 }
 0x229   :  { %v747_v11 = vpack.c.bf16 %v709_v56, %v707_v48  ;;  %v647_v37 = vadd.f32 %v5540_v61, %v577_v49  ;;  %v1147_v48 = vadd.f32 %v5662_v26, %v5536_v54  ;;  %v1151_v26 = vadd.f32 %v5674_v53, %v5536_v54 }
 0x22b   :  { %1569 = vmatprep.mubr.bf16.mxu0 %v747_v11  ;;  %v711_v50 = vmax.f32 %v647_v37, 0.0  ;;  %v1211_v11 = vmax.f32 %v1147_v48, 0.0 }
 0x22c   :  { %1126 = vxpose.xlu0.b32.cont [12/16] %v6915_v31, 128  ;;  %v578_v62 = vpop.trf.xlu0  ;;  %v5747_v4 = vpop.trf.xlu1 }
 0x22d   :  { %v649_v46 = vadd.f32 %v5540_v61, %v578_v62  ;;  %1570 = vmatmul.mubr.bf16.gmra.mrb[112].mxu0 %v746_v42 }
 0x22f   :  { %v713_v63 = vmax.f32 %v649_v46, 0.0 }
 0x230   :  { %1127 = vxpose.xlu0.b32.cont [13/16] %v6916_v23, 128  ;;  %v579_v59 = vpop.trf.xlu0  ;;  %v5755_v49 = vpop.trf.xlu1 }
 0x231   :  { %v749_v24 = vpack.c.bf16 %v713_v63, %v711_v50  ;;  %v651_v51 = vadd.f32 %v5540_v61, %v579_v59  ;;  %v1215_v63 = vmax.f32 %v1151_v26, 0.0  ;;  %v1169_v26 = vadd.f32 %v5747_v4, %v5536_v54 }
 0x233   :  { %1577 = vmatprep.mubr.bf16.mxu0 %v749_v24  ;;  %v715_v0 = vmax.f32 %v651_v51, 0.0  ;;  %v1155_v51 = vadd.f32 %v5693_v40, %v5536_v54  ;;  %v1159_v40 = vadd.f32 %v5706_v22, %v5536_v54  ;;  %v1163_v22 = vadd.f32 %v5725_v41, %v5536_v54 }
 0x234   :  { %1128 = vxpose.xlu0.b32.cont [14/16] %v5448_v35, 128  ;;  %v580_v18 = vpop.trf.xlu0  ;;  %v656_v35 = vadd.f32 %v5536_v54, %v5658_v34  ;;  %v5762_v8 = vpop.trf.xlu1  ;;  %v1167_v41 = vadd.f32 %v5738_v14, %v5536_v54  ;;  %v1171_v14 = vadd.f32 %v5755_v49, %v5536_v54 }
 0x235   :  { %v653_v47 = vadd.f32 %v5540_v61, %v580_v18  ;;  %1578 = vmatmul.mubr.bf16.gmra.mrb[116].mxu0 %v748_v60  ;;  %v1219_v17 = vmax.f32 %v1155_v51, 0.0  ;;  %v1173_v4 = vadd.f32 %v5762_v8, %v5536_v54 }
 0x236   :  { %v720_v5 = vmax.f32 %v656_v35, 0.0 }
 0x237   :  { %v717_v2 = vmax.f32 %v653_v47, 0.0  ;;  %v1279_v35 = vpack.c.bf16 %v1221_v1, %v1219_v17  ;;  %v1237_v17 = vmax.f32 %v1173_v4, 0.0 }
 0x238   :  { %1129 = vxpose.xlu0.b32.cont [15/16] %v5456_v36, 128  ;;  %v581_v10 = vpop.trf.xlu0  ;;  %v718_v36 = vmax.f32 %v654_v19, 0.0  ;;  %v5765_v53 = vpop.trf.xlu1 }
 0x239   :  { %v751_v13 = vpack.c.bf16 %v717_v2, %v715_v0  ;;  %v655_v7 = vadd.f32 %v5540_v61, %v581_v10  ;;  %v1175_v49 = vadd.f32 %v5765_v53, %v5536_v54 }
 0x23a   :  { %v752_v21 = vpack.c.bf16 %v720_v5, %v718_v36  ;;  %v1223_v36 = vmax.f32 %v1159_v40, 0.0  ;;  %v1225_v5 = vmax.f32 %v1161_v58, 0.0 }
 0x23b   :  { %1585 = vmatprep.mubr.bf16.mxu0 %v751_v13  ;;  %v719_v55 = vmax.f32 %v655_v7, 0.0 }
 0x23c   :  { %1130 = vxpose.xlu0.b32.end [16/16] %v5464_v15, 128  ;;  %v582_v38 = vpop.trf.xlu0  ;;  %v1149_v15 = vadd.f32 %v5670_v25, %v5536_v54  ;;  %v1153_v25 = vadd.f32 %v5683_v32, %v5536_v54  ;;  %v5773_v10 = vpop.trf.xlu1 }
 0x23d   :  { %v657_v33 = vadd.f32 %v5540_v61, %v582_v38  ;;  %1586 = vmatmul.mubr.bf16.gmra.mrb[120].mxu0 %v750_v6  ;;  %v1177_v8 = vadd.f32 %v5773_v10, %v5536_v54 }
 0x23e   :  { %v1213_v37 = vmax.f32 %v1149_v15, 0.0  ;;  %v1217_v23 = vmax.f32 %v1153_v25, 0.0 }
 0x23f   :  { %v721_v29 = vmax.f32 %v657_v33, 0.0 }
 0x240   :  { %v1099_v45 = vpop.trf.xlu0  ;;  %v1275_v46 = vpack.c.bf16 %v1213_v37, %v1211_v11  ;;  %v1277_v60 = vpack.c.bf16 %v1217_v23, %v1215_v63  ;;  %v5781_v33 = vpop.trf.xlu1  ;;  %v1233_v63 = vmax.f32 %v1169_v26, 0.0 }
 0x241   :  { %v753_v39 = vpack.c.bf16 %v721_v29, %v719_v55  ;;  %v1148_v34 = vadd.f32 %v1099_v45, %v5540_v61  ;;  %v1179_v53 = vadd.f32 %v5781_v33, %v5536_v54 }
 0x243   :  { %1593 = vmatprep.mubr.bf16.mxu0 %v753_v39  ;;  %v1212_v27 = vmax.f32 %v1148_v34, 0.0  ;;  %v1281_v34 = vpack.c.bf16 %v1225_v5, %v1223_v36 }
 0x244   :  { %v1100_v56 = vpop.trf.xlu0  ;;  %v1068_v15 = vpop.trf.xlu1 }
 0x245   :  { %v1150_v57 = vadd.f32 %v1100_v56, %v5540_v61  ;;  %1594 = vmatmul.mubr.bf16.gmra.mrb[124].mxu0 %v752_v21  ;;  %v1181_v10 = vadd.f32 %v1068_v15, %v5536_v54 }
 0x247   :  { %v1214_v16 = vmax.f32 %v1150_v57, 0.0  ;;  %v1227_v57 = vmax.f32 %v1163_v22, 0.0 }
 0x248   :  { %v1101_v42 = vpop.trf.xlu0 }
 0x249   :  { %v1276_v31 = vpack.c.bf16 %v1214_v16, %v1212_v27  ;;  %v1152_v62 = vadd.f32 %v1101_v42, %v5540_v61  ;;  %v1229_v27 = vmax.f32 %v1165_v28, 0.0  ;;  %v1243_v28 = vmax.f32 %v1179_v53, 0.0 }
 0x24b   :  { %1601 = vmatprep.mubr.bf16.mxu0 %v1276_v31  ;;  %v1216_v9 = vmax.f32 %v1152_v62, 0.0  ;;  %v5789_v31 = vpop.trf.xlu1  ;;  %v1283_v62 = vpack.c.bf16 %v1229_v27, %v1227_v57 }
 0x24c   :  { %v1102_v50 = vpop.trf.xlu0  ;;  %v1183_v33 = vadd.f32 %v5789_v31, %v5536_v54 }
 0x24d   :  { %v1154_v52 = vadd.f32 %v1102_v50, %v5540_v61  ;;  %1602 = vmatmul.mubr.bf16.gmra.mrb[128].mxu0 %v1275_v46  ;;  %v1231_v50 = vmax.f32 %v1167_v41, 0.0 }
 0x24e   :  { %v1247_v26 = vmax.f32 %v1183_v33, 0.0 }
 0x24f   :  { %v1218_v59 = vmax.f32 %v1154_v52, 0.0  ;;  %v1070_v23 = vpop.trf.xlu1  ;;  %v1285_v51 = vpack.c.bf16 %v1233_v63, %v1231_v50 }
 0x250   :  { %v1103_v24 = vpop.trf.xlu0  ;;  %v1185_v15 = vadd.f32 %v1070_v23, %v5536_v54 }
 0x251   :  { %v1278_v43 = vpack.c.bf16 %v1218_v59, %v1216_v9  ;;  %v1156_v32 = vadd.f32 %v1103_v24, %v5540_v61 }
 0x253   :  { %1609 = vmatprep.mubr.bf16.mxu0 %v1278_v43  ;;  %v1220_v0 = vmax.f32 %v1156_v32, 0.0 }
 0x254   :  { %v1104_v18 = vpop.trf.xlu0 }
 0x255   :  { %v1158_v47 = vadd.f32 %v1104_v18, %v5540_v61  ;;  %1610 = vmatmul.mubr.bf16.gmra.mrb[132].mxu0 %v1277_v60  ;;  %v1071_v60 = vpop.trf.xlu1  ;;  %v1235_v18 = vmax.f32 %v1171_v14, 0.0 }
 0x257   :  { %v1222_v2 = vmax.f32 %v1158_v47, 0.0 }
 0x258   :  { %v1105_v13 = vpop.trf.xlu0 }
 0x259   :  { %v1280_v19 = vpack.c.bf16 %v1222_v2, %v1220_v0  ;;  %v1160_v7 = vadd.f32 %v1105_v13, %v5540_v61  ;;  %v1072_v40 = vpop.trf.xlu1 }
 0x25b   :  { %1617 = vmatprep.mubr.bf16.mxu0 %v1280_v19  ;;  %v1224_v55 = vmax.f32 %v1160_v7, 0.0  ;;  %v1287_v19 = vpack.c.bf16 %v1237_v17, %v1235_v18 }
 0x25c   :  { %v1106_v6 = vpop.trf.xlu0 }
 0x25d   :  { %v1162_v38 = vadd.f32 %v1106_v6, %v5540_v61  ;;  %1618 = vmatmul.mubr.bf16.gmra.mrb[136].mxu0 %v1279_v35  ;;  %v1239_v35 = vmax.f32 %v1175_v49, 0.0 }
 0x25f   :  { %v1226_v29 = vmax.f32 %v1162_v38, 0.0  ;;  %v1241_v38 = vmax.f32 %v1177_v8, 0.0 }
 0x260   :  { %v1107_v45 = vpop.trf.xlu0 }
 0x261   :  { %v1282_v39 = vpack.c.bf16 %v1226_v29, %v1224_v55  ;;  %v1164_v48 = vadd.f32 %v1107_v45, %v5540_v61  ;;  %v1073_v29 = vpop.trf.xlu1 }
 0x263   :  { %1625 = vmatprep.mubr.bf16.mxu0 %v1282_v39  ;;  %v1228_v11 = vmax.f32 %v1164_v48, 0.0  ;;  %v1289_v39 = vpack.c.bf16 %v1241_v38, %v1239_v35 }
 0x264   :  { %v1108_v21 = vpop.trf.xlu0 }
 0x265   :  { %v1166_v56 = vadd.f32 %v1108_v21, %v5540_v61  ;;  %1626 = vmatmul.mubr.bf16.gmra.mrb[140].mxu0 %v1281_v34  ;;  %v1245_v21 = vmax.f32 %v1181_v10, 0.0  ;;  %v1074_v57 = vpop.trf.xlu1 }
 0x267   :  { %v1230_v37 = vmax.f32 %v1166_v56, 0.0 }
 0x268   :  { %v1109_v16 = vpop.trf.xlu0 }
 0x269   :  { %v1284_v42 = vpack.c.bf16 %v1230_v37, %v1228_v11  ;;  %v1168_v12 = vadd.f32 %v1109_v16, %v5540_v61  ;;  %v1291_v37 = vpack.c.bf16 %v1245_v21, %v1243_v28 }
 0x26b   :  { %1633 = vmatprep.mubr.bf16.mxu0 %v1284_v42  ;;  %v1232_v52 = vmax.f32 %v1168_v12, 0.0  ;;  %v1075_v12 = vpop.trf.xlu1 }
 0x26c   :  { %v1110_v25 = vpop.trf.xlu0 }
 0x26d   :  { %v1170_v46 = vadd.f32 %v1110_v25, %v5540_v61  ;;  %1634 = vmatmul.mubr.bf16.gmra.mrb[144].mxu0 %v1283_v62  ;;  %v1249_v25 = vmax.f32 %v1185_v15, 0.0 }
 0x26f   :  { %v1234_v9 = vmax.f32 %v1170_v46, 0.0  ;;  %v1293_v63 = vpack.c.bf16 %v1249_v25, %v1247_v26  ;;  %v1076_v23 = vpop.trf.xlu1 }
 0x270   :  { %v1111_v59 = vpop.trf.xlu0  ;;  %v1197_v10 = vadd.f32 %v1076_v23, %v5536_v54 }
 0x271   :  { %v1286_v24 = vpack.c.bf16 %v1234_v9, %v1232_v52  ;;  %v1172_v43 = vadd.f32 %v1111_v59, %v5540_v61  ;;  %v1187_v9 = vadd.f32 %v1071_v60, %v5536_v54  ;;  %v1189_v59 = vadd.f32 %v1072_v40, %v5536_v54 }
 0x272   :  { %v1191_v60 = vadd.f32 %v1073_v29, %v5536_v54 }
 0x273   :  { %1641 = vmatprep.mubr.bf16.mxu0 %v1286_v24  ;;  %v1236_v47 = vmax.f32 %v1172_v43, 0.0  ;;  %v1251_v43 = vmax.f32 %v1187_v9, 0.0 }
 0x274   :  { %v1112_v32 = vpop.trf.xlu0  ;;  %v1255_v8 = vmax.f32 %v1191_v60, 0.0 }
 0x275   :  { %v1174_v20 = vadd.f32 %v1112_v32, %v5540_v61  ;;  %1642 = vmatmul.mubr.bf16.gmra.mrb[148].mxu0 %v1285_v51  ;;  %v1253_v51 = vmax.f32 %v1189_v59, 0.0 }
 0x277   :  { %v1238_v0 = vmax.f32 %v1174_v20, 0.0  ;;  %v1295_v17 = vpack.c.bf16 %v1253_v51, %v1251_v43 }
 0x278   :  { %v1113_v1 = vpop.trf.xlu0 }
 0x279   :  { %v1288_v2 = vpack.c.bf16 %v1238_v0, %v1236_v47  ;;  %v1176_v13 = vadd.f32 %v1113_v1, %v5540_v61  ;;  %v1077_v47 = vpop.trf.xlu1  ;;  %v1193_v1 = vadd.f32 %v1074_v57, %v5536_v54 }
 0x27a   :  { %v1199_v26 = vadd.f32 %v1077_v47, %v5536_v54 }
 0x27b   :  { %1649 = vmatprep.mubr.bf16.mxu0 %v1288_v2  ;;  %v1240_v6 = vmax.f32 %v1176_v13, 0.0  ;;  %v5827_v13 = vld [vmem:[#allocation2 + $0x2] ss:$0 sm:$0xff]  ;;  %v1257_v40 = vmax.f32 %v1193_v1, 0.0 }
 0x27c   :  { %v1114_v7 = vpop.trf.xlu0 }
 0x27d   :  { %v1178_v58 = vadd.f32 %v1114_v7, %v5540_v61  ;;  %1650 = vmatmul.mubr.bf16.gmra.mrb[152].mxu0 %v1287_v19  ;;  %v1297_v53 = vpack.c.bf16 %v1257_v40, %v1255_v8 }
 0x27f   :  { %v1242_v36 = vmax.f32 %v1178_v58, 0.0  ;;  %v1078_v58 = vpop.trf.xlu1 }
 0x280   :  { %v1131_v55 = vpop.trf.xlu0 }
 0x281   :  { %v1290_v5 = vpack.c.bf16 %v1242_v36, %v1240_v6  ;;  %v1180_v45 = vadd.f32 %v1131_v55, %v5540_v61 }
 0x283   :  { %1657 = vmatprep.mubr.bf16.mxu0 %v1290_v5  ;;  %v1244_v34 = vmax.f32 %v1180_v45, 0.0  ;;  %v1195_v5 = vadd.f32 %v1075_v12, %v5536_v54 }
 0x284   :  { %v1132_v22 = vpop.trf.xlu0 }
 0x285   :  { %v1182_v48 = vadd.f32 %v1132_v22, %v5540_v61  ;;  %1658 = vmatmul.mubr.bf16.gmra.mrb[156].mxu0 %v1289_v39  ;;  %v1259_v57 = vmax.f32 %v1195_v5, 0.0 }
 0x287   :  { %v1246_v56 = vmax.f32 %v1182_v48, 0.0 }
 0x288   :  { %v1133_v11 = vpop.trf.xlu0 }
 0x289   :  { %v1292_v27 = vpack.c.bf16 %v1246_v56, %v1244_v34  ;;  %v1184_v16 = vadd.f32 %v1133_v11, %v5540_v61  ;;  %v1079_v56 = vpop.trf.xlu1 }
 0x28a   :  { %v1203_v1 = vadd.f32 %v1079_v56, %v5536_v54 }
 0x28b   :  { %1665 = vmatprep.mubr.bf16.mxu0 %v1292_v27  ;;  %v1248_v62 = vmax.f32 %v1184_v16, 0.0  ;;  %v1261_v27 = vmax.f32 %v1197_v10, 0.0 }
 0x28c   :  { %v1134_v42 = vpop.trf.xlu0 }
 0x28d   :  { %v1186_v41 = vadd.f32 %v1134_v42, %v5540_v61  ;;  %1666 = vmatmul.mubr.bf16.gmra.mrb[160].mxu0 %v1291_v37  ;;  %v1299_v25 = vpack.c.bf16 %v1261_v27, %v1259_v57  ;;  %v1080_v9 = vpop.trf.xlu1 }
 0x28f   :  { %v1250_v46 = vmax.f32 %v1186_v41, 0.0 }
 0x290   :  { %v1135_v50 = vpop.trf.xlu0 }
 0x291   :  { %v1294_v52 = vpack.c.bf16 %v1250_v46, %v1248_v62  ;;  %v1188_v31 = vadd.f32 %v1135_v50, %v5540_v61  ;;  %v1201_v50 = vadd.f32 %v1078_v58, %v5536_v54 }
 0x293   :  { %1673 = vmatprep.mubr.bf16.mxu0 %v1294_v52  ;;  %v1252_v4 = vmax.f32 %v1188_v31, 0.0 }
 0x294   :  { %v1136_v24 = vpop.trf.xlu0 }
 0x295   :  { %v1190_v14 = vadd.f32 %v1136_v24, %v5540_v61  ;;  %1674 = vmatmul.mubr.bf16.gmra.mrb[164].mxu0 %v1293_v63 }
 0x297   :  { %v1254_v32 = vmax.f32 %v1190_v14, 0.0  ;;  %v1263_v14 = vmax.f32 %v1199_v26, 0.0 }
 0x298   :  { %v1137_v20 = vpop.trf.xlu0 }
 0x299   :  { %v1296_v18 = vpack.c.bf16 %v1254_v32, %v1252_v4  ;;  %v1192_v0 = vadd.f32 %v1137_v20, %v5540_v61  ;;  %v1265_v4 = vmax.f32 %v1201_v50, 0.0 }
 0x29b   :  { %1681 = vmatprep.mubr.bf16.mxu0 %v1296_v18  ;;  %v1256_v19 = vmax.f32 %v1192_v0, 0.0  ;;  %v1081_v0 = vpop.trf.xlu1 }
 0x29c   :  { %v1138_v2 = vpop.trf.xlu0 }
 0x29d   :  { %v1194_v49 = vadd.f32 %v1138_v2, %v5540_v61  ;;  %1682 = vmatmul.mubr.bf16.gmra.mrb[168].mxu0 %v1295_v17 }
 0x29f   :  { %v1258_v7 = vmax.f32 %v1194_v49, 0.0  ;;  %v1301_v49 = vpack.c.bf16 %v1265_v4, %v1263_v14 }
 0x2a0   :  { %v1475_v35 = vpop.f32.mrb[64].mxu0  ;;  %v1139_v6 = vpop.trf.xlu0 }
 0x2a1   :  { %v1298_v38 = vpack.c.bf16 %v1258_v7, %v1256_v19  ;;  %v1476_v36 = vadd.f32 %v5827_v13, %v1475_v35  ;;  %v1477_v55 = vpop.f32.mrb[65].mxu0  ;;  %v1196_v45 = vadd.f32 %v1139_v6, %v5540_v61  ;;  %v1205_v19 = vadd.f32 %v1080_v9, %v5536_v54 }
 0x2a2   :  { %v1478_v29 = vpop.f32.mrb[66].mxu0 }
 0x2a3   :  { %v1479_v39 = vadd.f32 %v5827_v13, %v1478_v29  ;;  %v1480_v22 = vpop.f32.mrb[67].mxu0  ;;  %1689 = vmatprep.mubr.bf16.mxu0 %v1298_v38  ;;  %v1730_v28 = vmax.f32 %v1476_v36, 0.0  ;;  %v1260_v11 = vmax.f32 %v1196_v45, 0.0  ;;  %v1267_v36 = vmax.f32 %v1203_v1, 0.0  ;;  %v1082_v45 = vpop.trf.xlu1 }
 0x2a4   :  { %v1140_v48 = vpop.trf.xlu0  ;;  %v1269_v5 = vmax.f32 %v1205_v19, 0.0 }
 0x2a5   :  { %v1731_v34 = vmax.f32 %v1479_v39, 0.0  ;;  %v1198_v21 = vadd.f32 %v1140_v48, %v5540_v61  ;;  %1690 = vmatmul.mubr.bf16.gmra.mrb[172].mxu0 %v1297_v53 }
 0x2a6   :  { %v1303_v56 = vpack.c.bf16 %v1269_v5, %v1267_v36 }
 0x2a7   :  { %v5835_v37 = vpack.c.bf16 %v1731_v34, %v1730_v28  ;;  %v1262_v33 = vmax.f32 %v1198_v21, 0.0  ;;  %v1207_v34 = vadd.f32 %v1081_v0, %v5536_v54 }
 0x2a8   :  { %v1483_v16 = vpop.f32.mrb[68].mxu0  ;;  %v1141_v15 = vpop.trf.xlu0 }
 0x2a9   :  { %v1300_v42 = vpack.c.bf16 %v1262_v33, %v1260_v11  ;;  %v1484_v41 = vadd.f32 %v5827_v13, %v1483_v16  ;;  %v1485_v12 = vpop.f32.mrb[69].mxu0  ;;  %v1200_v46 = vadd.f32 %v1141_v15, %v5540_v61  ;;  %v1209_v11 = vadd.f32 %v1082_v45, %v5536_v54 }
 0x2aa   :  { %v1486_v62 = vpop.f32.mrb[70].mxu0  ;;  %v1271_v12 = vmax.f32 %v1207_v34, 0.0 }
 0x2ab   :  { %v1487_v52 = vadd.f32 %v5827_v13, %v1486_v62  ;;  %v1488_v63 = vpop.f32.mrb[71].mxu0  ;;  %1697 = vmatprep.mubr.bf16.mxu0 %v1300_v42  ;;  %v1732_v59 = vmax.f32 %v1484_v41, 0.0  ;;  %v1264_v43 = vmax.f32 %v1200_v46, 0.0  ;;  %v1273_v62 = vmax.f32 %v1209_v11, 0.0 }
 0x2ac   :  { %v1142_v31 = vpop.trf.xlu0 }
 0x2ad   :  { %v1733_v23 = vmax.f32 %v1487_v52, 0.0  ;;  %v1202_v24 = vadd.f32 %v1142_v31, %v5540_v61  ;;  %1698 = vmatmul.mubr.bf16.gmra.mrb[176].mxu0 %v1299_v25  ;;  %v1305_v31 = vpack.c.bf16 %v1273_v62, %v1271_v12 }
 0x2af   :  { %v5843_v51 = vpack.c.bf16 %v1733_v23, %v1732_v59  ;;  %v1266_v32 = vmax.f32 %v1202_v24, 0.0 }
 0x2b0   :  { %v1491_v20 = vpop.f32.mrb[72].mxu0  ;;  %v1143_v18 = vpop.trf.xlu0 }
 0x2b1   :  { %v1302_v47 = vpack.c.bf16 %v1266_v32, %v1264_v43  ;;  %v1492_v17 = vadd.f32 %v5827_v13, %v1491_v20  ;;  %v1493_v60 = vpop.f32.mrb[73].mxu0  ;;  %v1204_v8 = vadd.f32 %v1143_v18, %v5540_v61 }
 0x2b2   :  { %v1494_v2 = vpop.f32.mrb[74].mxu0 }
 0x2b3   :  { %v1495_v40 = vadd.f32 %v5827_v13, %v1494_v2  ;;  %v1496_v7 = vpop.f32.mrb[75].mxu0  ;;  %1705 = vmatprep.mubr.bf16.mxu0 %v1302_v47  ;;  %v1734_v35 = vmax.f32 %v1492_v17, 0.0  ;;  %v1268_v55 = vmax.f32 %v1204_v8, 0.0 }
 0x2b4   :  { %v1144_v58 = vpop.trf.xlu0 }
 0x2b5   :  { %v1735_v6 = vmax.f32 %v1495_v40, 0.0  ;;  %v1206_v38 = vadd.f32 %v1144_v58, %v5540_v61  ;;  %1706 = vmatmul.mubr.bf16.gmra.mrb[180].mxu0 %v1301_v49 }
 0x2b7   :  { %v1796_v29 = vpack.c.bf16 %v1735_v6, %v1734_v35  ;;  %v1270_v53 = vmax.f32 %v1206_v38, 0.0 }
 0x2b8   :  { %v1499_v10 = vpop.f32.mrb[76].mxu0  ;;  %v1145_v39 = vpop.trf.xlu0 }
 0x2b9   :  { %v1304_v22 = vpack.c.bf16 %v1270_v53, %v1268_v55  ;;  %v1500_v48 = vadd.f32 %v5827_v13, %v1499_v10  ;;  %v1501_v28 = vpop.f32.mrb[77].mxu0  ;;  %v1208_v57 = vadd.f32 %v1145_v39, %v5540_v61 }
 0x2ba   :  { %v1502_v21 = vpop.f32.mrb[78].mxu0 }
 0x2bb   :  { %v1503_v27 = vadd.f32 %v5827_v13, %v1502_v21  ;;  %v1504_v33 = vpop.f32.mrb[79].mxu0  ;;  %1713 = vmatprep.mubr.bf16.mxu0 %v1304_v22  ;;  %v1736_v15 = vmax.f32 %v1500_v48, 0.0  ;;  %v1272_v26 = vmax.f32 %v1208_v57, 0.0 }
 0x2bc   :  { %v1146_v16 = vpop.trf.xlu0 }
 0x2bd   :  { %v1737_v42 = vmax.f32 %v1503_v27, 0.0  ;;  %v1210_v41 = vadd.f32 %v1146_v16, %v5540_v61  ;;  %1714 = vmatmul.mubr.bf16.gmra.mrb[184].mxu0 %v1303_v56 }
 0x2bf   :  { %v1797_v25 = vpack.c.bf16 %v1737_v42, %v1736_v15  ;;  %v1274_v46 = vmax.f32 %v1210_v41, 0.0 }
 0x2c0   :  { %v1507_v50 = vpop.f32.mrb[80].mxu0 }
 0x2c1   :  { %v1306_v52 = vpack.c.bf16 %v1274_v46, %v1272_v26  ;;  %v1508_v63 = vadd.f32 %v5827_v13, %v1507_v50  ;;  %v1509_v54 = vpop.f32.mrb[81].mxu0 }
 0x2c2   :  { %v1510_v9 = vpop.f32.mrb[82].mxu0 }
 0x2c3   :  { %v1511_v59 = vadd.f32 %v5827_v13, %v1510_v9  ;;  %v1512_v23 = vpop.f32.mrb[83].mxu0  ;;  %1721 = vmatprep.mubr.bf16.mxu0 %v1306_v52  ;;  %v1738_v24 = vmax.f32 %v1508_v63, 0.0 }
 0x2c5   :  { %v1739_v14 = vmax.f32 %v1511_v59, 0.0  ;;  %1722 = vmatmul.mubr.bf16.gmra.mrb[188].mxu0 %v1305_v31 }
 0x2c6   :  { %4334 = vmatprep.mubr.bf16.mxu0 %v5835_v37 }
 0x2c7   :  { %v1798_v61 = vpack.c.bf16 %v1739_v14, %v1738_v24 }
 0x2c8   :  { %v1515_v43 = vpop.f32.mrb[84].mxu0 }
 0x2c9   :  { %v1516_v4 = vadd.f32 %v5827_v13, %v1515_v43  ;;  %v1517_v32 = vpop.f32.mrb[85].mxu0 }
 0x2ca   :  { %v1518_v20 = vpop.f32.mrb[86].mxu0 }
 0x2cb   :  { %v1519_v18 = vadd.f32 %v5827_v13, %v1518_v20  ;;  %v1520_v47 = vpop.f32.mrb[87].mxu0  ;;  %v1740_v17 = vmax.f32 %v1516_v4, 0.0  ;;  %v4451_v20 = vld [vmem:[%s6871_s5 + $0x4] ss:$8 sps:$4 sm:$0xff]  }
 0x2cc   :  { %2825 = vmatprep.subr.bf16.mxu1 %v4451_v20 }
 0x2cd   :  { %v1741_v60 = vmax.f32 %v1519_v18, 0.0  ;;  %4335 = vmatmul.mubr.bf16.vlgmr.msra.gmra.mrb[192].mxu0 %v5843_v51 }
 0x2ce   :  { %4338 = vmatprep.mubr.bf16.mxu0 %v1796_v29 }
 0x2cf   :  { %v1799_v0 = vpack.c.bf16 %v1741_v60, %v1740_v17 }
 0x2d0   :  { %v1523_v1 = vpop.f32.mrb[88].mxu0 }
 0x2d1   :  { %v1524_v2 = vadd.f32 %v5827_v13, %v1523_v1  ;;  %v1525_v49 = vpop.f32.mrb[89].mxu0 }
 0x2d2   :  { %v1526_v37 = vpop.f32.mrb[90].mxu0 }
 0x2d3   :  { %v1527_v8 = vadd.f32 %v5827_v13, %v1526_v37  ;;  %v1528_v19 = vpop.f32.mrb[91].mxu0  ;;  %v1742_v40 = vmax.f32 %v1524_v2, 0.0 }
 0x2d5   :  { %v1743_v7 = vmax.f32 %v1527_v8, 0.0  ;;  %4339 = vmatmul.mubr.bf16.gmra.mrb[196].mxu0 %v1797_v25 }
 0x2d6   :  { %4342 = vmatprep.mubr.bf16.mxu0 %v1798_v61 }
 0x2d7   :  { %v1800_v58 = vpack.c.bf16 %v1743_v7, %v1742_v40 }
 0x2d8   :  { %v1531_v35 = vpop.f32.mrb[92].mxu0 }
 0x2d9   :  { %v1532_v6 = vadd.f32 %v5827_v13, %v1531_v35  ;;  %v1533_v38 = vpop.f32.mrb[93].mxu0 }
 0x2da   :  { %v1534_v51 = vpop.f32.mrb[94].mxu0 }
 0x2db   :  { %v1535_v36 = vadd.f32 %v5827_v13, %v1534_v51  ;;  %v1536_v55 = vpop.f32.mrb[95].mxu0  ;;  %v1744_v5 = vmax.f32 %v1532_v6, 0.0 }
 0x2dd   :  { %v1745_v29 = vmax.f32 %v1535_v36, 0.0  ;;  %4343 = vmatmul.mubr.bf16.gmra.mrb[200].mxu0 %v1799_v0 }
 0x2de   :  { %4346 = vmatprep.mubr.bf16.mxu0 %v1800_v58 }
 0x2df   :  { %v1801_v53 = vpack.c.bf16 %v1745_v29, %v1744_v5 }
 0x2e0   :  { %v1539_v45 = vpop.f32.mrb[96].mxu0 }
 0x2e1   :  { %v1540_v10 = vadd.f32 %v5827_v13, %v1539_v45  ;;  %v1541_v39 = vpop.f32.mrb[97].mxu0 }
 0x2e2   :  { %v1542_v22 = vpop.f32.mrb[98].mxu0 }
 0x2e3   :  { %v1543_v48 = vadd.f32 %v5827_v13, %v1542_v22  ;;  %v1544_v28 = vpop.f32.mrb[99].mxu0  ;;  %v1746_v34 = vmax.f32 %v1540_v10, 0.0 }
 0x2e5   :  { %v1747_v21 = vmax.f32 %v1543_v48, 0.0  ;;  %4347 = vmatmul.mubr.bf16.gmra.mrb[204].mxu0 %v1801_v53 }
 0x2e7   :  { %v1802_v56 = vpack.c.bf16 %v1747_v21, %v1746_v34 }
 0x2e8   :  { %v1547_v57 = vpop.f32.mrb[100].mxu0 }
 0x2e9   :  { %v1548_v11 = vadd.f32 %v5827_v13, %v1547_v57  ;;  %v1549_v27 = vpop.f32.mrb[101].mxu0  ;;  %4350 = vmatprep.mubr.bf16.mxu0 %v1802_v56 }
 0x2ea   :  { %v1550_v33 = vpop.f32.mrb[102].mxu0 }
 0x2eb   :  { %v1551_v16 = vadd.f32 %v5827_v13, %v1550_v33  ;;  %v1552_v15 = vpop.f32.mrb[103].mxu0  ;;  %v1748_v42 = vmax.f32 %v1548_v11, 0.0  ;;  %v4449_v33 = vld [vmem:[%s6871_s5] ss:$8 sps:$4 sm:$0xff]  }
 0x2ec   :  { %v4454_v15 = vld [vmem:[%s6871_s5 + $0x14] ss:$8 sps:$4 sm:$0xff]  }
 0x2ed   :  { %v1749_v41 = vmax.f32 %v1551_v16, 0.0 }
 0x2ef   :  { %v1803_v12 = vpack.c.bf16 %v1749_v41, %v1748_v42 }
 0x2f0   :  { %v1555_v26 = vpop.f32.mrb[104].mxu0 }
 0x2f1   :  { %v1556_v62 = vadd.f32 %v5827_v13, %v1555_v26  ;;  %v1557_v25 = vpop.f32.mrb[105].mxu0  ;;  %4351 = vmatmul.mubr.bf16.gmra.mrb[208].mxu0 %v1803_v12 }
 0x2f2   :  { %v1558_v46 = vpop.f32.mrb[106].mxu0 }
 0x2f3   :  { %v1559_v50 = vadd.f32 %v5827_v13, %v1558_v46  ;;  %v1560_v52 = vpop.f32.mrb[107].mxu0  ;;  %v1750_v63 = vmax.f32 %v1556_v62, 0.0  ;;  %v4452_v62 = vld [vmem:[%s6871_s5 + $0x10] ss:$8 sps:$4 sm:$0xff]  }
 0x2f5   :  { %v1751_v54 = vmax.f32 %v1559_v50, 0.0  ;;  %v4457_v50 = vld [vmem:[%s6871_s5 + $0x24] ss:$8 sps:$4 sm:$0xff]  }
 0x2f7   :  { %v1804_v9 = vpack.c.bf16 %v1751_v54, %v1750_v63  ;;  %v4455_v54 = vld [vmem:[%s6871_s5 + $0x20] ss:$8 sps:$4 sm:$0xff]  }
 0x2f8   :  { %v1563_v31 = vpop.f32.mrb[108].mxu0 }
 0x2f9   :  { %v1564_v59 = vadd.f32 %v5827_v13, %v1563_v31  ;;  %v1565_v23 = vpop.f32.mrb[109].mxu0  ;;  %4354 = vmatprep.mubr.bf16.mxu0 %v1804_v9  ;;  %v4460_v31 = vld [vmem:[%s6871_s5 + $0x34] ss:$8 sps:$4 sm:$0xff]  }
 0x2fa   :  { %v1566_v24 = vpop.f32.mrb[110].mxu0 }
 0x2fb   :  { %v1567_v14 = vadd.f32 %v5827_v13, %v1566_v24  ;;  %v1568_v61 = vpop.f32.mrb[111].mxu0  ;;  %v1752_v43 = vmax.f32 %v1564_v59, 0.0 }
 0x2fc   :  { %v4458_v61 = vld [vmem:[%s6871_s5 + $0x30] ss:$8 sps:$4 sm:$0xff]  }
 0x2fd   :  { %v1753_v4 = vmax.f32 %v1567_v14, 0.0 }
 0x2ff   :  { %v1805_v32 = vpack.c.bf16 %v1753_v4, %v1752_v43 }
 0x300   :  { %v1571_v18 = vpop.f32.mrb[112].mxu0 }
 0x301   :  { %v1572_v47 = vadd.f32 %v5827_v13, %v1571_v18  ;;  %v1573_v17 = vpop.f32.mrb[113].mxu0  ;;  %4355 = vmatmul.mubr.bf16.gmra.mrb[212].mxu0 %v1805_v32  ;;  %v4463_v32 = vld [vmem:[%s6871_s5 + $0x44] ss:$8 sps:$4 sm:$0xff]  }
 0x302   :  { %v1574_v60 = vpop.f32.mrb[114].mxu0 }
 0x303   :  { %v1575_v0 = vadd.f32 %v5827_v13, %v1574_v60  ;;  %v1576_v1 = vpop.f32.mrb[115].mxu0  ;;  %v1754_v2 = vmax.f32 %v1572_v47, 0.0  ;;  %v4461_v47 = vld [vmem:[%s6871_s5 + $0x40] ss:$8 sps:$4 sm:$0xff]  }
 0x305   :  { %v1755_v49 = vmax.f32 %v1575_v0, 0.0 }
 0x307   :  { %v1806_v37 = vpack.c.bf16 %v1755_v49, %v1754_v2 }
 0x308   :  { %v1579_v8 = vpop.f32.mrb[116].mxu0 }
 0x309   :  { %v1580_v19 = vadd.f32 %v5827_v13, %v1579_v8  ;;  %v1581_v40 = vpop.f32.mrb[117].mxu0  ;;  %4358 = vmatprep.mubr.bf16.mxu0 %v1806_v37 }
 0x30a   :  { %v1582_v7 = vpop.f32.mrb[118].mxu0  ;;  %v4466_v40 = vld [vmem:[%s6871_s5 + $0x54] ss:$8 sps:$4 sm:$0xff]  }
 0x30b   :  { %v1583_v58 = vadd.f32 %v5827_v13, %v1582_v7  ;;  %v1584_v35 = vpop.f32.mrb[119].mxu0  ;;  %v1756_v6 = vmax.f32 %v1580_v19, 0.0 }
 0x30d   :  { %v1757_v38 = vmax.f32 %v1583_v58, 0.0  ;;  %v4464_v58 = vld [vmem:[%s6871_s5 + $0x50] ss:$8 sps:$4 sm:$0xff]  }
 0x30f   :  { %v1807_v51 = vpack.c.bf16 %v1757_v38, %v1756_v6 }
 0x310   :  { %v1587_v36 = vpop.f32.mrb[120].mxu0 }
 0x311   :  { %v1588_v55 = vadd.f32 %v5827_v13, %v1587_v36  ;;  %v1589_v5 = vpop.f32.mrb[121].mxu0  ;;  %4359 = vmatmul.mubr.bf16.gmra.mrb[216].mxu0 %v1807_v51 }
 0x312   :  { %v1590_v29 = vpop.f32.mrb[122].mxu0  ;;  %v4469_v5 = vld [vmem:[%s6871_s5 + $0x64] ss:$8 sps:$4 sm:$0xff]  }
 0x313   :  { %v1591_v53 = vadd.f32 %v5827_v13, %v1590_v29  ;;  %v1592_v45 = vpop.f32.mrb[123].mxu0  ;;  %v1758_v10 = vmax.f32 %v1588_v55, 0.0  ;;  %v4467_v29 = vld [vmem:[%s6871_s5 + $0x60] ss:$8 sps:$4 sm:$0xff]  }
 0x315   :  { %v1759_v39 = vmax.f32 %v1591_v53, 0.0 }
 0x317   :  { %v1808_v22 = vpack.c.bf16 %v1759_v39, %v1758_v10  ;;  %v4472_v39 = vld [vmem:[%s6871_s5 + $0x74] ss:$8 sps:$4 sm:$0xff]  }
 0x318   :  { %v1595_v48 = vpop.f32.mrb[124].mxu0 }
 0x319   :  { %v1596_v28 = vadd.f32 %v5827_v13, %v1595_v48  ;;  %v1597_v34 = vpop.f32.mrb[125].mxu0  ;;  %4362 = vmatprep.mubr.bf16.mxu1 %v1808_v22  ;;  %v4470_v48 = vld [vmem:[%s6871_s5 + $0x70] ss:$8 sps:$4 sm:$0xff]  }
 0x31a   :  { %v1598_v21 = vpop.f32.mrb[126].mxu0 }
 0x31b   :  { %v1599_v56 = vadd.f32 %v5827_v13, %v1598_v21  ;;  %v1600_v57 = vpop.f32.mrb[127].mxu0  ;;  %v1760_v11 = vmax.f32 %v1596_v28, 0.0 }
 0x31d   :  { %v1761_v27 = vmax.f32 %v1599_v56, 0.0 }
 0x31f   :  { %v1809_v16 = vpack.c.bf16 %v1761_v27, %v1760_v11 }
 0x320   :  { %v1603_v42 = vpop.f32.mrb[128].mxu0 }
 0x321   :  { %v1604_v41 = vadd.f32 %v5827_v13, %v1603_v42  ;;  %v1605_v12 = vpop.f32.mrb[129].mxu0  ;;  %4363 = vmatmul.mubr.bf16.vlgmr.msra.gmra.mrb[64].mxu1 %v1809_v16 }
 0x322   :  { %v1606_v26 = vpop.f32.mrb[130].mxu0  ;;  %2826 = vmatpush1.bf16.msra.mxu1 %v4449_v33 }
 0x323   :  { %v1607_v25 = vadd.f32 %v5827_v13, %v1606_v26  ;;  %v1608_v46 = vpop.f32.mrb[131].mxu0  ;;  %2827 = vmatprep.subr.bf16.mxu1 %v4454_v15  ;;  %v1762_v52 = vmax.f32 %v1604_v41, 0.0 }
 0x325   :  { %v1763_v63 = vmax.f32 %v1607_v25, 0.0 }
 0x326   :  { %2828 = vmatpush1.bf16.msra.mxu1 %v4452_v62 }
 0x327   :  { %v1810_v9 = vpack.c.bf16 %v1763_v63, %v1762_v52  ;;  %2829 = vmatprep.subr.bf16.mxu1 %v4457_v50 }
 0x328   :  { %v1611_v59 = vpop.f32.mrb[132].mxu0 }
 0x329   :  { %v1612_v23 = vadd.f32 %v5827_v13, %v1611_v59  ;;  %v1613_v24 = vpop.f32.mrb[133].mxu0  ;;  %4366 = vmatprep.mubr.bf16.mxu1 %v1810_v9 }
 0x32a   :  { %v1614_v14 = vpop.f32.mrb[134].mxu0  ;;  %2830 = vmatpush1.bf16.msra.mxu1 %v4455_v54 }
 0x32b   :  { %v1615_v43 = vadd.f32 %v5827_v13, %v1614_v14  ;;  %v1616_v4 = vpop.f32.mrb[135].mxu0  ;;  %2831 = vmatprep.subr.bf16.mxu1 %v4460_v31  ;;  %v1764_v20 = vmax.f32 %v1612_v23, 0.0 }
 0x32d   :  { %v1765_v18 = vmax.f32 %v1615_v43, 0.0 }
 0x32e   :  { %2832 = vmatpush1.bf16.msra.mxu1 %v4458_v61 }
 0x32f   :  { %v1811_v17 = vpack.c.bf16 %v1765_v18, %v1764_v20  ;;  %2833 = vmatprep.subr.bf16.mxu1 %v4463_v32 }
 0x330   :  { %v1619_v60 = vpop.f32.mrb[136].mxu0 }
 0x331   :  { %v1620_v0 = vadd.f32 %v5827_v13, %v1619_v60  ;;  %v1621_v1 = vpop.f32.mrb[137].mxu0  ;;  %4367 = vmatmul.mubr.bf16.gmra.mrb[68].mxu1 %v1811_v17 }
 0x332   :  { %v1622_v2 = vpop.f32.mrb[138].mxu0  ;;  %2834 = vmatpush1.bf16.msra.mxu1 %v4461_v47 }
 0x333   :  { %v1623_v49 = vadd.f32 %v5827_v13, %v1622_v2  ;;  %v1624_v37 = vpop.f32.mrb[139].mxu0  ;;  %v1766_v8 = vmax.f32 %v1620_v0, 0.0  ;;  %2835 = vmatprep.subr.bf16.mxu1 %v4466_v40 }
 0x335   :  { %v1767_v19 = vmax.f32 %v1623_v49, 0.0 }
 0x336   :  { %2836 = vmatpush1.bf16.msra.mxu1 %v4464_v58 }
 0x337   :  { %v1812_v7 = vpack.c.bf16 %v1767_v19, %v1766_v8  ;;  %2837 = vmatprep.subr.bf16.mxu1 %v4469_v5 }
 0x338   :  { %v1627_v35 = vpop.f32.mrb[140].mxu0 }
 0x339   :  { %v1628_v6 = vadd.f32 %v5827_v13, %v1627_v35  ;;  %v1629_v38 = vpop.f32.mrb[141].mxu0  ;;  %4370 = vmatprep.mubr.bf16.mxu1 %v1812_v7 }
 0x33a   :  { %v1630_v51 = vpop.f32.mrb[142].mxu0  ;;  %2838 = vmatpush1.bf16.msra.mxu1 %v4467_v29 }
 0x33b   :  { %v1631_v36 = vadd.f32 %v5827_v13, %v1630_v51  ;;  %v1632_v55 = vpop.f32.mrb[143].mxu0  ;;  %v1768_v53 = vmax.f32 %v1628_v6, 0.0  ;;  %2839 = vmatprep.subr.bf16.mxu1 %v4472_v39 }
 0x33d   :  { %v1769_v45 = vmax.f32 %v1631_v36, 0.0 }
 0x33e   :  { %2840 = vmatpush1.bf16.msra.mxu1 %v4470_v48 }
 0x33f   :  { %v1813_v10 = vpack.c.bf16 %v1769_v45, %v1768_v53 }
 0x340   :  { %v1635_v22 = vpop.f32.mrb[144].mxu0 }
 0x341   :  { %v1636_v28 = vadd.f32 %v5827_v13, %v1635_v22  ;;  %v1637_v34 = vpop.f32.mrb[145].mxu0  ;;  %4371 = vmatmul.mubr.bf16.gmra.mrb[72].mxu1 %v1813_v10 }
 0x342   :  { %v1638_v21 = vpop.f32.mrb[146].mxu0 }
 0x343   :  { %v1639_v56 = vadd.f32 %v5827_v13, %v1638_v21  ;;  %v1640_v57 = vpop.f32.mrb[147].mxu0  ;;  %v1770_v11 = vmax.f32 %v1636_v28, 0.0 }
 0x345   :  { %v1771_v27 = vmax.f32 %v1639_v56, 0.0 }
 0x347   :  { %v1814_v33 = vpack.c.bf16 %v1771_v27, %v1770_v11 }
 0x348   :  { %v1643_v16 = vpop.f32.mrb[148].mxu0 }
 0x349   :  { %v1644_v15 = vadd.f32 %v5827_v13, %v1643_v16  ;;  %v1645_v42 = vpop.f32.mrb[149].mxu0  ;;  %4374 = vmatprep.mubr.bf16.mxu1 %v1814_v33 }
 0x34a   :  { %v1646_v41 = vpop.f32.mrb[150].mxu0 }
 0x34b   :  { %v1647_v12 = vadd.f32 %v5827_v13, %v1646_v41  ;;  %v1648_v26 = vpop.f32.mrb[151].mxu0  ;;  %v1772_v62 = vmax.f32 %v1644_v15, 0.0 }
 0x34d   :  { %v1773_v25 = vmax.f32 %v1647_v12, 0.0 }
 0x34f   :  { %v1815_v46 = vpack.c.bf16 %v1773_v25, %v1772_v62 }
 0x350   :  { %v1651_v50 = vpop.f32.mrb[152].mxu0 }
 0x351   :  { %v1652_v52 = vadd.f32 %v5827_v13, %v1651_v50  ;;  %v1653_v63 = vpop.f32.mrb[153].mxu0  ;;  %4375 = vmatmul.mubr.bf16.gmra.mrb[76].mxu1 %v1815_v46 }
 0x352   :  { %v1654_v54 = vpop.f32.mrb[154].mxu0 }
 0x353   :  { %v1655_v9 = vadd.f32 %v5827_v13, %v1654_v54  ;;  %v1656_v31 = vpop.f32.mrb[155].mxu0  ;;  %v1774_v59 = vmax.f32 %v1652_v52, 0.0 }
 0x355   :  { %v1775_v23 = vmax.f32 %v1655_v9, 0.0 }
 0x357   :  { %v1816_v24 = vpack.c.bf16 %v1775_v23, %v1774_v59 }
 0x358   :  { %v1659_v14 = vpop.f32.mrb[156].mxu0 }
 0x359   :  { %v1660_v61 = vadd.f32 %v5827_v13, %v1659_v14  ;;  %v1661_v43 = vpop.f32.mrb[157].mxu0  ;;  %4378 = vmatprep.mubr.bf16.mxu1 %v1816_v24 }
 0x35a   :  { %v1662_v4 = vpop.f32.mrb[158].mxu0 }
 0x35b   :  { %v1663_v32 = vadd.f32 %v5827_v13, %v1662_v4  ;;  %v1664_v20 = vpop.f32.mrb[159].mxu0  ;;  %v1776_v18 = vmax.f32 %v1660_v61, 0.0 }
 0x35d   :  { %v1777_v47 = vmax.f32 %v1663_v32, 0.0 }
 0x35f   :  { %v1817_v17 = vpack.c.bf16 %v1777_v47, %v1776_v18 }
 0x360   :  { %v1667_v60 = vpop.f32.mrb[160].mxu0 }
 0x361   :  { %v1668_v0 = vadd.f32 %v5827_v13, %v1667_v60  ;;  %v1669_v1 = vpop.f32.mrb[161].mxu0  ;;  %4379 = vmatmul.mubr.bf16.gmra.mrb[80].mxu1 %v1817_v17 }
 0x362   :  { %v1670_v2 = vpop.f32.mrb[162].mxu0 }
 0x363   :  { %v1671_v49 = vadd.f32 %v5827_v13, %v1670_v2  ;;  %v1672_v37 = vpop.f32.mrb[163].mxu0  ;;  %v1778_v8 = vmax.f32 %v1668_v0, 0.0 }
 0x365   :  { %v1779_v19 = vmax.f32 %v1671_v49, 0.0 }
 0x367   :  { %v1818_v40 = vpack.c.bf16 %v1779_v19, %v1778_v8 }
 0x368   :  { %v1675_v7 = vpop.f32.mrb[164].mxu0 }
 0x369   :  { %v1676_v58 = vadd.f32 %v5827_v13, %v1675_v7  ;;  %v1677_v35 = vpop.f32.mrb[165].mxu0  ;;  %4382 = vmatprep.mubr.bf16.mxu1 %v1818_v40 }
 0x36a   :  { %v1678_v6 = vpop.f32.mrb[166].mxu0  ;;  %v5963_v35 = vld [vmem:[#allocation2 + $0x3] ss:$0 sm:$0xff] }
 0x36b   :  { %v1679_v38 = vadd.f32 %v5827_v13, %v1678_v6  ;;  %v1680_v51 = vpop.f32.mrb[167].mxu0  ;;  %v1780_v36 = vmax.f32 %v1676_v58, 0.0 }
 0x36d   :  { %v1781_v55 = vmax.f32 %v1679_v38, 0.0 }
 0x36f   :  { %v1819_v5 = vpack.c.bf16 %v1781_v55, %v1780_v36 }
 0x370   :  { %v1683_v29 = vpop.f32.mrb[168].mxu0 }
 0x371   :  { %v1684_v53 = vadd.f32 %v5827_v13, %v1683_v29  ;;  %v1685_v45 = vpop.f32.mrb[169].mxu0  ;;  %4383 = vmatmul.mubr.bf16.gmra.mrb[84].mxu1 %v1819_v5  ;;  %v6917_v29 = vmov 0  }
 0x372   :  { %v1686_v10 = vpop.f32.mrb[170].mxu0 }
 0x373   :  { %v1687_v39 = vadd.f32 %v5827_v13, %v1686_v10  ;;  %v1688_v22 = vpop.f32.mrb[171].mxu0  ;;  %v1782_v48 = vmax.f32 %v1684_v53, 0.0 }
 0x375   :  { %v1783_v28 = vmax.f32 %v1687_v39, 0.0 }
 0x377   :  { %v1820_v34 = vpack.c.bf16 %v1783_v28, %v1782_v48 }
 0x378   :  { %v1691_v21 = vpop.f32.mrb[172].mxu0 }
 0x379   :  { %v1692_v56 = vadd.f32 %v5827_v13, %v1691_v21  ;;  %v1693_v57 = vpop.f32.mrb[173].mxu0  ;;  %4386 = vmatprep.mubr.bf16.mxu1 %v1820_v34 }
 0x37a   :  { %v1694_v11 = vpop.f32.mrb[174].mxu0 }
 0x37b   :  { %v1695_v27 = vadd.f32 %v5827_v13, %v1694_v11  ;;  %v1696_v33 = vpop.f32.mrb[175].mxu0  ;;  %v1784_v16 = vmax.f32 %v1692_v56, 0.0 }
 0x37d   :  { %v1785_v15 = vmax.f32 %v1695_v27, 0.0 }
 0x37f   :  { %v1821_v42 = vpack.c.bf16 %v1785_v15, %v1784_v16 }
 0x380   :  { %v1699_v41 = vpop.f32.mrb[176].mxu0 }
 0x381   :  { %v1700_v12 = vadd.f32 %v5827_v13, %v1699_v41  ;;  %v1701_v26 = vpop.f32.mrb[177].mxu0  ;;  %4387 = vmatmul.mubr.bf16.gmra.mrb[88].mxu1 %v1821_v42 }
 0x382   :  { %v1702_v62 = vpop.f32.mrb[178].mxu0 }
 0x383   :  { %v1703_v25 = vadd.f32 %v5827_v13, %v1702_v62  ;;  %v1704_v46 = vpop.f32.mrb[179].mxu0  ;;  %v1786_v50 = vmax.f32 %v1700_v12, 0.0 }
 0x385   :  { %v1787_v52 = vmax.f32 %v1703_v25, 0.0 }
 0x387   :  { %v1822_v63 = vpack.c.bf16 %v1787_v52, %v1786_v50 }
 0x388   :  { %v1707_v54 = vpop.f32.mrb[180].mxu0 }
 0x389   :  { %v1708_v9 = vadd.f32 %v5827_v13, %v1707_v54  ;;  %v1709_v31 = vpop.f32.mrb[181].mxu0  ;;  %4390 = vmatprep.mubr.bf16.mxu1 %v1822_v63 }
 0x38a   :  { %v1710_v59 = vpop.f32.mrb[182].mxu0 }
 0x38b   :  { %v1711_v23 = vadd.f32 %v5827_v13, %v1710_v59  ;;  %v1712_v24 = vpop.f32.mrb[183].mxu0  ;;  %v1788_v14 = vmax.f32 %v1708_v9, 0.0 }
 0x38d   :  { %v1789_v61 = vmax.f32 %v1711_v23, 0.0 }
 0x38f   :  { %v1823_v43 = vpack.c.bf16 %v1789_v61, %v1788_v14 }
 0x390   :  { %v1715_v4 = vpop.f32.mrb[184].mxu0 }
 0x391   :  { %v1716_v32 = vadd.f32 %v5827_v13, %v1715_v4  ;;  %v1717_v20 = vpop.f32.mrb[185].mxu0  ;;  %4391 = vmatmul.mubr.bf16.gmra.mrb[92].mxu1 %v1823_v43 }
 0x392   :  { %v1718_v18 = vpop.f32.mrb[186].mxu0 }
 0x393   :  { %v1719_v47 = vadd.f32 %v5827_v13, %v1718_v18  ;;  %v1720_v17 = vpop.f32.mrb[187].mxu0  ;;  %v1790_v60 = vmax.f32 %v1716_v32, 0.0 }
 0x395   :  { %v1791_v0 = vmax.f32 %v1719_v47, 0.0 }
 0x397   :  { %v1824_v1 = vpack.c.bf16 %v1791_v0, %v1790_v60 }
 0x398   :  { %v1723_v2 = vpop.f32.mrb[188].mxu0 }
 0x399   :  { %v1724_v49 = vadd.f32 %v5827_v13, %v1723_v2  ;;  %v1725_v37 = vpop.f32.mrb[189].mxu0  ;;  %4394 = vmatprep.mubr.bf16.mxu1 %v1824_v1 }
 0x39a   :  { %v1726_v8 = vpop.f32.mrb[190].mxu0 }
 0x39b   :  { %v1727_v19 = vadd.f32 %v5827_v13, %v1726_v8  ;;  %v1728_v40 = vpop.f32.mrb[191].mxu0  ;;  %v1792_v7 = vmax.f32 %v1724_v49, 0.0 }
 0x39d   :  { %v1793_v58 = vmax.f32 %v1727_v19, 0.0 }
 0x39f   :  { %v1825_v6 = vpack.c.bf16 %v1793_v58, %v1792_v7 }
 0x3a0   :  { %v4336_v38 = vpop.f32.mrb[192].mxu0 }
 0x3a1   :  { %v1939_v51 = vadd.f32 %v4336_v38, %v5963_v35  ;;  %v1930_v36 = vpop.f32.mrb[193].mxu0  ;;  %4395 = vmatmul.mubr.bf16.gmra.mrb[96].mxu1 %v1825_v6 }
 0x3a2   :  { %v1931_v55 = vadd.f32 %v5963_v35, %v1930_v36  ;;  %v4337_v5 = vpop.f32.mrb[194].mxu0  ;;  %2857 = vmatprep.mubr.bf16.mxu1 %v6917_v29 }
 0x3a3   :  { %v2187_v53 = vsub.f32 0.0, %v1939_v51  ;;  %v1942_v45 = vadd.f32 %v4337_v5, %v5963_v35  ;;  %v1933_v13 = vpop.f32.mrb[195].mxu0 }
 0x3a4   :  { %v2185_v10 = vsub.f32 0.0, %v1931_v55  ;;  %v1934_v39 = vadd.f32 %v5963_v35, %v1933_v13 }
 0x3a5   :  { %v2253_v22 = vmul.f32 1.442695, %v2187_v53  ;;  %v2188_v48 = vsub.f32 0.0, %v1942_v45 }
 0x3a6   :  { %v2249_v28 = vmul.f32 1.442695, %v2185_v10  ;;  %v2186_v34 = vsub.f32 0.0, %v1934_v39 }
 0x3a7   :  { %4489 = vpow2.f32 %v2253_v22  ;;  %v2255_v21 = vmul.f32 1.442695, %v2188_v48 }
 0x3a8   :  { %4491 = vpow2.f32 %v2249_v28  ;;  %v2251_v56 = vmul.f32 1.442695, %v2186_v34  ;;  %v4340_v57 = vpop.f32.mrb[196].mxu0 }
 0x3a9   :  { %4493 = vpow2.f32 %v2255_v21  ;;  %v1955_v11 = vadd.f32 %v4340_v57, %v5963_v35  ;;  %v1946_v27 = vpop.f32.mrb[197].mxu0 }
 0x3aa   :  { %4495 = vpow2.f32 %v2251_v56  ;;  %v1947_v33 = vadd.f32 %v5963_v35, %v1946_v27  ;;  %v4341_v16 = vpop.f32.mrb[198].mxu0 }
 0x3ab   :  { %v2191_v15 = vsub.f32 0.0, %v1955_v11  ;;  %v1958_v42 = vadd.f32 %v4341_v16, %v5963_v35  ;;  %v1949_v41 = vpop.f32.mrb[199].mxu0 }
 0x3ac   :  { %v2189_v12 = vsub.f32 0.0, %v1947_v33  ;;  %v1950_v26 = vadd.f32 %v5963_v35, %v1949_v41 }
 0x3ad   :  { %v2261_v62 = vmul.f32 1.442695, %v2191_v15  ;;  %v2192_v25 = vsub.f32 0.0, %v1958_v42 }
 0x3ae   :  { %v2257_v46 = vmul.f32 1.442695, %v2189_v12  ;;  %v2190_v50 = vsub.f32 0.0, %v1950_v26 }
 0x3af   :  { %4497 = vpow2.f32 %v2261_v62  ;;  %v2263_v52 = vmul.f32 1.442695, %v2192_v25 }
 0x3b0   :  { %4499 = vpow2.f32 %v2257_v46  ;;  %v2259_v63 = vmul.f32 1.442695, %v2190_v50  ;;  %v4344_v54 = vpop.f32.mrb[200].mxu0 }
 0x3b1   :  { %v4490_v9 = vpop.eup %4489  ;;  %4501 = vpow2.f32 %v2263_v52  ;;  %v1971_v31 = vadd.f32 %v4344_v54, %v5963_v35  ;;  %v1962_v59 = vpop.f32.mrb[201].mxu0 }
 0x3b2   :  { %v4492_v23 = vpop.eup %4491  ;;  %v2379_v24 = vadd.f32 1.0, %v4490_v9  ;;  %4503 = vpow2.f32 %v2259_v63  ;;  %v1963_v14 = vadd.f32 %v5963_v35, %v1962_v59  ;;  %v4345_v61 = vpop.f32.mrb[202].mxu0 }
 0x3b3   :  { %v4494_v43 = vpop.eup %4493  ;;  %v2377_v4 = vadd.f32 1.0, %v4492_v23  ;;  %v2195_v32 = vsub.f32 0.0, %v1971_v31  ;;  %v1974_v20 = vadd.f32 %v4345_v61, %v5963_v35  ;;  %v1965_v18 = vpop.f32.mrb[203].mxu0 }
 0x3b4   :  { %v4496_v47 = vpop.eup %4495  ;;  %4505 = vrcp.f32 %v2379_v24  ;;  %v2380_v17 = vadd.f32 1.0, %v4494_v43  ;;  %v2193_v60 = vsub.f32 0.0, %v1963_v14  ;;  %v1966_v0 = vadd.f32 %v5963_v35, %v1965_v18 }
 0x3b5   :  { %4507 = vrcp.f32 %v2377_v4  ;;  %v2378_v1 = vadd.f32 1.0, %v4496_v47  ;;  %v2269_v2 = vmul.f32 1.442695, %v2195_v32  ;;  %v2196_v49 = vsub.f32 0.0, %v1974_v20 }
 0x3b6   :  { %4509 = vrcp.f32 %v2380_v17  ;;  %v2265_v37 = vmul.f32 1.442695, %v2193_v60  ;;  %v2194_v8 = vsub.f32 0.0, %v1966_v0 }
 0x3b7   :  { %4511 = vrcp.f32 %v2378_v1  ;;  %v2271_v19 = vmul.f32 1.442695, %v2196_v49 }
 0x3b8   :  { %4513 = vpow2.f32 %v2269_v2  ;;  %v2267_v40 = vmul.f32 1.442695, %v2194_v8  ;;  %v4348_v7 = vpop.f32.mrb[204].mxu0 }
 0x3b9   :  { %v4498_v58 = vpop.eup %4497  ;;  %4515 = vpow2.f32 %v2265_v37  ;;  %v1987_v6 = vadd.f32 %v4348_v7, %v5963_v35  ;;  %v1978_v38 = vpop.f32.mrb[205].mxu0 }
 0x3ba   :  { %v4500_v51 = vpop.eup %4499  ;;  %v2383_v36 = vadd.f32 1.0, %v4498_v58  ;;  %4517 = vpow2.f32 %v2271_v19  ;;  %v1979_v55 = vadd.f32 %v5963_v35, %v1978_v38  ;;  %v4349_v5 = vpop.f32.mrb[206].mxu0 }
 0x3bb   :  { %v4502_v53 = vpop.eup %4501  ;;  %v2381_v45 = vadd.f32 1.0, %v4500_v51  ;;  %4519 = vpow2.f32 %v2267_v40  ;;  %v2199_v13 = vsub.f32 0.0, %v1987_v6  ;;  %v1990_v10 = vadd.f32 %v4349_v5, %v5963_v35  ;;  %v1981_v39 = vpop.f32.mrb[207].mxu0 }
 0x3bc   :  { %v4504_v22 = vpop.eup %4503  ;;  %4521 = vrcp.f32 %v2383_v36  ;;  %v2384_v48 = vadd.f32 1.0, %v4502_v53  ;;  %v2197_v28 = vsub.f32 0.0, %v1979_v55  ;;  %v1982_v34 = vadd.f32 %v5963_v35, %v1981_v39 }
 0x3bd   :  { %4523 = vrcp.f32 %v2381_v45  ;;  %v2382_v21 = vadd.f32 1.0, %v4504_v22  ;;  %v2277_v56 = vmul.f32 1.442695, %v2199_v13  ;;  %v2200_v57 = vsub.f32 0.0, %v1990_v10 }
 0x3be   :  { %v5982_v11 = vpop.eup %4505  ;;  %4525 = vrcp.f32 %v2384_v48  ;;  %v2273_v27 = vmul.f32 1.442695, %v2197_v28  ;;  %v2198_v33 = vsub.f32 0.0, %v1982_v34 }
 0x3bf   :  { %v4508_v16 = vpop.eup %4507  ;;  %4527 = vrcp.f32 %v2382_v21  ;;  %v2279_v15 = vmul.f32 1.442695, %v2200_v57  ;;  %v2507_v42 = vmul.f32 %v5982_v11, %v5982_v11 }
 0x3c0   :  { %v4510_v41 = vpop.eup %4509  ;;  %4529 = vpow2.f32 %v2277_v56  ;;  %v2275_v12 = vmul.f32 1.442695, %v2198_v33  ;;  %v2505_v54 = vmul.f32 %v4508_v16, %v4508_v16 }
 0x3c1   :  { %v4512_v26 = vpop.eup %4511  ;;  %4531 = vpow2.f32 %v2273_v27  ;;  %2573 = vadd.xlane.f32.xlu0 %v2507_v42  ;;  %v2698_v62 = vpack.c.bf16 %v4510_v41, %v5982_v11  ;;  %v2508_v0 = vmul.f32 %v4510_v41, %v4510_v41 }
 0x3c2   :  { %v4514_v25 = vpop.eup %4513  ;;  %4533 = vpow2.f32 %v2279_v15  ;;  %v2506_v46 = vmul.f32 %v4512_v26, %v4512_v26  ;;  %v2697_v50 = vpack.c.bf16 %v4512_v26, %v4508_v16 }
 0x3c3   :  { %v4516_v52 = vpop.eup %4515  ;;  %v2387_v63 = vadd.f32 1.0, %v4514_v25  ;;  %4535 = vpow2.f32 %v2275_v12 }
 0x3c4   :  { %v4518_v9 = vpop.eup %4517  ;;  %v2385_v31 = vadd.f32 1.0, %v4516_v52  ;;  %v4352_v59 = vpop.f32.mrb[208].mxu0  ;;  %2571 = vadd.xlane.f32.xlu1 %v2506_v46  ;;  %2858 = vmatmul.mubr.bf16.vlgmr.msra.gmra.mrb[100].mxu1 %v2697_v50 }
 0x3c5   :  { %v4520_v23 = vpop.eup %4519  ;;  %4537 = vrcp.f32 %v2387_v63  ;;  %v2388_v24 = vadd.f32 1.0, %v4518_v9  ;;  %v2003_v14 = vadd.f32 %v4352_v59, %v5963_v35  ;;  %v1994_v61 = vpop.f32.mrb[209].mxu0  ;;  %2569 = vadd.xlane.f32.xlu0 %v2505_v54  ;;  %2867 = vmatprep.mubr.bf16.mxu1 %v6917_v29 }
 0x3c6   :  { %v5989_v43 = vpop.eup %4521  ;;  %4539 = vrcp.f32 %v2385_v31  ;;  %v2386_v4 = vadd.f32 1.0, %v4520_v23  ;;  %v1995_v32 = vadd.f32 %v5963_v35, %v1994_v61  ;;  %v4353_v20 = vpop.f32.mrb[210].mxu0 }
 0x3c7   :  { %v4524_v18 = vpop.eup %4523  ;;  %4541 = vrcp.f32 %v2388_v24  ;;  %v2203_v47 = vsub.f32 0.0, %v2003_v14  ;;  %v2006_v17 = vadd.f32 %v4353_v20, %v5963_v35  ;;  %v1997_v60 = vpop.f32.mrb[211].mxu0  ;;  %v2511_v55 = vmul.f32 %v5989_v43, %v5989_v43 }
 0x3c8   :  { %v5993_v1 = vpop.eup %4525  ;;  %4543 = vrcp.f32 %v2386_v4  ;;  %v2201_v2 = vsub.f32 0.0, %v1995_v32  ;;  %v1998_v49 = vadd.f32 %v5963_v35, %v1997_v60  ;;  %v2509_v28 = vmul.f32 %v4524_v18, %v4524_v18 }
 0x3c9   :  { %v4528_v37 = vpop.eup %4527  ;;  %v2285_v8 = vmul.f32 1.442695, %v2203_v47  ;;  %v2204_v19 = vsub.f32 0.0, %v2006_v17  ;;  %2575 = vadd.xlane.f32.xlu0 %v2508_v0  ;;  %v2700_v40 = vpack.c.bf16 %v5993_v1, %v5989_v43  ;;  %v2512_v11 = vmul.f32 %v5993_v1, %v5993_v1 }
 0x3ca   :  { %v4530_v7 = vpop.eup %4529  ;;  %v2281_v58 = vmul.f32 1.442695, %v2201_v2  ;;  %v2202_v6 = vsub.f32 0.0, %v1998_v49  ;;  %v2699_v38 = vpack.c.bf16 %v4528_v37, %v4524_v18  ;;  %v2510_v63 = vmul.f32 %v4528_v37, %v4528_v37 }
 0x3cb   :  { %v4532_v51 = vpop.eup %4531  ;;  %v2391_v36 = vadd.f32 1.0, %v4530_v7  ;;  %4545 = vpow2.f32 %v2285_v8  ;;  %v2287_v10 = vmul.f32 1.442695, %v2204_v19 }
 0x3cc   :  { %v4534_v5 = vpop.eup %4533  ;;  %v2389_v53 = vadd.f32 1.0, %v4532_v51  ;;  %4547 = vpow2.f32 %v2281_v58  ;;  %2868 = vmatmul.mubr.bf16.gmra.mrb[104].mxu1 %v2698_v62  ;;  %v2283_v22 = vmul.f32 1.442695, %v2202_v6 }
 0x3cd   :  { %v4536_v45 = vpop.eup %4535  ;;  %4549 = vrcp.f32 %v2391_v36  ;;  %v2392_v13 = vadd.f32 1.0, %v4534_v5  ;;  %2581 = vadd.xlane.f32.xlu0 %v2511_v55  ;;  %2877 = vmatprep.mubr.bf16.mxu1 %v6917_v29 }
 0x3ce   :  { %4551 = vrcp.f32 %v2389_v53  ;;  %v2390_v39 = vadd.f32 1.0, %v4536_v45 }
 0x3cf   :  { %v6001_v48 = vpop.eup %4537  ;;  %4553 = vrcp.f32 %v2392_v13 }
 0x3d0   :  { %v4540_v34 = vpop.eup %4539  ;;  %4555 = vrcp.f32 %v2390_v39  ;;  %v2515_v47 = vmul.f32 %v6001_v48, %v6001_v48 }
 0x3d1   :  { %v6003_v21 = vpop.eup %4541  ;;  %4557 = vpow2.f32 %v2287_v10  ;;  %2577 = vadd.xlane.f32.xlu0 %v2509_v28  ;;  %v2513_v8 = vmul.f32 %v4540_v34, %v4540_v34 }
 0x3d2   :  { %v6005_v56 = vpop.eup %4543  ;;  %4559 = vpow2.f32 %v2283_v22  ;;  %v2702_v57 = vpack.c.bf16 %v6003_v21, %v6001_v48  ;;  %v2516_v19 = vmul.f32 %v6003_v21, %v6003_v21 }
 0x3d3   :  { %v2701_v27 = vpack.c.bf16 %v6005_v56, %v4540_v34  ;;  %v2514_v10 = vmul.f32 %v6005_v56, %v6005_v56 }
 0x3d4   :  { %v4356_v33 = vpop.f32.mrb[212].mxu0  ;;  %2878 = vmatmul.mubr.bf16.gmra.mrb[108].mxu1 %v2699_v38 }
 0x3d5   :  { %v4546_v16 = vpop.eup %4545  ;;  %v2019_v15 = vadd.f32 %v4356_v33, %v5963_v35  ;;  %v2010_v42 = vpop.f32.mrb[213].mxu0  ;;  %2583 = vadd.xlane.f32.xlu0 %v2512_v11  ;;  %2887 = vmatprep.mubr.bf16.mxu1 %v6917_v29 }
 0x3d6   :  { %v4548_v41 = vpop.eup %4547  ;;  %v2011_v12 = vadd.f32 %v5963_v35, %v2010_v42  ;;  %v4357_v26 = vpop.f32.mrb[214].mxu0  ;;  %v2395_v49 = vadd.f32 1.0, %v4546_v16 }
 0x3d7   :  { %v6015_v62 = vpop.eup %4549  ;;  %v2393_v25 = vadd.f32 1.0, %v4548_v41  ;;  %v2207_v46 = vsub.f32 0.0, %v2019_v15  ;;  %v2022_v50 = vadd.f32 %v4357_v26, %v5963_v35  ;;  %v2013_v52 = vpop.f32.mrb[215].mxu0 }
 0x3d8   :  { %v6018_v54 = vpop.eup %4551  ;;  %v2205_v9 = vsub.f32 0.0, %v2011_v12  ;;  %v2014_v31 = vadd.f32 %v5963_v35, %v2013_v52 }
 0x3d9   :  { %v6021_v59 = vpop.eup %4553  ;;  %v2293_v23 = vmul.f32 1.442695, %v2207_v46  ;;  %v2208_v24 = vsub.f32 0.0, %v2022_v50  ;;  %2579 = vadd.xlane.f32.xlu0 %v2510_v63  ;;  %4561 = vrcp.f32 %v2393_v25  ;;  %v2519_v25 = vmul.f32 %v6015_v62, %v6015_v62 }
 0x3da   :  { %v6023_v14 = vpop.eup %4555  ;;  %v2289_v61 = vmul.f32 1.442695, %v2205_v9  ;;  %v2206_v4 = vsub.f32 0.0, %v2014_v31  ;;  %v2704_v32 = vpack.c.bf16 %v6021_v59, %v6015_v62  ;;  %v2517_v52 = vmul.f32 %v6018_v54, %v6018_v54 }
 0x3db   :  { %v4558_v20 = vpop.eup %4557  ;;  %4563 = vpow2.f32 %v2293_v23  ;;  %v2295_v18 = vmul.f32 1.442695, %v2208_v24  ;;  %v2703_v17 = vpack.c.bf16 %v6023_v14, %v6018_v54  ;;  %v2520_v48 = vmul.f32 %v6021_v59, %v6021_v59 }
 0x3dc   :  { %v4560_v60 = vpop.eup %4559  ;;  %v2396_v0 = vadd.f32 1.0, %v4558_v20  ;;  %4565 = vpow2.f32 %v2289_v61  ;;  %v2291_v2 = vmul.f32 1.442695, %v2206_v4  ;;  %2888 = vmatmul.mubr.bf16.gmra.mrb[112].mxu1 %v2700_v40 }
 0x3dd   :  { %v2394_v37 = vadd.f32 1.0, %v4560_v60  ;;  %4567 = vpow2.f32 %v2295_v18  ;;  %2589 = vadd.xlane.f32.xlu0 %v2515_v47  ;;  %2897 = vmatprep.mubr.bf16.mxu1 %v6917_v29 }
 0x3de   :  { %4569 = vrcp.f32 %v2396_v0 }
 0x3df   :  { %4571 = vrcp.f32 %v2394_v37 }
 0x3e0   :  { %4573 = vpow2.f32 %v2291_v2 }
 0x3e1   :  { %4575 = vrcp.f32 %v2395_v49  ;;  %2585 = vadd.xlane.f32.xlu0 %v2513_v8  ;;  %v2518_v49 = vmul.f32 %v6023_v14, %v6023_v14 }
 0x3e3   :  { %v6037_v7 = vpop.eup %4561 }
 0x3e4   :  { %v4360_v58 = vpop.f32.mrb[216].mxu0  ;;  %2898 = vmatmul.mubr.bf16.gmra.mrb[116].mxu1 %v2701_v27 }
 0x3e5   :  { %v4564_v43 = vpop.eup %4563  ;;  %v2035_v1 = vadd.f32 %v4360_v58, %v5963_v35  ;;  %v2026_v40 = vpop.f32.mrb[217].mxu0  ;;  %2591 = vadd.xlane.f32.xlu0 %v2516_v19  ;;  %2907 = vmatprep.mubr.bf16.mxu1 %v6917_v29 }
 0x3e6   :  { %v4566_v6 = vpop.eup %4565  ;;  %v2399_v38 = vadd.f32 1.0, %v4564_v43  ;;  %v2027_v51 = vadd.f32 %v5963_v35, %v2026_v40  ;;  %v4361_v36 = vpop.f32.mrb[218].mxu0 }
 0x3e7   :  { %v4568_v55 = vpop.eup %4567  ;;  %v2397_v5 = vadd.f32 1.0, %v4566_v6  ;;  %v2211_v53 = vsub.f32 0.0, %v2035_v1  ;;  %v2038_v45 = vadd.f32 %v4361_v36, %v5963_v35  ;;  %v2029_v13 = vpop.f32.mrb[219].mxu0 }
 0x3e8   :  { %v6045_v39 = vpop.eup %4569  ;;  %4577 = vrcp.f32 %v2399_v38  ;;  %v2400_v22 = vadd.f32 1.0, %v4568_v55  ;;  %v2209_v28 = vsub.f32 0.0, %v2027_v51  ;;  %v2030_v34 = vadd.f32 %v5963_v35, %v2029_v13 }
 0x3e9   :  { %v6048_v11 = vpop.eup %4571  ;;  %4579 = vrcp.f32 %v2397_v5  ;;  %v2301_v27 = vmul.f32 1.442695, %v2211_v53  ;;  %v2212_v33 = vsub.f32 0.0, %v2038_v45  ;;  %2587 = vadd.xlane.f32.xlu0 %v2514_v10  ;;  %v2521_v53 = vmul.f32 %v6037_v7, %v6037_v7 }
 0x3ea   :  { %v4574_v16 = vpop.eup %4573  ;;  %4581 = vrcp.f32 %v2400_v22  ;;  %v2297_v15 = vmul.f32 1.442695, %v2209_v28  ;;  %v2210_v42 = vsub.f32 0.0, %v2030_v34  ;;  %v2705_v56 = vpack.c.bf16 %v6048_v11, %v6037_v7 }
 0x3eb   :  { %v6052_v41 = vpop.eup %4575  ;;  %v2398_v12 = vadd.f32 1.0, %v4574_v16  ;;  %4583 = vpow2.f32 %v2301_v27  ;;  %v2303_v26 = vmul.f32 1.442695, %v2212_v33  ;;  %v2524_v13 = vmul.f32 %v6045_v39, %v6045_v39 }
 0x3ec   :  { %4585 = vpow2.f32 %v2297_v15  ;;  %v2299_v46 = vmul.f32 1.442695, %v2210_v42  ;;  %2908 = vmatmul.mubr.bf16.gmra.mrb[120].mxu1 %v2702_v57  ;;  %v2706_v50 = vpack.c.bf16 %v6045_v39, %v6052_v41  ;;  %v2523_v14 = vmul.f32 %v6052_v41, %v6052_v41 }
 0x3ed   :  { %4587 = vrcp.f32 %v2398_v12  ;;  %2597 = vadd.xlane.f32.xlu0 %v2519_v25  ;;  %2917 = vmatprep.mubr.bf16.mxu1 %v6917_v29 }
 0x3ee   :  { %4589 = vpow2.f32 %v2303_v26 }
 0x3ef   :  { %4591 = vpow2.f32 %v2299_v46 }
 0x3f1   :  { %2593 = vadd.xlane.f32.xlu0 %v2517_v52 }
 0x3f2   :  { %v6064_v63 = vpop.eup %4577 }
 0x3f3   :  { %v6066_v9 = vpop.eup %4579 }
 0x3f4   :  { %v6070_v21 = vpop.eup %4581  ;;  %v4364_v57 = vpop.f32.mrb[64].mxu1  ;;  %2918 = vmatmul.mubr.bf16.gmra.mrb[124].mxu1 %v2703_v17 }
 0x3f5   :  { %v4584_v31 = vpop.eup %4583  ;;  %v2051_v23 = vadd.f32 %v4364_v57, %v5963_v35  ;;  %v2042_v24 = vpop.f32.mrb[65].mxu1  ;;  %2599 = vadd.xlane.f32.xlu0 %v2520_v48  ;;  %2927 = vmatprep.mubr.bf16.mxu1 %v6917_v29  ;;  %v2708_v61 = vpack.c.bf16 %v6070_v21, %v6064_v63 }
 0x3f6   :  { %v4586_v4 = vpop.eup %4585  ;;  %v2403_v20 = vadd.f32 1.0, %v4584_v31  ;;  %v2043_v18 = vadd.f32 %v5963_v35, %v2042_v24  ;;  %v4365_v47 = vpop.f32.mrb[66].mxu1 }
 0x3f7   :  { %v6080_v60 = vpop.eup %4587  ;;  %v2401_v0 = vadd.f32 1.0, %v4586_v4  ;;  %v2215_v54 = vsub.f32 0.0, %v2051_v23  ;;  %v2054_v17 = vadd.f32 %v4365_v47, %v5963_v35  ;;  %v2045_v2 = vpop.f32.mrb[67].mxu1  ;;  %v2527_v47 = vmul.f32 %v6064_v63, %v6064_v63 }
 0x3f8   :  { %v4590_v37 = vpop.eup %4589  ;;  %v2213_v8 = vsub.f32 0.0, %v2043_v18  ;;  %v2046_v19 = vadd.f32 %v5963_v35, %v2045_v2  ;;  %v2707_v58 = vpack.c.bf16 %v6080_v60, %v6066_v9  ;;  %4593 = vrcp.f32 %v2403_v20 }
 0x3f9   :  { %v4592_v43 = vpop.eup %4591  ;;  %v2404_v1 = vadd.f32 1.0, %v4590_v37  ;;  %v2309_v40 = vmul.f32 1.442695, %v2215_v54  ;;  %v2216_v6 = vsub.f32 0.0, %v2054_v17  ;;  %2595 = vadd.xlane.f32.xlu0 %v2518_v49  ;;  %4595 = vrcp.f32 %v2401_v0 }
 0x3fa   :  { %v2402_v38 = vadd.f32 1.0, %v4592_v43  ;;  %v2305_v51 = vmul.f32 1.442695, %v2213_v8  ;;  %v2214_v36 = vsub.f32 0.0, %v2046_v19  ;;  %v2525_v17 = vmul.f32 %v6066_v9, %v6066_v9 }
 0x3fb   :  { %4597 = vrcp.f32 %v2404_v1  ;;  %v2311_v55 = vmul.f32 1.442695, %v2216_v6  ;;  %v2528_v2 = vmul.f32 %v6070_v21, %v6070_v21 }
 0x3fc   :  { %4599 = vrcp.f32 %v2402_v38  ;;  %v2307_v5 = vmul.f32 1.442695, %v2214_v36  ;;  %2928 = vmatmul.mubr.bf16.gmra.mrb[128].mxu1 %v2704_v32 }
 0x3fd   :  { %4601 = vpow2.f32 %v2309_v40  ;;  %2605 = vadd.xlane.f32.xlu0 %v2523_v14  ;;  %2937 = vmatprep.mubr.bf16.mxu1 %v6917_v29 }
 0x3fe   :  { %4603 = vpow2.f32 %v2305_v51 }
 0x3ff   :  { %4605 = vpow2.f32 %v2311_v55 }
 0x400   :  { %4607 = vpow2.f32 %v2307_v5 }
 0x401   :  { %2601 = vadd.xlane.f32.xlu0 %v2521_v53 }
 0x402   :  { %v6096_v45 = vpop.eup %4593 }
 0x403   :  { %v6100_v10 = vpop.eup %4595 }
 0x404   :  { %v4368_v62 = vpop.f32.mrb[68].mxu1  ;;  %2938 = vmatmul.mubr.bf16.gmra.mrb[132].mxu1 %v2705_v56  ;;  %v2522_v56 = vmul.f32 %v6048_v11, %v6048_v11 }
 0x405   :  { %v6105_v59 = vpop.eup %4597  ;;  %v2067_v32 = vadd.f32 %v4368_v62, %v5963_v35  ;;  %v2058_v22 = vpop.f32.mrb[69].mxu1  ;;  %2607 = vadd.xlane.f32.xlu0 %v2524_v13  ;;  %2947 = vmatprep.mubr.bf16.mxu1 %v6917_v29 }
 0x406   :  { %v6109_v28 = vpop.eup %4599  ;;  %v2059_v34 = vadd.f32 %v5963_v35, %v2058_v22  ;;  %v4369_v27 = vpop.f32.mrb[70].mxu1  ;;  %v2710_v33 = vpack.c.bf16 %v6105_v59, %v6096_v45 }
 0x407   :  { %v4602_v16 = vpop.eup %4601  ;;  %v2219_v15 = vsub.f32 0.0, %v2067_v32  ;;  %v2070_v7 = vadd.f32 %v4369_v27, %v5963_v35  ;;  %v2061_v42 = vpop.f32.mrb[71].mxu1  ;;  %v2709_v12 = vpack.c.bf16 %v6109_v28, %v6100_v10 }
 0x408   :  { %v4604_v26 = vpop.eup %4603  ;;  %v2407_v25 = vadd.f32 1.0, %v4602_v16  ;;  %v2217_v46 = vsub.f32 0.0, %v2059_v34  ;;  %v2062_v52 = vadd.f32 %v5963_v35, %v2061_v42  ;;  %v2531_v16 = vmul.f32 %v6096_v45, %v6096_v45 }
 0x409   :  { %v4606_v48 = vpop.eup %4605  ;;  %v2405_v57 = vadd.f32 1.0, %v4604_v26  ;;  %v2220_v31 = vsub.f32 0.0, %v2070_v7  ;;  %2603 = vadd.xlane.f32.xlu0 %v2522_v56  ;;  %v2317_v4 = vmul.f32 1.442695, %v2219_v15  ;;  %v2529_v26 = vmul.f32 %v6100_v10, %v6100_v10 }
 0x40a   :  { %v4608_v23 = vpop.eup %4607  ;;  %4609 = vrcp.f32 %v2407_v25  ;;  %v2408_v24 = vadd.f32 1.0, %v4606_v48  ;;  %v2218_v20 = vsub.f32 0.0, %v2062_v52  ;;  %v2313_v11 = vmul.f32 1.442695, %v2217_v46 }
 0x40b   :  { %4611 = vrcp.f32 %v2405_v57  ;;  %v2406_v18 = vadd.f32 1.0, %v4608_v23  ;;  %v2319_v0 = vmul.f32 1.442695, %v2220_v31  ;;  %v2532_v25 = vmul.f32 %v6105_v59, %v6105_v59 }
 0x40c   :  { %4613 = vrcp.f32 %v2408_v24  ;;  %2948 = vmatmul.mubr.bf16.gmra.mrb[136].mxu1 %v2706_v50  ;;  %v2315_v54 = vmul.f32 1.442695, %v2218_v20 }
 0x40d   :  { %4615 = vrcp.f32 %v2406_v18  ;;  %2613 = vadd.xlane.f32.xlu0 %v2527_v47  ;;  %2957 = vmatprep.mubr.bf16.mxu1 %v6917_v29 }
 0x40e   :  { %4617 = vpow2.f32 %v2317_v4  ;;  %v2530_v4 = vmul.f32 %v6109_v28, %v6109_v28 }
 0x40f   :  { %4619 = vpow2.f32 %v2313_v11 }
 0x410   :  { %4621 = vpow2.f32 %v2319_v0 }
 0x411   :  { %4623 = vpow2.f32 %v2315_v54  ;;  %2609 = vadd.xlane.f32.xlu0 %v2525_v17 }
 0x414   :  { %v6130_v49 = vpop.eup %4609  ;;  %v4372_v39 = vpop.f32.mrb[72].mxu1  ;;  %2958 = vmatmul.mubr.bf16.gmra.mrb[140].mxu1 %v2707_v58  ;;  %v2526_v58 = vmul.f32 %v6080_v60, %v6080_v60 }
 0x415   :  { %v6135_v41 = vpop.eup %4611  ;;  %v2083_v50 = vadd.f32 %v4372_v39, %v5963_v35  ;;  %v2074_v37 = vpop.f32.mrb[73].mxu1  ;;  %2615 = vadd.xlane.f32.xlu0 %v2528_v2  ;;  %2967 = vmatprep.mubr.bf16.mxu1 %v6917_v29 }
 0x416   :  { %v6139_v8 = vpop.eup %4613  ;;  %v2075_v19 = vadd.f32 %v5963_v35, %v2074_v37  ;;  %v4373_v43 = vpop.f32.mrb[74].mxu1 }
 0x417   :  { %v6142_v1 = vpop.eup %4615  ;;  %v2223_v40 = vsub.f32 0.0, %v2083_v50  ;;  %v2086_v6 = vadd.f32 %v4373_v43, %v5963_v35  ;;  %v2077_v9 = vpop.f32.mrb[75].mxu1  ;;  %v2712_v38 = vpack.c.bf16 %v6139_v8, %v6130_v49 }
 0x418   :  { %v4618_v51 = vpop.eup %4617  ;;  %v2221_v36 = vsub.f32 0.0, %v2075_v19  ;;  %v2078_v55 = vadd.f32 %v5963_v35, %v2077_v9  ;;  %v2711_v14 = vpack.c.bf16 %v6142_v1, %v6135_v41  ;;  %v2534_v59 = vmul.f32 %v6142_v1, %v6142_v1 }
 0x419   :  { %v4620_v5 = vpop.eup %4619  ;;  %v2411_v53 = vadd.f32 1.0, %v4618_v51  ;;  %v2224_v13 = vsub.f32 0.0, %v2086_v6  ;;  %2611 = vadd.xlane.f32.xlu0 %v2526_v58  ;;  %v2325_v27 = vmul.f32 1.442695, %v2223_v40  ;;  %v2535_v40 = vmul.f32 %v6130_v49, %v6130_v49 }
 0x41a   :  { %v4622_v62 = vpop.eup %4621  ;;  %v2409_v32 = vadd.f32 1.0, %v4620_v5  ;;  %v2222_v22 = vsub.f32 0.0, %v2078_v55  ;;  %v2321_v7 = vmul.f32 1.442695, %v2221_v36 }
 0x41b   :  { %v4624_v34 = vpop.eup %4623  ;;  %4625 = vrcp.f32 %v2411_v53  ;;  %v2412_v60 = vadd.f32 1.0, %v4622_v62  ;;  %v2327_v42 = vmul.f32 1.442695, %v2224_v13  ;;  %v2533_v53 = vmul.f32 %v6135_v41, %v6135_v41 }
 0x41c   :  { %4627 = vrcp.f32 %v2409_v32  ;;  %v2410_v15 = vadd.f32 1.0, %v4624_v34  ;;  %2968 = vmatmul.mubr.bf16.gmra.mrb[144].mxu1 %v2708_v61  ;;  %v2323_v56 = vmul.f32 1.442695, %v2222_v22 }
 0x41d   :  { %4629 = vrcp.f32 %v2412_v60  ;;  %2621 = vadd.xlane.f32.xlu0 %v2531_v16  ;;  %2977 = vmatprep.mubr.bf16.mxu1 %v6917_v29 }
 0x41e   :  { %4631 = vrcp.f32 %v2410_v15 }
 0x41f   :  { %4633 = vpow2.f32 %v2325_v27 }
 0x420   :  { %4635 = vpow2.f32 %v2321_v7  ;;  %v2536_v7 = vmul.f32 %v6139_v8, %v6139_v8 }
 0x421   :  { %4637 = vpow2.f32 %v2327_v42  ;;  %2617 = vadd.xlane.f32.xlu0 %v2529_v26  ;;  %v6219_v26 = vld [vmem:[#allocation2 + $0x3] ss:$0 sm:$0xff] }
 0x422   :  { %4639 = vpow2.f32 %v2323_v56 }
 0x424   :  { %v4376_v63 = vpop.f32.mrb[76].mxu1  ;;  %2978 = vmatmul.mubr.bf16.gmra.mrb[148].mxu1 %v2709_v12 }
 0x425   :  { %v6165_v21 = vpop.eup %4625  ;;  %v2099_v61 = vadd.f32 %v4376_v63, %v5963_v35  ;;  %v2090_v46 = vpop.f32.mrb[77].mxu1  ;;  %2623 = vadd.xlane.f32.xlu0 %v2532_v25  ;;  %2987 = vmatprep.mubr.bf16.mxu1 %v6917_v29 }
 0x426   :  { %v6169_v52 = vpop.eup %4627  ;;  %v2091_v48 = vadd.f32 %v5963_v35, %v2090_v46  ;;  %v2539_v57 = vmul.f32 %v6165_v21, %v6165_v21  ;;  %v4377_v31 = vpop.f32.mrb[78].mxu1 }
 0x427   :  { %v6174_v23 = vpop.eup %4629  ;;  %v2227_v10 = vsub.f32 0.0, %v2099_v61  ;;  %v2102_v12 = vadd.f32 %v4377_v31, %v5963_v35  ;;  %v2093_v24 = vpop.f32.mrb[79].mxu1  ;;  %v2537_v28 = vmul.f32 %v6169_v52, %v6169_v52 }
 0x428   :  { %v6179_v20 = vpop.eup %4631  ;;  %v2225_v18 = vsub.f32 0.0, %v2091_v48  ;;  %2637 = vadd.xlane.f32.xlu1 %v2539_v57  ;;  %v2094_v11 = vadd.f32 %v5963_v35, %v2093_v24  ;;  %v2714_v47 = vpack.c.bf16 %v6174_v23, %v6165_v21  ;;  %v2540_v5 = vmul.f32 %v6174_v23, %v6174_v23 }
 0x429   :  { %v4634_v0 = vpop.eup %4633  ;;  %v2333_v54 = vmul.f32 1.442695, %v2227_v10  ;;  %v2228_v17 = vsub.f32 0.0, %v2102_v12  ;;  %2619 = vadd.xlane.f32.xlu0 %v2530_v4  ;;  %v2713_v2 = vpack.c.bf16 %v6179_v20, %v6169_v52  ;;  %v2538_v45 = vmul.f32 %v6179_v20, %v6179_v20 }
 0x42a   :  { %v4636_v39 = vpop.eup %4635  ;;  %v2415_v50 = vadd.f32 1.0, %v4634_v0  ;;  %v2226_v37 = vsub.f32 0.0, %v2094_v11  ;;  %v2329_v58 = vmul.f32 1.442695, %v2225_v18 }
 0x42b   :  { %v4638_v19 = vpop.eup %4637  ;;  %v2413_v43 = vadd.f32 1.0, %v4636_v39  ;;  %4641 = vpow2.f32 %v2333_v54  ;;  %v2335_v36 = vmul.f32 1.442695, %v2228_v17 }
 0x42c   :  { %v4640_v6 = vpop.eup %4639  ;;  %4643 = vrcp.f32 %v2415_v50  ;;  %v2416_v9 = vadd.f32 1.0, %v4638_v19  ;;  %2633 = vadd.xlane.f32.xlu1 %v2537_v28  ;;  %2988 = vmatmul.mubr.bf16.gmra.mrb[152].mxu1 %v2710_v33  ;;  %v2331_v55 = vmul.f32 1.442695, %v2226_v37 }
 0x42d   :  { %4645 = vrcp.f32 %v2413_v43  ;;  %v2414_v51 = vadd.f32 1.0, %v4640_v6  ;;  %2629 = vadd.xlane.f32.xlu0 %v2535_v40  ;;  %2997 = vmatprep.mubr.bf16.mxu1 %v6917_v29 }
 0x42e   :  { %4647 = vrcp.f32 %v2416_v9 }
 0x42f   :  { %4649 = vrcp.f32 %v2414_v51 }
 0x430   :  { %4651 = vpow2.f32 %v2329_v58  ;;  %2639 = vadd.xlane.f32.xlu1 %v2540_v5 }
 0x431   :  { %4653 = vpow2.f32 %v2335_v36  ;;  %2625 = vadd.xlane.f32.xlu0 %v2533_v53 }
 0x432   :  { %4655 = vpow2.f32 %v2331_v55 }
 0x434   :  { %2635 = vadd.xlane.f32.xlu1 %v2538_v45  ;;  %v4380_v33 = vpop.f32.mrb[80].mxu1  ;;  %2998 = vmatmul.mubr.bf16.gmra.mrb[156].mxu1 %v2711_v14 }
 0x435   :  { %v4642_v13 = vpop.eup %4641  ;;  %v2115_v62 = vadd.f32 %v4380_v33, %v5963_v35  ;;  %v2106_v32 = vpop.f32.mrb[81].mxu1  ;;  %2627 = vadd.xlane.f32.xlu0 %v2534_v59  ;;  %3007 = vmatprep.mubr.bf16.mxu1 %v6917_v29 }
 0x436   :  { %v6207_v22 = vpop.eup %4643  ;;  %v2419_v34 = vadd.f32 1.0, %v4642_v13  ;;  %v2107_v60 = vadd.f32 %v5963_v35, %v2106_v32  ;;  %v4381_v27 = vpop.f32.mrb[82].mxu1 }
 0x437   :  { %v6210_v16 = vpop.eup %4645  ;;  %v2231_v15 = vsub.f32 0.0, %v2115_v62  ;;  %v2543_v41 = vmul.f32 %v6207_v22, %v6207_v22  ;;  %v2118_v1 = vadd.f32 %v4381_v27, %v5963_v35  ;;  %v2109_v14 = vpop.f32.mrb[83].mxu1 }
 0x438   :  { %v6217_v42 = vpop.eup %4647  ;;  %4657 = vrcp.f32 %v2419_v34  ;;  %v2229_v56 = vsub.f32 0.0, %v2107_v60  ;;  %v2110_v25 = vadd.f32 %v6219_v26, %v2109_v14  ;;  %v2541_v4 = vmul.f32 %v6210_v16, %v6210_v16 }
 0x439   :  { %v6222_v63 = vpop.eup %4649  ;;  %v2341_v61 = vmul.f32 1.442695, %v2231_v15  ;;  %2645 = vadd.xlane.f32.xlu1 %v2543_v41  ;;  %v2232_v46 = vsub.f32 0.0, %v2118_v1  ;;  %2631 = vadd.xlane.f32.xlu0 %v2536_v7  ;;  %v2716_v35 = vpack.c.bf16 %v6217_v42, %v6207_v22  ;;  %v2544_v39 = vmul.f32 %v6217_v42, %v6217_v42 }
 0x43a   :  { %v4652_v48 = vpop.eup %4651  ;;  %v2337_v57 = vmul.f32 1.442695, %v2229_v56  ;;  %v2230_v31 = vsub.f32 0.0, %v2110_v25  ;;  %v2715_v10 = vpack.c.bf16 %v6222_v63, %v6210_v16  ;;  %v2542_v49 = vmul.f32 %v6222_v63, %v6222_v63 }
 0x43b   :  { %v4654_v12 = vpop.eup %4653  ;;  %v2417_v24 = vadd.f32 1.0, %v4652_v48  ;;  %4659 = vpow2.f32 %v2341_v61  ;;  %v2343_v0 = vmul.f32 1.442695, %v2232_v46 }
 0x43c   :  { %v4656_v18 = vpop.eup %4655  ;;  %v2420_v11 = vadd.f32 1.0, %v4654_v12  ;;  %4661 = vpow2.f32 %v2337_v57  ;;  %3008 = vmatmul.mubr.bf16.gmra.mrb[160].mxu1 %v2712_v38  ;;  %v2339_v17 = vmul.f32 1.442695, %v2230_v31 }
 0x43d   :  { %4663 = vrcp.f32 %v2417_v24  ;;  %v2418_v54 = vadd.f32 1.0, %v4656_v18  ;;  %2641 = vadd.xlane.f32.xlu1 %v2541_v4  ;;  %3017 = vmatprep.mubr.bf16.mxu1 %v6917_v29 }
 0x43e   :  { %4665 = vrcp.f32 %v2420_v11 }
 0x43f   :  { %4667 = vrcp.f32 %v2418_v54 }
 0x440   :  { %4669 = vpow2.f32 %v2343_v0 }
 0x441   :  { %4671 = vpow2.f32 %v2339_v17  ;;  %2647 = vadd.xlane.f32.xlu1 %v2544_v39 }
 0x442   :  { %v6236_v50 = vpop.eup %4657 }
 0x443   :  { %v2547_v19 = vmul.f32 %v6236_v50, %v6236_v50 }
 0x444   :  { %v4384_v8 = vpop.f32.mrb[84].mxu1  ;;  %3018 = vmatmul.mubr.bf16.gmra.mrb[164].mxu1 %v2713_v2 }
 0x445   :  { %v4660_v38 = vpop.eup %4659  ;;  %2643 = vadd.xlane.f32.xlu1 %v2542_v49  ;;  %v2131_v37 = vadd.f32 %v6219_v26, %v4384_v8  ;;  %v2122_v28 = vpop.f32.mrb[85].mxu1  ;;  %3027 = vmatprep.mubr.bf16.mxu1 %v6917_v29 }
 0x446   :  { %v4662_v43 = vpop.eup %4661  ;;  %v2423_v40 = vadd.f32 1.0, %v4660_v38  ;;  %v2123_v6 = vadd.f32 %v6219_v26, %v2122_v28  ;;  %v4385_v9 = vpop.f32.mrb[86].mxu1 }
 0x447   :  { %v6248_v58 = vpop.eup %4663  ;;  %v2421_v51 = vadd.f32 1.0, %v4662_v43  ;;  %v2235_v52 = vsub.f32 0.0, %v2131_v37  ;;  %v2134_v20 = vadd.f32 %v6219_v26, %v4385_v9  ;;  %v2125_v2 = vpop.f32.mrb[87].mxu1 }
 0x448   :  { %v6251_v36 = vpop.eup %4665  ;;  %4673 = vrcp.f32 %v2423_v40  ;;  %v2233_v55 = vsub.f32 0.0, %v2123_v6  ;;  %v2126_v5 = vadd.f32 %v6219_v26, %v2125_v2  ;;  %v2545_v33 = vmul.f32 %v6248_v58, %v6248_v58 }
 0x449   :  { %v6254_v53 = vpop.eup %4667  ;;  %v2349_v45 = vmul.f32 1.442695, %v2235_v52  ;;  %2653 = vadd.xlane.f32.xlu1 %v2547_v19  ;;  %v2236_v59 = vsub.f32 0.0, %v2134_v20  ;;  %4675 = vrcp.f32 %v2421_v51  ;;  %v2718_v41 = vpack.c.bf16 %v6251_v36, %v6236_v50 }
 0x44a   :  { %v4670_v13 = vpop.eup %4669  ;;  %v2345_v62 = vmul.f32 1.442695, %v2233_v55  ;;  %v2234_v32 = vsub.f32 0.0, %v2126_v5  ;;  %v2717_v34 = vpack.c.bf16 %v6254_v53, %v6248_v58  ;;  %v2548_v7 = vmul.f32 %v6251_v36, %v6251_v36 }
 0x44b   :  { %v4672_v60 = vpop.eup %4671  ;;  %v2424_v27 = vadd.f32 1.0, %v4670_v13  ;;  %4677 = vpow2.f32 %v2349_v45  ;;  %v2351_v15 = vmul.f32 1.442695, %v2236_v59  ;;  %v2546_v25 = vmul.f32 %v6254_v53, %v6254_v53 }
 0x44c   :  { %v2422_v1 = vadd.f32 1.0, %v4672_v60  ;;  %4679 = vpow2.f32 %v2345_v62  ;;  %v2347_v14 = vmul.f32 1.442695, %v2234_v32  ;;  %3028 = vmatmul.mubr.bf16.gmra.mrb[168].mxu1 %v2714_v47 }
 0x44d   :  { %4681 = vrcp.f32 %v2424_v27  ;;  %2649 = vadd.xlane.f32.xlu1 %v2545_v33  ;;  %3037 = vmatprep.mubr.bf16.mxu1 %v6917_v29 }
 0x44e   :  { %4683 = vrcp.f32 %v2422_v1  ;;  %v6297_v52 = vpop.xlane.xlu0 %2573 }
 0x44f   :  { %4685 = vpow2.f32 %v2351_v15 }
 0x450   :  { %4687 = vpow2.f32 %v2347_v14 }
 0x451   :  { %2655 = vadd.xlane.f32.xlu1 %v2548_v7 }
 0x452   :  { %v6268_v56 = vpop.eup %4673  ;;  %v6306_v5 = vpop.xlane.xlu0 %2569 }
 0x453   :  { %v6272_v61 = vpop.eup %4675  ;;  %v2551_v48 = vmul.f32 %v6268_v56, %v6268_v56 }
 0x454   :  { %v4388_v21 = vpop.f32.mrb[88].mxu1  ;;  %3038 = vmatmul.mubr.bf16.gmra.mrb[172].mxu1 %v2715_v10  ;;  %v2549_v8 = vmul.f32 %v6272_v61, %v6272_v61 }
 0x455   :  { %v4678_v23 = vpop.eup %4677  ;;  %2651 = vadd.xlane.f32.xlu1 %v2546_v25  ;;  %v2147_v47 = vadd.f32 %v6219_v26, %v4388_v21  ;;  %v2138_v46 = vpop.f32.mrb[89].mxu1  ;;  %3047 = vmatprep.mubr.bf16.mxu1 %v6917_v29 }
 0x456   :  { %v4680_v57 = vpop.eup %4679  ;;  %v2427_v31 = vadd.f32 1.0, %v4678_v23  ;;  %v2139_v12 = vadd.f32 %v6219_v26, %v2138_v46  ;;  %v4389_v24 = vpop.f32.mrb[90].mxu1 }
 0x457   :  { %v6282_v4 = vpop.eup %4681  ;;  %v2425_v18 = vadd.f32 1.0, %v4680_v57  ;;  %v2239_v16 = vsub.f32 0.0, %v2147_v47  ;;  %v2150_v63 = vadd.f32 %v6219_v26, %v4389_v24  ;;  %v2141_v10 = vpop.f32.mrb[91].mxu1 }
 0x458   :  { %v6285_v11 = vpop.eup %4683  ;;  %4689 = vrcp.f32 %v2427_v31  ;;  %v2237_v0 = vsub.f32 0.0, %v2139_v12  ;;  %v2142_v54 = vadd.f32 %v6219_v26, %v2141_v10  ;;  %v2720_v9 = vpack.c.bf16 %v6282_v4, %v6268_v56  ;;  %v6326_v23 = vpop.xlane.xlu0 %2575 }
 0x459   :  { %v4686_v17 = vpop.eup %4685  ;;  %4691 = vrcp.f32 %v2425_v18  ;;  %v2357_v39 = vmul.f32 1.442695, %v2239_v16  ;;  %2661 = vadd.xlane.f32.xlu1 %v2551_v48  ;;  %v2240_v49 = vsub.f32 0.0, %v2150_v63  ;;  %v2719_v43 = vpack.c.bf16 %v6285_v11, %v6272_v61 }
 0x45a   :  { %v4688_v38 = vpop.eup %4687  ;;  %v2428_v37 = vadd.f32 1.0, %v4686_v17  ;;  %v2353_v28 = vmul.f32 1.442695, %v2237_v0  ;;  %v2238_v19 = vsub.f32 0.0, %v2142_v54  ;;  %v2552_v20 = vmul.f32 %v6282_v4, %v6282_v4 }
 0x45b   :  { %v2426_v40 = vadd.f32 1.0, %v4688_v38  ;;  %4693 = vpow2.f32 %v2357_v39  ;;  %v2359_v6 = vmul.f32 1.442695, %v2240_v49  ;;  %v2550_v22 = vmul.f32 %v6285_v11, %v6285_v11 }
 0x45c   :  { %4695 = vrcp.f32 %v2428_v37  ;;  %v2355_v51 = vmul.f32 1.442695, %v2238_v19  ;;  %3048 = vmatmul.mubr.bf16.gmra.mrb[176].mxu1 %v2716_v35  ;;  %v6336_v0 = vpop.xlane.xlu0 %2581 }
 0x45d   :  { %4697 = vrcp.f32 %v2426_v40  ;;  %2657 = vadd.xlane.f32.xlu1 %v2549_v8  ;;  %3057 = vmatprep.mubr.bf16.mxu1 %v6917_v29 }
 0x45e   :  { %4699 = vpow2.f32 %v2353_v28 }
 0x45f   :  { %4701 = vpow2.f32 %v2359_v6 }
 0x460   :  { %4703 = vpow2.f32 %v2355_v51  ;;  %v6349_v39 = vpop.xlane.xlu0 %2577 }
 0x461   :  { %2663 = vadd.xlane.f32.xlu1 %v2552_v20 }
 0x462   :  { %v6302_v2 = vpop.eup %4689 }
 0x463   :  { %v6304_v55 = vpop.eup %4691  ;;  %v2555_v33 = vmul.f32 %v6302_v2, %v6302_v2 }
 0x464   :  { %v4392_v42 = vpop.f32.mrb[92].mxu1  ;;  %3058 = vmatmul.mubr.bf16.gmra.mrb[180].mxu1 %v2717_v34  ;;  %v2553_v16 = vmul.f32 %v6304_v55, %v6304_v55 }
 0x465   :  { %v4694_v35 = vpop.eup %4693  ;;  %2659 = vadd.xlane.f32.xlu1 %v2550_v22  ;;  %v2163_v45 = vadd.f32 %v6219_v26, %v4392_v42  ;;  %v2154_v59 = vpop.f32.mrb[93].mxu1  ;;  %3067 = vmatprep.mubr.bf16.mxu1 %v6917_v29 }
 0x466   :  { %v6317_v13 = vpop.eup %4695  ;;  %v2431_v62 = vadd.f32 1.0, %v4694_v35  ;;  %v2155_v32 = vadd.f32 %v6219_v26, %v2154_v59  ;;  %v4393_v60 = vpop.f32.mrb[94].mxu1 }
 0x467   :  { %v6320_v27 = vpop.eup %4697  ;;  %v2243_v58 = vsub.f32 0.0, %v2163_v45  ;;  %v2166_v53 = vadd.f32 %v6219_v26, %v4393_v60  ;;  %v2157_v34 = vpop.f32.mrb[95].mxu1  ;;  %v2722_v15 = vpack.c.bf16 %v6317_v13, %v6302_v2  ;;  %v2556_v54 = vmul.f32 %v6317_v13, %v6317_v13  ;;  %v60_v2 = vld [vmem:[#allocation2 + $0x4] sm:$0x3] }
 0x468   :  { %v4700_v1 = vpop.eup %4699  ;;  %4705 = vrcp.f32 %v2431_v62  ;;  %v2241_v14 = vsub.f32 0.0, %v2155_v32  ;;  %v2158_v7 = vadd.f32 %v6219_v26, %v2157_v34  ;;  %v2721_v46 = vpack.c.bf16 %v6320_v27, %v6304_v55 }
 0x469   :  { %v4702_v25 = vpop.eup %4701  ;;  %v2429_v21 = vadd.f32 1.0, %v4700_v1  ;;  %2669 = vadd.xlane.f32.xlu1 %v2555_v33  ;;  %v2244_v47 = vsub.f32 0.0, %v2166_v53  ;;  %v2365_v31 = vmul.f32 1.442695, %v2243_v58  ;;  %v2554_v50 = vmul.f32 %v6320_v27, %v6320_v27  ;;  %v6366_v58 = vpop.xlane.xlu0 %2583 }
 0x46a   :  { %v4704_v48 = vpop.eup %4703  ;;  %v2432_v57 = vadd.f32 1.0, %v4702_v25  ;;  %v2242_v12 = vsub.f32 0.0, %v2158_v7  ;;  %v2361_v18 = vmul.f32 1.442695, %v2241_v14 }
 0x46b   :  { %4707 = vrcp.f32 %v2429_v21  ;;  %v2430_v24 = vadd.f32 1.0, %v4704_v48  ;;  %v2367_v63 = vmul.f32 1.442695, %v2244_v47 }
 0x46c   :  { %4709 = vrcp.f32 %v2432_v57  ;;  %3068 = vmatmul.mubr.bf16.gmra.mrb[184].mxu1 %v2718_v41  ;;  %v2363_v10 = vmul.f32 1.442695, %v2242_v12 }
 0x46d   :  { %4711 = vrcp.f32 %v2430_v24  ;;  %2665 = vadd.xlane.f32.xlu1 %v2553_v16  ;;  %3077 = vmatprep.mubr.bf16.mxu1 %v6917_v29  ;;  %v6376_v47 = vpop.xlane.xlu0 %2579 }
 0x46e   :  { %4713 = vpow2.f32 %v2365_v31 }
 0x46f   :  { %4715 = vpow2.f32 %v2361_v18 }
 0x470   :  { %4717 = vpow2.f32 %v2367_v63 }
 0x471   :  { %4719 = vpow2.f32 %v2363_v10  ;;  %2671 = vadd.xlane.f32.xlu1 %v2556_v54  ;;  %v6392_v31 = vpop.xlane.xlu0 %2589 }
 0x472   :  { %v6340_v17 = vpop.eup %4705 }
 0x473   :  { %v2559_v38 = vmul.f32 %v6340_v17, %v6340_v17 }
 0x474   :  { %v4396_v36 = vpop.f32.mrb[96].mxu1  ;;  %3078 = vmatmul.mubr.bf16.gmra.mrb[188].mxu1 %v2719_v43 }
 0x475   :  { %v6347_v41 = vpop.eup %4707  ;;  %2667 = vadd.xlane.f32.xlu1 %v2554_v50  ;;  %v2179_v49 = vadd.f32 %v6219_v26, %v4396_v36  ;;  %v2170_v8 = vpop.f32.mrb[97].mxu1  ;;  %3087 = vmatprep.mubr.bf16.mxu1 %v6917_v29 }
 0x476   :  { %v6355_v37 = vpop.eup %4709  ;;  %v2171_v28 = vadd.f32 %v6219_v26, %v2170_v8  ;;  %v4397_v19 = vpop.f32.mrb[98].mxu1  ;;  %v2557_v1 = vmul.f32 %v6347_v41, %v6347_v41 }
 0x477   :  { %v6358_v61 = vpop.eup %4711  ;;  %v2247_v11 = vsub.f32 0.0, %v2179_v49  ;;  %v2182_v43 = vadd.f32 %v6219_v26, %v4397_v19  ;;  %v2173_v40 = vpop.f32.mrb[99].mxu1  ;;  %v2724_v6 = vpack.c.bf16 %v6355_v37, %v6340_v17  ;;  %v2560_v21 = vmul.f32 %v6355_v37, %v6355_v37 }
 0x478   :  { %v4714_v51 = vpop.eup %4713  ;;  %v2245_v20 = vsub.f32 0.0, %v2171_v28  ;;  %v2174_v22 = vadd.f32 %v6219_v26, %v2173_v40  ;;  %v2723_v42 = vpack.c.bf16 %v6358_v61, %v6347_v41  ;;  %v2558_v56 = vmul.f32 %v6358_v61, %v6358_v61  ;;  %v6405_v36 = vpop.xlane.xlu0 %2585 }
 0x479   :  { %v4716_v35 = vpop.eup %4715  ;;  %v2435_v45 = vadd.f32 1.0, %v4714_v51  ;;  %2677 = vadd.xlane.f32.xlu1 %v2559_v38  ;;  %v2248_v59 = vsub.f32 0.0, %v2182_v43  ;;  %v2373_v34 = vmul.f32 1.442695, %v2247_v11  ;;  %v6428_v51 = vrot.slane %v60_v2, %v586_v44 }
 0x47a   :  { %v4718_v33 = vpop.eup %4717  ;;  %v2433_v62 = vadd.f32 1.0, %v4716_v35  ;;  %v2246_v32 = vsub.f32 0.0, %v2174_v22  ;;  %v2369_v14 = vmul.f32 1.442695, %v2245_v20 }
 0x47b   :  { %v4720_v60 = vpop.eup %4719  ;;  %4721 = vrcp.f32 %v2435_v45  ;;  %v2436_v53 = vadd.f32 1.0, %v4718_v33  ;;  %v2375_v7 = vmul.f32 1.442695, %v2248_v59 }
 0x47c   :  { %4723 = vrcp.f32 %v2433_v62  ;;  %v2434_v26 = vadd.f32 1.0, %v4720_v60  ;;  %3088 = vmatmul.mubr.bf16.gmra.mrb[192].mxu1 %v2720_v9  ;;  %v2371_v25 = vmul.f32 1.442695, %v2246_v32  ;;  %v6410_v38 = vpop.xlane.xlu0 %2591  ;;  %v2572_v32 = vpop.xlane.xlu1 %2571 }
 0x47d   :  { %4725 = vrcp.f32 %v2436_v53  ;;  %2673 = vadd.xlane.f32.xlu1 %v2557_v1  ;;  %3097 = vmatprep.mubr.bf16.mxu1 %v6917_v29 }
 0x47e   :  { %4727 = vrcp.f32 %v2434_v26 }
 0x47f   :  { %4729 = vpow2.f32 %v2373_v34 }
 0x480   :  { %4731 = vpow2.f32 %v2369_v14  ;;  %v6432_v20 = vpop.xlane.xlu0 %2587 }
 0x481   :  { %4733 = vpow2.f32 %v2375_v7  ;;  %2679 = vadd.xlane.f32.xlu1 %v2560_v21 }
 0x482   :  { %4735 = vpow2.f32 %v2371_v25 }
 0x484   :  { %3098 = vmatmul.mubr.bf16.gmra.mrb[196].mxu1 %v2721_v46 }
 0x485   :  { %v6383_v4 = vpop.eup %4721  ;;  %2675 = vadd.xlane.f32.xlu1 %v2558_v56  ;;  %3107 = vmatprep.mubr.bf16.mxu1 %v6917_v29 }
 0x486   :  { %v6386_v9 = vpop.eup %4723  ;;  %v2563_v48 = vmul.f32 %v6383_v4, %v6383_v4 }
 0x487   :  { %v6390_v57 = vpop.eup %4725  ;;  %v2561_v10 = vmul.f32 %v6386_v9, %v6386_v9 }
 0x488   :  { %v6394_v12 = vpop.eup %4727  ;;  %v2726_v55 = vpack.c.bf16 %v6390_v57, %v6383_v4  ;;  %v2564_v8 = vmul.f32 %v6390_v57, %v6390_v57 }
 0x489   :  { %v4730_v27 = vpop.eup %4729  ;;  %2685 = vadd.xlane.f32.xlu1 %v2563_v48  ;;  %v2725_v46 = vpack.c.bf16 %v6394_v12, %v6386_v9  ;;  %v2562_v28 = vmul.f32 %v6394_v12, %v6394_v12 }
 0x48a   :  { %v4732_v24 = vpop.eup %4731  ;;  %v2439_v18 = vadd.f32 1.0, %v4730_v27 }
 0x48b   :  { %v4734_v16 = vpop.eup %4733  ;;  %v2437_v63 = vadd.f32 1.0, %v4732_v24 }
 0x48c   :  { %v4736_v54 = vpop.eup %4735  ;;  %4737 = vrcp.f32 %v2439_v18  ;;  %v2440_v50 = vadd.f32 1.0, %v4734_v16  ;;  %3108 = vmatmul.mubr.bf16.gmra.mrb[200].mxu1 %v2722_v15 }
 0x48d   :  { %4739 = vrcp.f32 %v2437_v63  ;;  %v2438_v49 = vadd.f32 1.0, %v4736_v54  ;;  %2681 = vadd.xlane.f32.xlu1 %v2561_v10  ;;  %3117 = vmatprep.mubr.bf16.mxu1 %v6917_v29 }
 0x48e   :  { %4741 = vrcp.f32 %v2440_v50 }
 0x48f   :  { %4743 = vrcp.f32 %v2438_v49 }
 0x491   :  { %2687 = vadd.xlane.f32.xlu1 %v2564_v8 }
 0x494   :  { %3118 = vmatmul.mubr.bf16.gmra.mrb[204].mxu1 %v2723_v42  ;;  %v6436_v42 = vrot.slane %v60_v2, %v590_v3 }
 0x495   :  { %2683 = vadd.xlane.f32.xlu1 %v2562_v28  ;;  %3127 = vmatprep.mubr.bf16.mxu1 %v6917_v29 }
 0x496   :  { %v6418_v13 = vpop.eup %4737 }
 0x497   :  { %v6420_v15 = vpop.eup %4739  ;;  %v2567_v19 = vmul.f32 %v6418_v13, %v6418_v13  ;;  %v2859_v11 = vpop.f32.mrb[100].mxu1 }
 0x498   :  { %v6424_v43 = vpop.eup %4741  ;;  %v3178_v40 = vmul.f32 2.0, %v2859_v11  ;;  %v2861_v41 = vpop.f32.mrb[101].mxu1  ;;  %v2565_v53 = vmul.f32 %v6420_v15, %v6420_v15 }
 0x499   :  { %v6430_v61 = vpop.eup %4743  ;;  %2693 = vadd.xlane.f32.xlu1 %v2567_v19  ;;  %v3179_v22 = vmul.f32 2.0, %v2861_v41  ;;  %v2863_v35 = vpop.f32.mrb[102].mxu1  ;;  %v2728_v45 = vpack.c.bf16 %v6424_v43, %v6418_v13  ;;  %v2568_v28 = vmul.f32 %v6424_v43, %v6424_v43 }
 0x49a   :  { %v3306_v59 = vsub.f32 %v6306_v5, %v3178_v40  ;;  %v3180_v33 = vmul.f32 2.0, %v2863_v35  ;;  %v2865_v44 = vpop.f32.mrb[103].mxu1  ;;  %v2727_v62 = vpack.c.bf16 %v6430_v61, %v6420_v15  ;;  %v2566_v21 = vmul.f32 %v6430_v61, %v6430_v61 }
 0x49b   :  { %v3307_v60 = vsub.f32 %v6306_v5, %v3179_v22  ;;  %v3181_v34 = vmul.f32 2.0, %v2865_v44  ;;  %v6453_v5 = vpop.xlane.xlu0 %2597 }
 0x49c   :  { %v3445_v3 = vadd.f32 %v6428_v51, %v3306_v59  ;;  %v3308_v1 = vsub.f32 %v2572_v32, %v3180_v33  ;;  %3128 = vmatmul.mubr.bf16.gmra.mrb[208].mxu1 %v2724_v6 }
 0x49d   :  { %v3446_v26 = vadd.f32 %v6436_v42, %v3307_v60  ;;  %2689 = vadd.xlane.f32.xlu1 %v2565_v53  ;;  %v3309_v14 = vsub.f32 %v2572_v32, %v3181_v34  ;;  %3137 = vmatprep.mubr.bf16.mxu1 %v6917_v29 }
 0x49e   :  { %v3447_v7 = vadd.f32 %v6428_v51, %v3308_v1  ;;  %v3573_v48 = vmax.f32 %v3445_v3, 0.0 }
 0x49f   :  { %v3448_v25 = vadd.f32 %v6436_v42, %v3309_v14  ;;  %v2869_v56 = vpop.f32.mrb[104].mxu1  ;;  %v3574_v6 = vmax.f32 %v3446_v26, 0.0  ;;  %v6467_v40 = vpop.xlane.xlu0 %2593 }
 0x4a0   :  { %v3575_v27 = vmax.f32 %v3447_v7, 0.0  ;;  %v3182_v17 = vmul.f32 2.0, %v2869_v56  ;;  %v2871_v37 = vpop.f32.mrb[105].mxu1 }
 0x4a1   :  { %v3576_v24 = vmax.f32 %v3448_v25, 0.0  ;;  %2691 = vadd.xlane.f32.xlu1 %v2566_v21  ;;  %v3183_v18 = vmul.f32 2.0, %v2871_v37  ;;  %v2873_v16 = vpop.f32.mrb[106].mxu1 }
 0x4a2   :  { %v3701_v63 = vmin.f32 %v3573_v48, %v3575_v27  ;;  %v3310_v10 = vsub.f32 %v6297_v52, %v3182_v17  ;;  %v3184_v54 = vmul.f32 2.0, %v2873_v16  ;;  %v2875_v50 = vpop.f32.mrb[107].mxu1 }
 0x4a3   :  { %v3738_v49 = vmin.f32 %v3574_v6, %v3576_v24  ;;  %v3311_v8 = vsub.f32 %v6297_v52, %v3183_v18  ;;  %v3185_v2 = vmul.f32 2.0, %v2875_v50  ;;  %v6475_v7 = vpop.xlane.xlu0 %2599 }
 0x4a4   :  { %v3449_v19 = vadd.f32 %v6428_v51, %v3310_v10  ;;  %v3312_v11 = vsub.f32 %v6326_v23, %v3184_v54  ;;  %3138 = vmatmul.mubr.bf16.gmra.mrb[212].mxu1 %v2725_v46 }
 0x4a5   :  { %v3450_v41 = vadd.f32 %v6436_v42, %v3311_v8  ;;  %2695 = vadd.xlane.f32.xlu1 %v2568_v28  ;;  %v3313_v22 = vsub.f32 %v6326_v23, %v3185_v2  ;;  %3147 = vmatprep.mubr.bf16.mxu1 %v6917_v29 }
 0x4a6   :  { %v3577_v52 = vmax.f32 %v3449_v19, 0.0  ;;  %v3451_v35 = vadd.f32 %v6428_v51, %v3312_v11 }
 0x4a7   :  { %v3578_v59 = vmax.f32 %v3450_v41, 0.0  ;;  %v3452_v33 = vadd.f32 %v6436_v42, %v3313_v22  ;;  %v2879_v44 = vpop.f32.mrb[108].mxu1 }
 0x4a8   :  { %v3702_v32 = vmin.f32 %v3701_v63, %v3577_v52  ;;  %v3579_v60 = vmax.f32 %v3451_v35, 0.0  ;;  %v3186_v9 = vmul.f32 2.0, %v2879_v44  ;;  %v2881_v12 = vpop.f32.mrb[109].mxu1 }
 0x4a9   :  { %v3739_v46 = vmin.f32 %v3738_v49, %v3578_v59  ;;  %v3580_v53 = vmax.f32 %v3452_v33, 0.0  ;;  %v3187_v34 = vmul.f32 2.0, %v2881_v12  ;;  %v2883_v3 = vpop.f32.mrb[110].mxu1  ;;  %v6488_v49 = vpop.xlane.xlu0 %2595 }
 0x4aa   :  { %v3703_v1 = vmin.f32 %v3702_v32, %v3579_v60  ;;  %v3314_v23 = vsub.f32 %v6349_v39, %v3186_v9  ;;  %v3188_v26 = vmul.f32 2.0, %v2883_v3  ;;  %v2885_v14 = vpop.f32.mrb[111].mxu1 }
 0x4ab   :  { %v3740_v25 = vmin.f32 %v3739_v46, %v3580_v53  ;;  %v3315_v21 = vsub.f32 %v6349_v39, %v3187_v34  ;;  %v3189_v56 = vmul.f32 2.0, %v2885_v14 }
 0x4ac   :  { %v3453_v48 = vadd.f32 %v6428_v51, %v3314_v23  ;;  %v3316_v27 = vsub.f32 %v6376_v47, %v3188_v26  ;;  %3148 = vmatmul.mubr.bf16.gmra.mrb[216].mxu1 %v2726_v55 }
 0x4ad   :  { %v3454_v17 = vadd.f32 %v6436_v42, %v3315_v21  ;;  %v3317_v37 = vsub.f32 %v6376_v47, %v3189_v56  ;;  %3157 = vmatprep.mubr.bf16.mxu1 %v6917_v29  ;;  %v6501_v60 = vpop.xlane.xlu0 %2605 }
 0x4ae   :  { %v3581_v6 = vmax.f32 %v3453_v48, 0.0  ;;  %v3455_v24 = vadd.f32 %v6428_v51, %v3316_v27 }
 0x4af   :  { %v3582_v18 = vmax.f32 %v3454_v17, 0.0  ;;  %v3456_v39 = vadd.f32 %v6436_v42, %v3317_v37  ;;  %v2889_v16 = vpop.f32.mrb[112].mxu1 }
 0x4b0   :  { %v3704_v63 = vmin.f32 %v3703_v1, %v3581_v6  ;;  %v3583_v10 = vmax.f32 %v3455_v24, 0.0  ;;  %v3190_v54 = vmul.f32 2.0, %v2889_v16  ;;  %v2891_v50 = vpop.f32.mrb[113].mxu1 }
 0x4b1   :  { %v3741_v4 = vmin.f32 %v3740_v25, %v3582_v18  ;;  %v3584_v57 = vmax.f32 %v3456_v39, 0.0  ;;  %v3191_v55 = vmul.f32 2.0, %v2891_v50  ;;  %v2893_v8 = vpop.f32.mrb[114].mxu1  ;;  %v6511_v27 = vpop.xlane.xlu0 %2601 }
 0x4b2   :  { %v3705_v47 = vmin.f32 %v3704_v63, %v3583_v10  ;;  %v3318_v28 = vsub.f32 %v6336_v0, %v3190_v54  ;;  %v3192_v2 = vmul.f32 2.0, %v2893_v8  ;;  %v2895_v19 = vpop.f32.mrb[115].mxu1 }
 0x4b3   :  { %v3742_v11 = vmin.f32 %v3741_v4, %v3584_v57  ;;  %v3319_v41 = vsub.f32 %v6336_v0, %v3191_v55  ;;  %v3193_v22 = vmul.f32 2.0, %v2895_v19 }
 0x4b4   :  { %v3457_v52 = vadd.f32 %v6428_v51, %v3318_v28  ;;  %v3320_v35 = vsub.f32 %v6366_v58, %v3192_v2  ;;  %3158 = vmatmul.mubr.bf16.gmra.mrb[220].mxu1 %v2727_v62 }
 0x4b5   :  { %v3458_v59 = vadd.f32 %v6436_v42, %v3319_v41  ;;  %v3321_v33 = vsub.f32 %v6366_v58, %v3193_v22  ;;  %3167 = vmatprep.mubr.bf16.mxu1 %v6917_v29  ;;  %v6518_v8 = vpop.xlane.xlu0 %2607 }
 0x4b6   :  { %v3585_v44 = vmax.f32 %v3457_v52, 0.0  ;;  %v3459_v32 = vadd.f32 %v6428_v51, %v3320_v35 }
 0x4b7   :  { %v3586_v0 = vmax.f32 %v3458_v59, 0.0  ;;  %v3460_v9 = vadd.f32 %v6436_v42, %v3321_v33  ;;  %v2899_v12 = vpop.f32.mrb[116].mxu1 }
 0x4b8   :  { %v3706_v46 = vmin.f32 %v3705_v47, %v3585_v44  ;;  %v3587_v53 = vmax.f32 %v3459_v32, 0.0  ;;  %v3194_v34 = vmul.f32 2.0, %v2899_v12  ;;  %v2901_v15 = vpop.f32.mrb[117].mxu1 }
 0x4b9   :  { %v3743_v61 = vmin.f32 %v3742_v11, %v3586_v0  ;;  %v3588_v62 = vmax.f32 %v3460_v9, 0.0  ;;  %v3195_v3 = vmul.f32 2.0, %v2901_v15  ;;  %v2903_v1 = vpop.f32.mrb[118].mxu1  ;;  %v6527_v12 = vpop.xlane.xlu0 %2603 }
 0x4ba   :  { %v3707_v58 = vmin.f32 %v3706_v46, %v3587_v53  ;;  %v3322_v29 = vsub.f32 %v6405_v36, %v3194_v34  ;;  %v3196_v23 = vmul.f32 2.0, %v2903_v1  ;;  %v2905_v26 = vpop.f32.mrb[119].mxu1 }
 0x4bb   :  { %v3744_v14 = vmin.f32 %v3743_v61, %v3588_v62  ;;  %v3323_v25 = vsub.f32 %v6405_v36, %v3195_v3  ;;  %v3197_v21 = vmul.f32 2.0, %v2905_v26 }
 0x4bc   :  { %v3461_v56 = vadd.f32 %v6428_v51, %v3322_v29  ;;  %v3324_v48 = vsub.f32 %v6432_v20, %v3196_v23  ;;  %3168 = vmatmul.mubr.bf16.gmra.mrb[224].mxu1 %v2728_v45 }
 0x4bd   :  { %v3462_v17 = vadd.f32 %v6436_v42, %v3323_v25  ;;  %v3325_v37 = vsub.f32 %v6432_v20, %v3197_v21 }
 0x4be   :  { %v3589_v6 = vmax.f32 %v3461_v56, 0.0  ;;  %v3463_v24 = vadd.f32 %v6428_v51, %v3324_v48  ;;  %v6536_v48 = vpop.xlane.xlu0 %2613 }
 0x4bf   :  { %v3590_v18 = vmax.f32 %v3462_v17, 0.0  ;;  %v3464_v36 = vadd.f32 %v6436_v42, %v3325_v37  ;;  %v2909_v39 = vpop.f32.mrb[120].mxu1 }
 0x4c0   :  { %v3708_v16 = vmin.f32 %v3707_v58, %v3589_v6  ;;  %v3591_v63 = vmax.f32 %v3463_v24, 0.0  ;;  %v3198_v10 = vmul.f32 2.0, %v2909_v39  ;;  %v2911_v54 = vpop.f32.mrb[121].mxu1 }
 0x4c1   :  { %v3745_v50 = vmin.f32 %v3744_v14, %v3590_v18  ;;  %v3592_v13 = vmax.f32 %v3464_v36, 0.0  ;;  %v3199_v43 = vmul.f32 2.0, %v2911_v54  ;;  %v2913_v45 = vpop.f32.mrb[122].mxu1 }
 0x4c2   :  { %v3709_v4 = vmin.f32 %v3708_v16, %v3591_v63  ;;  %v3326_v57 = vsub.f32 %v6392_v31, %v3198_v10  ;;  %v3200_v55 = vmul.f32 2.0, %v2913_v45  ;;  %v2915_v20 = vpop.f32.mrb[123].mxu1 }
 0x4c3   :  { %v3746_v47 = vmin.f32 %v3745_v50, %v3592_v13  ;;  %v3327_v28 = vsub.f32 %v6392_v31, %v3199_v43  ;;  %v3201_v2 = vmul.f32 2.0, %v2915_v20  ;;  %v6543_v20 = vpop.xlane.xlu0 %2609 }
 0x4c4   :  { %v3465_v19 = vadd.f32 %v6428_v51, %v3326_v57  ;;  %v3328_v11 = vsub.f32 %v6410_v38, %v3200_v55 }
 0x4c5   :  { %v3466_v41 = vadd.f32 %v6436_v42, %v3327_v28  ;;  %v3329_v22 = vsub.f32 %v6410_v38, %v3201_v2 }
 0x4c6   :  { %v3593_v52 = vmax.f32 %v3465_v19, 0.0  ;;  %v3467_v35 = vadd.f32 %v6428_v51, %v3328_v11  ;;  %v6548_v11 = vpop.xlane.xlu1 %2637 }
 0x4c7   :  { %v3594_v59 = vmax.f32 %v3466_v41, 0.0  ;;  %v3468_v33 = vadd.f32 %v6436_v42, %v3329_v22  ;;  %v2919_v44 = vpop.f32.mrb[124].mxu1 }
 0x4c8   :  { %v3710_v32 = vmin.f32 %v3709_v4, %v3593_v52  ;;  %v3595_v0 = vmax.f32 %v3467_v35, 0.0  ;;  %v3202_v9 = vmul.f32 2.0, %v2919_v44  ;;  %v2921_v31 = vpop.f32.mrb[125].mxu1 }
 0x4c9   :  { %v3747_v46 = vmin.f32 %v3746_v47, %v3594_v59  ;;  %v3596_v53 = vmax.f32 %v3468_v33, 0.0  ;;  %v3203_v34 = vmul.f32 2.0, %v2921_v31  ;;  %v2923_v15 = vpop.f32.mrb[126].mxu1 }
 0x4ca   :  { %v3711_v61 = vmin.f32 %v3710_v32, %v3595_v0  ;;  %v3330_v38 = vsub.f32 %v6467_v40, %v3202_v9  ;;  %v3204_v62 = vmul.f32 2.0, %v2923_v15  ;;  %v2925_v3 = vpop.f32.mrb[127].mxu1 }
 0x4cb   :  { %v3748_v1 = vmin.f32 %v3747_v46, %v3596_v53  ;;  %v3331_v58 = vsub.f32 %v6467_v40, %v3203_v34  ;;  %v3205_v29 = vmul.f32 2.0, %v2925_v3  ;;  %v6552_v34 = vpop.xlane.xlu0 %2615 }
 0x4cc   :  { %v3469_v23 = vadd.f32 %v6428_v51, %v3330_v38  ;;  %v3332_v26 = vsub.f32 %v6488_v49, %v3204_v62 }
 0x4cd   :  { %v3470_v14 = vadd.f32 %v6436_v42, %v3331_v58  ;;  %v3333_v25 = vsub.f32 %v6488_v49, %v3205_v29 }
 0x4ce   :  { %v3597_v21 = vmax.f32 %v3469_v23, 0.0  ;;  %v3471_v56 = vadd.f32 %v6428_v51, %v3332_v26 }
 0x4cf   :  { %v3598_v17 = vmax.f32 %v3470_v14, 0.0  ;;  %v3472_v37 = vadd.f32 %v6436_v42, %v3333_v25  ;;  %v2929_v6 = vpop.f32.mrb[128].mxu1 }
 0x4d0   :  { %v3712_v24 = vmin.f32 %v3711_v61, %v3597_v21  ;;  %v3599_v40 = vmax.f32 %v3471_v56, 0.0  ;;  %v3206_v18 = vmul.f32 2.0, %v2929_v6  ;;  %v2931_v36 = vpop.f32.mrb[129].mxu1  ;;  %v2612_v6 = vpop.xlane.xlu0 %2611 }
 0x4d1   :  { %v3749_v39 = vmin.f32 %v3748_v1, %v3598_v17  ;;  %v3600_v16 = vmax.f32 %v3472_v37, 0.0  ;;  %v3207_v63 = vmul.f32 2.0, %v2931_v36  ;;  %v2933_v10 = vpop.f32.mrb[130].mxu1  ;;  %v6557_v1 = vpop.xlane.xlu1 %2633 }
 0x4d2   :  { %v3713_v54 = vmin.f32 %v3712_v24, %v3599_v40  ;;  %v3334_v49 = vsub.f32 %v6453_v5, %v3206_v18  ;;  %v3208_v50 = vmul.f32 2.0, %v2933_v10  ;;  %v2935_v13 = vpop.f32.mrb[131].mxu1 }
 0x4d3   :  { %v3750_v43 = vmin.f32 %v3749_v39, %v3600_v16  ;;  %v3335_v45 = vsub.f32 %v6453_v5, %v3207_v63  ;;  %v3209_v4 = vmul.f32 2.0, %v2935_v13 }
 0x4d4   :  { %v3473_v57 = vadd.f32 %v6428_v51, %v3334_v49  ;;  %v3336_v55 = vsub.f32 %v6475_v7, %v3208_v50 }
 0x4d5   :  { %v3474_v47 = vadd.f32 %v6436_v42, %v3335_v45  ;;  %v3337_v28 = vsub.f32 %v6475_v7, %v3209_v4  ;;  %v6564_v10 = vpop.xlane.xlu1 %2639 }
 0x4d6   :  { %v3601_v2 = vmax.f32 %v3473_v57, 0.0  ;;  %v3475_v19 = vadd.f32 %v6428_v51, %v3336_v55 }
 0x4d7   :  { %v3602_v41 = vmax.f32 %v3474_v47, 0.0  ;;  %v3476_v22 = vadd.f32 %v6436_v42, %v3337_v28  ;;  %v2939_v5 = vpop.f32.mrb[132].mxu1  ;;  %v6572_v47 = vpop.xlane.xlu0 %2621 }
 0x4d8   :  { %v3714_v52 = vmin.f32 %v3713_v54, %v3601_v2  ;;  %v3603_v35 = vmax.f32 %v3475_v19, 0.0  ;;  %v3210_v59 = vmul.f32 2.0, %v2939_v5  ;;  %v2941_v33 = vpop.f32.mrb[133].mxu1 }
 0x4d9   :  { %v3751_v44 = vmin.f32 %v3750_v43, %v3602_v41  ;;  %v3604_v32 = vmax.f32 %v3476_v22, 0.0  ;;  %v3211_v0 = vmul.f32 2.0, %v2941_v33  ;;  %v2943_v9 = vpop.f32.mrb[134].mxu1 }
 0x4da   :  { %v3715_v31 = vmin.f32 %v3714_v52, %v3603_v35  ;;  %v3338_v7 = vsub.f32 %v6511_v27, %v3210_v59  ;;  %v3212_v46 = vmul.f32 2.0, %v2943_v9  ;;  %v2945_v53 = vpop.f32.mrb[135].mxu1  ;;  %v6575_v52 = vpop.xlane.xlu1 %2635 }
 0x4db   :  { %v3752_v15 = vmin.f32 %v3751_v44, %v3604_v32  ;;  %v3339_v61 = vsub.f32 %v6511_v27, %v3211_v0  ;;  %v3213_v38 = vmul.f32 2.0, %v2945_v53 }
 0x4dc   :  { %v3477_v62 = vadd.f32 %v6428_v51, %v3338_v7  ;;  %v3340_v3 = vsub.f32 %v6527_v12, %v3212_v46 }
 0x4dd   :  { %v3478_v58 = vadd.f32 %v6436_v42, %v3339_v61  ;;  %v3341_v29 = vsub.f32 %v6527_v12, %v3213_v38  ;;  %v2618_v61 = vpop.xlane.xlu0 %2617 }
 0x4de   :  { %v3605_v23 = vmax.f32 %v3477_v62, 0.0  ;;  %v3479_v26 = vadd.f32 %v6428_v51, %v3340_v3 }
 0x4df   :  { %v3606_v14 = vmax.f32 %v3478_v58, 0.0  ;;  %v3480_v25 = vadd.f32 %v6436_v42, %v3341_v29  ;;  %v2949_v21 = vpop.f32.mrb[136].mxu1  ;;  %v6582_v29 = vpop.xlane.xlu1 %2645 }
 0x4e0   :  { %v3716_v56 = vmin.f32 %v3715_v31, %v3605_v23  ;;  %v3607_v27 = vmax.f32 %v3479_v26, 0.0  ;;  %v3214_v17 = vmul.f32 2.0, %v2949_v21  ;;  %v2951_v37 = vpop.f32.mrb[137].mxu1 }
 0x4e1   :  { %v3753_v24 = vmin.f32 %v3752_v15, %v3606_v14  ;;  %v3608_v40 = vmax.f32 %v3480_v25, 0.0  ;;  %v3215_v18 = vmul.f32 2.0, %v2951_v37  ;;  %v2953_v36 = vpop.f32.mrb[138].mxu1 }
 0x4e2   :  { %v3717_v39 = vmin.f32 %v3716_v56, %v3607_v27  ;;  %v3342_v16 = vsub.f32 %v6501_v60, %v3214_v17  ;;  %v3216_v12 = vmul.f32 2.0, %v2953_v36  ;;  %v2955_v63 = vpop.f32.mrb[139].mxu1 }
 0x4e3   :  { %v3754_v54 = vmin.f32 %v3753_v24, %v3608_v40  ;;  %v3343_v49 = vsub.f32 %v6501_v60, %v3215_v18  ;;  %v3217_v50 = vmul.f32 2.0, %v2955_v63 }
 0x4e4   :  { %v3481_v13 = vadd.f32 %v6428_v51, %v3342_v16  ;;  %v3344_v43 = vsub.f32 %v6518_v8, %v3216_v12 }
 0x4e5   :  { %v3482_v45 = vadd.f32 %v6436_v42, %v3343_v49  ;;  %v3345_v4 = vsub.f32 %v6518_v8, %v3217_v50  ;;  %v6591_v50 = vpop.xlane.xlu1 %2641 }
 0x4e6   :  { %v3609_v57 = vmax.f32 %v3481_v13, 0.0  ;;  %v3483_v55 = vadd.f32 %v6428_v51, %v3344_v43 }
 0x4e7   :  { %v3610_v28 = vmax.f32 %v3482_v45, 0.0  ;;  %v3484_v2 = vadd.f32 %v6436_v42, %v3345_v4  ;;  %v2959_v19 = vpop.f32.mrb[140].mxu1 }
 0x4e8   :  { %v3718_v41 = vmin.f32 %v3717_v39, %v3609_v57  ;;  %v3611_v60 = vmax.f32 %v3483_v55, 0.0  ;;  %v3218_v22 = vmul.f32 2.0, %v2959_v19  ;;  %v2961_v5 = vpop.f32.mrb[141].mxu1  ;;  %v6586_v39 = vpop.xlane.xlu0 %2623 }
 0x4e9   :  { %v3755_v35 = vmin.f32 %v3754_v54, %v3610_v28  ;;  %v3612_v59 = vmax.f32 %v3484_v2, 0.0  ;;  %v3219_v33 = vmul.f32 2.0, %v2961_v5  ;;  %v2963_v44 = vpop.f32.mrb[142].mxu1 }
 0x4ea   :  { %v3719_v8 = vmin.f32 %v3718_v41, %v3611_v60  ;;  %v3346_v32 = vsub.f32 %v6543_v20, %v3218_v22  ;;  %v3220_v0 = vmul.f32 2.0, %v2963_v44  ;;  %v2965_v9 = vpop.f32.mrb[143].mxu1 }
 0x4eb   :  { %v3756_v31 = vmin.f32 %v3755_v35, %v3612_v59  ;;  %v3347_v7 = vsub.f32 %v6543_v20, %v3219_v33  ;;  %v3221_v46 = vmul.f32 2.0, %v2965_v9 }
 0x4ec   :  { %v3485_v53 = vadd.f32 %v6428_v51, %v3346_v32  ;;  %v3348_v15 = vsub.f32 %v2612_v6, %v3220_v0  ;;  %v2620_v60 = vpop.xlane.xlu0 %2619  ;;  %v6597_v32 = vpop.xlane.xlu1 %2647 }
 0x4ed   :  { %v3486_v38 = vadd.f32 %v6436_v42, %v3347_v7  ;;  %v3349_v62 = vsub.f32 %v2612_v6, %v3221_v46 }
 0x4ee   :  { %v3613_v3 = vmax.f32 %v3485_v53, 0.0  ;;  %v3487_v58 = vadd.f32 %v6428_v51, %v3348_v15 }
 0x4ef   :  { %v3614_v23 = vmax.f32 %v3486_v38, 0.0  ;;  %v3488_v26 = vadd.f32 %v6436_v42, %v3349_v62  ;;  %v2969_v14 = vpop.f32.mrb[144].mxu1 }
 0x4f0   :  { %v3720_v25 = vmin.f32 %v3719_v8, %v3613_v3  ;;  %v3615_v21 = vmax.f32 %v3487_v58, 0.0  ;;  %v3222_v20 = vmul.f32 2.0, %v2969_v14  ;;  %v2971_v56 = vpop.f32.mrb[145].mxu1  ;;  %v6602_v3 = vpop.xlane.xlu0 %2629 }
 0x4f1   :  { %v3757_v27 = vmin.f32 %v3756_v31, %v3614_v23  ;;  %v3616_v17 = vmax.f32 %v3488_v26, 0.0  ;;  %v3223_v37 = vmul.f32 2.0, %v2971_v56  ;;  %v2973_v24 = vpop.f32.mrb[146].mxu1 }
 0x4f2   :  { %v3721_v40 = vmin.f32 %v3720_v25, %v3615_v21  ;;  %v3350_v6 = vsub.f32 %v6536_v48, %v3222_v20  ;;  %v3224_v18 = vmul.f32 2.0, %v2973_v24  ;;  %v2975_v36 = vpop.f32.mrb[147].mxu1  ;;  %v6605_v20 = vpop.xlane.xlu1 %2643 }
 0x4f3   :  { %v3758_v16 = vmin.f32 %v3757_v27, %v3616_v17  ;;  %v3351_v12 = vsub.f32 %v6536_v48, %v3223_v37  ;;  %v3225_v63 = vmul.f32 2.0, %v2975_v36 }
 0x4f4   :  { %v3489_v54 = vadd.f32 %v6428_v51, %v3350_v6  ;;  %v3352_v49 = vsub.f32 %v6552_v34, %v3224_v18 }
 0x4f5   :  { %v3490_v13 = vadd.f32 %v6436_v42, %v3351_v12  ;;  %v3353_v43 = vsub.f32 %v6552_v34, %v3225_v63 }
 0x4f6   :  { %v3617_v45 = vmax.f32 %v3489_v54, 0.0  ;;  %v3491_v4 = vadd.f32 %v6428_v51, %v3352_v49  ;;  %v2626_v49 = vpop.xlane.xlu0 %2625 }
 0x4f7   :  { %v3618_v57 = vmax.f32 %v3490_v13, 0.0  ;;  %v3492_v55 = vadd.f32 %v6436_v42, %v3353_v43  ;;  %v2979_v28 = vpop.f32.mrb[148].mxu1 }
 0x4f8   :  { %v3722_v2 = vmin.f32 %v3721_v40, %v3617_v45  ;;  %v3619_v48 = vmax.f32 %v3491_v4, 0.0  ;;  %v3226_v19 = vmul.f32 2.0, %v2979_v28  ;;  %v2981_v41 = vpop.f32.mrb[149].mxu1 }
 0x4f9   :  { %v3759_v22 = vmin.f32 %v3758_v16, %v3618_v57  ;;  %v3620_v5 = vmax.f32 %v3492_v55, 0.0  ;;  %v3227_v35 = vmul.f32 2.0, %v2981_v41  ;;  %v2983_v59 = vpop.f32.mrb[150].mxu1  ;;  %v6614_v57 = vpop.xlane.xlu1 %2653 }
 0x4fa   :  { %v3723_v33 = vmin.f32 %v3722_v2, %v3619_v48  ;;  %v3354_v44 = vsub.f32 %v2618_v61, %v3226_v19  ;;  %v3228_v8 = vmul.f32 2.0, %v2983_v59  ;;  %v2985_v34 = vpop.f32.mrb[151].mxu1 }
 0x4fb   :  { %v3760_v0 = vmin.f32 %v3759_v22, %v3620_v5  ;;  %v3355_v9 = vsub.f32 %v2618_v61, %v3227_v35  ;;  %v3229_v31 = vmul.f32 2.0, %v2985_v34 }
 0x4fc   :  { %v3493_v7 = vadd.f32 %v6428_v51, %v3354_v44  ;;  %v3356_v46 = vsub.f32 %v2620_v60, %v3228_v8  ;;  %v2628_v8 = vpop.xlane.xlu0 %2627 }
 0x4fd   :  { %v3494_v53 = vadd.f32 %v6436_v42, %v3355_v9  ;;  %v3357_v15 = vsub.f32 %v2620_v60, %v3229_v31 }
 0x4fe   :  { %v3621_v38 = vmax.f32 %v3493_v7, 0.0  ;;  %v3495_v62 = vadd.f32 %v6428_v51, %v3356_v46  ;;  %v6618_v46 = vpop.xlane.xlu1 %2649 }
 0x4ff   :  { %v3622_v58 = vmax.f32 %v3494_v53, 0.0  ;;  %v3496_v23 = vadd.f32 %v6436_v42, %v3357_v15  ;;  %v2989_v26 = vpop.f32.mrb[152].mxu1 }
 0x500   :  { %v3724_v14 = vmin.f32 %v3723_v33, %v3621_v38  ;;  %v3623_v25 = vmax.f32 %v3495_v62, 0.0  ;;  %v3230_v21 = vmul.f32 2.0, %v2989_v26  ;;  %v2991_v61 = vpop.f32.mrb[153].mxu1 }
 0x501   :  { %v3761_v56 = vmin.f32 %v3760_v0, %v3622_v58  ;;  %v3624_v27 = vmax.f32 %v3496_v23, 0.0  ;;  %v3231_v17 = vmul.f32 2.0, %v2991_v61  ;;  %v2993_v37 = vpop.f32.mrb[154].mxu1 }
 0x502   :  { %v3725_v24 = vmin.f32 %v3724_v14, %v3623_v25  ;;  %v3358_v40 = vsub.f32 %v6572_v47, %v3230_v21  ;;  %v3232_v6 = vmul.f32 2.0, %v2993_v37  ;;  %v2995_v18 = vpop.f32.mrb[155].mxu1 }
 0x503   :  { %v3762_v36 = vmin.f32 %v3761_v56, %v3624_v27  ;;  %v3359_v16 = vsub.f32 %v6572_v47, %v3231_v17  ;;  %v3233_v12 = vmul.f32 2.0, %v2995_v18 }
 0x504   :  { %v3497_v63 = vadd.f32 %v6428_v51, %v3358_v40  ;;  %v3360_v54 = vsub.f32 %v6586_v39, %v3232_v6 }
 0x505   :  { %v3498_v13 = vadd.f32 %v6436_v42, %v3359_v16  ;;  %v3361_v43 = vsub.f32 %v6586_v39, %v3233_v12  ;;  %v2632_v16 = vpop.xlane.xlu0 %2631  ;;  %v6627_v12 = vpop.xlane.xlu1 %2655 }
 0x506   :  { %v3625_v45 = vmax.f32 %v3497_v63, 0.0  ;;  %v3499_v4 = vadd.f32 %v6428_v51, %v3360_v54 }
 0x507   :  { %v3626_v55 = vmax.f32 %v3498_v13, 0.0  ;;  %v3500_v28 = vadd.f32 %v6436_v42, %v3361_v43  ;;  %v2999_v2 = vpop.f32.mrb[156].mxu1  ;;  %v4474_v13 = vld [vmem:[%s6872_s6] sm:$0xff]  }
 0x508   :  { %v3726_v47 = vmin.f32 %v3725_v24, %v3625_v45  ;;  %v3627_v48 = vmax.f32 %v3499_v4, 0.0  ;;  %v3234_v19 = vmul.f32 2.0, %v2999_v2  ;;  %v3001_v41 = vpop.f32.mrb[157].mxu1 }
 0x509   :  { %v3763_v60 = vmin.f32 %v3762_v36, %v3626_v55  ;;  %v3628_v22 = vmax.f32 %v3500_v28, 0.0  ;;  %v3235_v5 = vmul.f32 2.0, %v3001_v41  ;;  %v3003_v35 = vpop.f32.mrb[158].mxu1  ;;  %v4473_v36 = vld [vmem:[%s6872_s6 + $0x40] sm:$0xff]  }
 0x50a   :  { %v3727_v59 = vmin.f32 %v3726_v47, %v3627_v48  ;;  %v3362_v33 = vsub.f32 %v2626_v49, %v3234_v19  ;;  %v3236_v39 = vmul.f32 2.0, %v3003_v35  ;;  %v3005_v44 = vpop.f32.mrb[159].mxu1  ;;  %4296 = vmatprep.subr.bf16.mxu0 %v4473_v36 }
 0x50b   :  { %v3764_v34 = vmin.f32 %v3763_v60, %v3628_v22  ;;  %v3363_v0 = vsub.f32 %v2626_v49, %v3235_v5  ;;  %v3237_v9 = vmul.f32 2.0, %v3005_v44  ;;  %4297 = vmatpush3.bf16.msra.mxu0 %v4474_v13  ;;  %v6637_v5 = vpop.xlane.xlu1 %2651  ;;  %v4475_v44 = vld [vmem:[%s6872_s6 + $0x48] sm:$0xff]  }
 0x50c   :  { %v3501_v31 = vadd.f32 %v6428_v51, %v3362_v33  ;;  %v3364_v7 = vsub.f32 %v2628_v8, %v3236_v39  ;;  %4298 = vmatprep.subr.bf16.mxu0 %v4475_v44 }
 0x50d   :  { %v3502_v53 = vadd.f32 %v6436_v42, %v3363_v0  ;;  %v3365_v15 = vsub.f32 %v2628_v8, %v3237_v9 }
 0x50e   :  { %v3629_v38 = vmax.f32 %v3501_v31, 0.0  ;;  %v3503_v62 = vadd.f32 %v6428_v51, %v3364_v7 }
 0x50f   :  { %v3630_v58 = vmax.f32 %v3502_v53, 0.0  ;;  %v3504_v23 = vadd.f32 %v6436_v42, %v3365_v15  ;;  %v3009_v26 = vpop.f32.mrb[160].mxu1 }
 0x510   :  { %v3728_v14 = vmin.f32 %v3727_v59, %v3629_v38  ;;  %v3631_v25 = vmax.f32 %v3503_v62, 0.0  ;;  %v3238_v21 = vmul.f32 2.0, %v3009_v26  ;;  %v3011_v61 = vpop.f32.mrb[161].mxu1 }
 0x511   :  { %v3765_v56 = vmin.f32 %v3764_v34, %v3630_v58  ;;  %v3632_v27 = vmax.f32 %v3504_v23, 0.0  ;;  %v3239_v17 = vmul.f32 2.0, %v3011_v61  ;;  %v3013_v37 = vpop.f32.mrb[162].mxu1 }
 0x512   :  { %v3729_v24 = vmin.f32 %v3728_v14, %v3631_v25  ;;  %v3366_v40 = vsub.f32 %v6602_v3, %v3238_v21  ;;  %v3240_v6 = vmul.f32 2.0, %v3013_v37  ;;  %v3015_v18 = vpop.f32.mrb[163].mxu1  ;;  %v6649_v21 = vpop.xlane.xlu1 %2661 }
 0x513   :  { %v3766_v63 = vmin.f32 %v3765_v56, %v3632_v27  ;;  %v3367_v54 = vsub.f32 %v6602_v3, %v3239_v17  ;;  %v3241_v49 = vmul.f32 2.0, %v3015_v18 }
 0x514   :  { %v3505_v43 = vadd.f32 %v6428_v51, %v3366_v40  ;;  %v3368_v45 = vsub.f32 %v2632_v16, %v3240_v6 }
 0x515   :  { %v3506_v4 = vadd.f32 %v6436_v42, %v3367_v54  ;;  %v3369_v55 = vsub.f32 %v2632_v16, %v3241_v49 }
 0x516   :  { %v3633_v28 = vmax.f32 %v3505_v43, 0.0  ;;  %v3507_v2 = vadd.f32 %v6428_v51, %v3368_v45 }
 0x517   :  { %v3634_v47 = vmax.f32 %v3506_v4, 0.0  ;;  %v3508_v48 = vadd.f32 %v6436_v42, %v3369_v55  ;;  %v3019_v3 = vpop.f32.mrb[164].mxu1 }
 0x518   :  { %v3730_v19 = vmin.f32 %v3729_v24, %v3633_v28  ;;  %v3635_v41 = vmax.f32 %v3507_v2, 0.0  ;;  %v3242_v60 = vmul.f32 2.0, %v3019_v3  ;;  %v3021_v22 = vpop.f32.mrb[165].mxu1  ;;  %v6656_v3 = vpop.xlane.xlu1 %2657 }
 0x519   :  { %v3767_v35 = vmin.f32 %v3766_v63, %v3634_v47  ;;  %v3636_v59 = vmax.f32 %v3508_v48, 0.0  ;;  %v3243_v33 = vmul.f32 2.0, %v3021_v22  ;;  %v3023_v39 = vpop.f32.mrb[166].mxu1 }
 0x51a   :  { %v3731_v8 = vmin.f32 %v3730_v19, %v3635_v41  ;;  %v3370_v34 = vsub.f32 %v6557_v1, %v3242_v60  ;;  %v3244_v0 = vmul.f32 2.0, %v3023_v39  ;;  %v3025_v9 = vpop.f32.mrb[167].mxu1 }
 0x51b   :  { %v3768_v31 = vmin.f32 %v3767_v35, %v3636_v59  ;;  %v3371_v7 = vsub.f32 %v6557_v1, %v3243_v33  ;;  %v3245_v53 = vmul.f32 2.0, %v3025_v9 }
 0x51c   :  { %v3732_v15 = vrot.slane %v3731_v8, 4  ;;  %v3509_v38 = vadd.f32 %v6428_v51, %v3370_v34  ;;  %v3372_v62 = vsub.f32 %v6575_v52, %v3244_v0 }
 0x51d   :  { %v3769_v58 = vrot.slane %v3768_v31, 4  ;;  %v3510_v23 = vadd.f32 %v6436_v42, %v3371_v7  ;;  %v3373_v26 = vsub.f32 %v6575_v52, %v3245_v53 }
 0x51e   :  { %v3733_v14 = vmin.f32 %v3731_v8, %v3732_v15  ;;  %v3511_v25 = vadd.f32 %v6428_v51, %v3372_v62  ;;  %v3637_v17 = vmax.f32 %v3509_v38, 0.0 }
 0x51f   :  { %v3770_v61 = vmin.f32 %v3768_v31, %v3769_v58  ;;  %v3512_v1 = vadd.f32 %v6436_v42, %v3373_v26  ;;  %v3029_v56 = vpop.f32.mrb[168].mxu1  ;;  %v3638_v18 = vmax.f32 %v3510_v23, 0.0  ;;  %v6666_v58 = vpop.xlane.xlu1 %2663 }
 0x520   :  { %v3734_v27 = vrot.slane %v3733_v14, 2  ;;  %v3639_v37 = vmax.f32 %v3511_v25, 0.0  ;;  %v3246_v24 = vmul.f32 2.0, %v3029_v56  ;;  %v3031_v40 = vpop.f32.mrb[169].mxu1  ;;  %v4476_v25 = vld [vmem:[%s6872_s6 + $0x8] sm:$0xff]  }
 0x521   :  { %v3771_v6 = vrot.slane %v3770_v61, 2  ;;  %v3640_v36 = vmax.f32 %v3512_v1, 0.0  ;;  %v3247_v16 = vmul.f32 2.0, %v3031_v40  ;;  %v3033_v63 = vpop.f32.mrb[170].mxu1  ;;  %4299 = vmatpush3.bf16.msra.mxu0 %v4476_v25 }
 0x522   :  { %v3735_v52 = vmin.f32 %v3733_v14, %v3734_v27  ;;  %v3775_v54 = vmin.f32 %v3637_v17, %v3639_v37  ;;  %v3374_v49 = vsub.f32 %v6548_v11, %v3246_v24  ;;  %v3248_v13 = vmul.f32 2.0, %v3033_v63  ;;  %v3035_v43 = vpop.f32.mrb[171].mxu1 }
 0x523   :  { %v3772_v45 = vmin.f32 %v3770_v61, %v3771_v6  ;;  %v3812_v4 = vmin.f32 %v3638_v18, %v3640_v36  ;;  %v3375_v55 = vsub.f32 %v6548_v11, %v3247_v16  ;;  %v3249_v28 = vmul.f32 2.0, %v3035_v43  ;;  %v4477_v61 = vld [vmem:[%s6872_s6 + $0x50] sm:$0xff]   ;;  %v4479_v6 = vld [vmem:[%s6872_s6 + $0x58] sm:$0xff]  }
 0x524   :  { %v3736_v2 = vrot.slane %v3735_v52, 1  ;;  %v3513_v47 = vadd.f32 %v6428_v51, %v3374_v49  ;;  %v3376_v48 = vsub.f32 %v6564_v10, %v3248_v13  ;;  %4300 = vmatprep.subr.bf16.mxu0 %v4477_v61  ;;  %v6690_v13 = vpop.xlane.xlu1 %2659  ;;  %v4484_v61 = vld [vmem:[%s6872_s6 + $0x28] sm:$0xff]  }
 0x525   :  { %v3773_v19 = vrot.slane %v3772_v45, 1  ;;  %v3514_v41 = vadd.f32 %v6436_v42, %v3375_v55  ;;  %v3377_v60 = vsub.f32 %v6564_v10, %v3249_v28 }
 0x526   :  { %v3641_v22 = vmax.f32 %v3513_v47, 0.0  ;;  %v3515_v35 = vadd.f32 %v6428_v51, %v3376_v48  ;;  %v6662_v39 = vmin.f32 %v3735_v52, %v3736_v2 }
 0x527   :  { %v3642_v59 = vmax.f32 %v3514_v41, 0.0  ;;  %v3516_v33 = vadd.f32 %v6436_v42, %v3377_v60  ;;  %v3039_v11 = vpop.f32.mrb[172].mxu1  ;;  %v6664_v44 = vmin.f32 %v3772_v45, %v3773_v19  ;;  %v4481_v19 = vld [vmem:[%s6872_s6 + $0x60] sm:$0xff]  }
 0x528   :  { %v3776_v8 = vmin.f32 %v3775_v54, %v3641_v22  ;;  %v3643_v34 = vmax.f32 %v3515_v35, 0.0  ;;  %v3041_v0 = vpop.f32.mrb[173].mxu1  ;;  %v3250_v7 = vmul.f32 2.0, %v3039_v11 }
 0x529   :  { %v3813_v9 = vmin.f32 %v3812_v4, %v3642_v59  ;;  %v3644_v31 = vmax.f32 %v3516_v33, 0.0  ;;  %v3251_v53 = vmul.f32 2.0, %v3041_v0  ;;  %v3043_v15 = vpop.f32.mrb[174].mxu1  ;;  %v4068_v37 = vcombine.low %v6662_v39, %v6664_v44 }
 0x52a   :  { %v3777_v10 = vmin.f32 %v3776_v8, %v3643_v34  ;;  %v3252_v38 = vmul.f32 2.0, %v3043_v15  ;;  %v3045_v62 = vpop.f32.mrb[175].mxu1  ;;  %v3378_v26 = vsub.f32 %v6591_v50, %v3250_v7  ;;  %v4482_v34 = vld [vmem:[%s6872_s6 + $0x20] sm:$0xff]  }
 0x52b   :  { %v3814_v23 = vmin.f32 %v3813_v9, %v3644_v31  ;;  %v3379_v14 = vsub.f32 %v6591_v50, %v3251_v53  ;;  %v3253_v56 = vmul.f32 2.0, %v3045_v62  ;;  %v4478_v50 = vld [vmem:[%s6872_s6 + $0x10] sm:$0xff]   ;;  %v6711_v31 = vpop.xlane.xlu1 %2669 }
 0x52c   :  { %v3380_v1 = vsub.f32 %v6605_v20, %v3252_v38  ;;  %v3517_v27 = vadd.f32 %v6428_v51, %v3378_v26  ;;  %4301 = vmatpush3.bf16.msra.mxu0 %v4478_v50  ;;  %v4485_v50 = vld [vmem:[%s6872_s6 + $0x70] sm:$0xff]  }
 0x52d   :  { %v3518_v17 = vadd.f32 %v6436_v42, %v3379_v14  ;;  %v3381_v40 = vsub.f32 %v6605_v20, %v3253_v56  ;;  %v4480_v20 = vld [vmem:[%s6872_s6 + $0x18] sm:$0xff]   ;;  %4302 = vmatprep.subr.bf16.mxu0 %v4479_v6 }
 0x52e   :  { %v3519_v24 = vadd.f32 %v6428_v51, %v3380_v1  ;;  %v3645_v18 = vmax.f32 %v3517_v27, 0.0 }
 0x52f   :  { %v3646_v36 = vmax.f32 %v3518_v17, 0.0  ;;  %v3049_v16 = vpop.f32.mrb[176].mxu1  ;;  %v3520_v52 = vadd.f32 %v6436_v42, %v3381_v40 }
 0x530   :  { %v3647_v63 = vmax.f32 %v3519_v24, 0.0  ;;  %v3254_v54 = vmul.f32 2.0, %v3049_v16  ;;  %v3051_v49 = vpop.f32.mrb[177].mxu1  ;;  %v3778_v43 = vmin.f32 %v3777_v10, %v3645_v18  ;;  %4303 = vmatpush3.bf16.msra.mxu0 %v4480_v20  ;;  %v6724_v16 = vpop.xlane.xlu1 %2665 }
 0x531   :  { %v3815_v45 = vmin.f32 %v3814_v23, %v3646_v36  ;;  %v3255_v4 = vmul.f32 2.0, %v3051_v49  ;;  %v3053_v55 = vpop.f32.mrb[178].mxu1  ;;  %v3648_v28 = vmax.f32 %v3520_v52, 0.0  ;;  %4304 = vmatprep.subr.bf16.mxu0 %v4481_v19 }
 0x532   :  { %v3382_v2 = vsub.f32 %v6582_v29, %v3254_v54  ;;  %v3256_v47 = vmul.f32 2.0, %v3053_v55  ;;  %v3055_v48 = vpop.f32.mrb[179].mxu1  ;;  %v3779_v41 = vmin.f32 %v3778_v43, %v3647_v63  ;;  %v4486_v54 = vld [vmem:[%s6872_s6 + $0x30] sm:$0xff]  }
 0x533   :  { %v3383_v60 = vsub.f32 %v6582_v29, %v3255_v4  ;;  %v3257_v22 = vmul.f32 2.0, %v3055_v48  ;;  %v3816_v35 = vmin.f32 %v3815_v45, %v3648_v28  ;;  %v4483_v29 = vld [vmem:[%s6872_s6 + $0x68] sm:$0xff]  }
 0x534   :  { %v3521_v59 = vadd.f32 %v6428_v51, %v3382_v2  ;;  %v3384_v33 = vsub.f32 %v6597_v32, %v3256_v47  ;;  %4305 = vmatpush3.bf16.msra.mxu0 %v4482_v34 }
 0x535   :  { %v3522_v11 = vadd.f32 %v6436_v42, %v3383_v60  ;;  %v3385_v8 = vsub.f32 %v6597_v32, %v3257_v22  ;;  %4306 = vmatprep.subr.bf16.mxu0 %v4483_v29  ;;  %v4488_v60 = vld [vmem:[%s6872_s6 + $0x38] sm:$0xff]  }
 0x536   :  { %v3649_v0 = vmax.f32 %v3521_v59, 0.0  ;;  %v3523_v9 = vadd.f32 %v6428_v51, %v3384_v33 }
 0x537   :  { %v3650_v7 = vmax.f32 %v3522_v11, 0.0  ;;  %v3524_v53 = vadd.f32 %v6436_v42, %v3385_v8  ;;  %v3059_v15 = vpop.f32.mrb[180].mxu1  ;;  %v6740_v11 = vpop.xlane.xlu1 %2671 }
 0x538   :  { %v3780_v32 = vmin.f32 %v3779_v41, %v3649_v0  ;;  %v3651_v10 = vmax.f32 %v3523_v9, 0.0  ;;  %v3258_v38 = vmul.f32 2.0, %v3059_v15  ;;  %v3061_v62 = vpop.f32.mrb[181].mxu1  ;;  %4307 = vmatpush3.bf16.msra.mxu0 %v4484_v61 }
 0x539   :  { %v3817_v23 = vmin.f32 %v3816_v35, %v3650_v7  ;;  %v3652_v26 = vmax.f32 %v3524_v53, 0.0  ;;  %v3259_v14 = vmul.f32 2.0, %v3061_v62  ;;  %v3063_v25 = vpop.f32.mrb[182].mxu1  ;;  %4308 = vmatprep.subr.bf16.mxu0 %v4485_v50 }
 0x53a   :  { %v3781_v1 = vmin.f32 %v3780_v32, %v3651_v10  ;;  %v3386_v56 = vsub.f32 %v6618_v46, %v3258_v38  ;;  %v3260_v27 = vmul.f32 2.0, %v3063_v25  ;;  %v3065_v17 = vpop.f32.mrb[183].mxu1 }
 0x53b   :  { %v3818_v24 = vmin.f32 %v3817_v23, %v3652_v26  ;;  %v3387_v40 = vsub.f32 %v6618_v46, %v3259_v14  ;;  %v3261_v6 = vmul.f32 2.0, %v3065_v17  ;;  %v4487_v46 = vld [vmem:[%s6872_s6 + $0x78] sm:$0xff]   ;;  %v6749_v25 = vpop.xlane.xlu1 %2667  ;;  %s4865_s6 = smov [#allocation8]  }
 0x53c   :  { %v3525_v18 = vadd.f32 %v6428_v51, %v3386_v56  ;;  %v3388_v36 = vsub.f32 %v6637_v5, %v3260_v27  ;;  %4309 = vmatpush3.bf16.msra.mxu0 %v4486_v54  ;;  %s4115_s30 = sshll.u32 %s4865_s6, 4  ;;  %s4116_s30 = int_to_ptr.vmem [resolvable:$true] %s4115_s30 }
 0x53d   :  { %v3526_v63 = vadd.f32 %v6436_v42, %v3387_v40  ;;  %v3389_v52 = vsub.f32 %v6637_v5, %v3261_v6  ;;  %4310 = vmatprep.subr.bf16.mxu0 %v4487_v46  ;;  %s4806_s13 = scalar_lea.vmem %s4116_s30, 64  ;;  %p4811_p3 = scmp.lt.s32.totalorder %s4116_s30, %s4116_s30 }
 0x53e   :  { %v3653_v49 = vmax.f32 %v3525_v18, 0.0  ;;  %v3527_v43 = vadd.f32 %v6428_v51, %v3388_v36  ;;  %p4807_p2 = scmp.ne.s32.totalorder %s4116_s30, %s4806_s13  ;;  %p4812_p4 = scmp.lt.s32.totalorder %s4806_s13, %s4806_s13 }
 0x53f   :  { %v3654_v45 = vmax.f32 %v3526_v63, 0.0  ;;  %v3528_v4 = vadd.f32 %v6436_v42, %v3389_v52  ;;  %v3069_v55 = vpop.f32.mrb[184].mxu1  ;;  %v6758_v46 = vpop.xlane.xlu1 %2677 }
 0x540   :  { %v3782_v20 = vmin.f32 %v3781_v1, %v3653_v49  ;;  %v3655_v28 = vmax.f32 %v3527_v43, 0.0  ;;  %v3262_v5 = vmul.f32 2.0, %v3069_v55  ;;  %v3071_v2 = vpop.f32.mrb[185].mxu1  ;;  %4311 = vmatpush3.bf16.msra.mxu0 %v4488_v60  ;;  %p4813_p5 = por %p4812_p4, %p4811_p3 }
 0x541   :  { %v3819_v47 = vmin.f32 %v3818_v24, %v3654_v45  ;;  %v3656_v48 = vmax.f32 %v3528_v4, 0.0  ;;  %v3263_v19 = vmul.f32 2.0, %v3071_v2  ;;  %v3073_v41 = vpop.f32.mrb[186].mxu1 }
 0x542   :  { %v3783_v22 = vmin.f32 %v3782_v20, %v3655_v28  ;;  %v3390_v35 = vsub.f32 %v6614_v57, %v3262_v5  ;;  %v3264_v59 = vmul.f32 2.0, %v3073_v41  ;;  %v3075_v33 = vpop.f32.mrb[187].mxu1  ;;  %p4814_p6 = pnand %p4813_p5, %p4807_p2 }
 0x543   :  { %v3820_v8 = vmin.f32 %v3819_v47, %v3656_v48  ;;  %v3391_v34 = vsub.f32 %v6614_v57, %v3263_v19  ;;  %v3265_v0 = vmul.f32 2.0, %v3075_v33 }
 0x544   :  { %v3529_v9 = vadd.f32 %v6428_v51, %v3390_v35  ;;  %v3392_v29 = vsub.f32 %v6627_v12, %v3264_v59 }
 0x545   :  { %v3530_v7 = vadd.f32 %v6436_v42, %v3391_v34  ;;  %v3393_v53 = vsub.f32 %v6627_v12, %v3265_v0  ;;  %v6765_v0 = vpop.xlane.xlu1 %2673 }
 0x546   :  { %v3657_v15 = vmax.f32 %v3529_v9, 0.0  ;;  %v3531_v32 = vadd.f32 %v6428_v51, %v3392_v29 }
 0x547   :  { %v3658_v10 = vmax.f32 %v3530_v7, 0.0  ;;  %v3532_v38 = vadd.f32 %v6436_v42, %v3393_v53  ;;  %v3079_v62 = vpop.f32.mrb[188].mxu1 }
 0x548   :  { %v3784_v23 = vmin.f32 %v3783_v22, %v3657_v15  ;;  %v3659_v26 = vmax.f32 %v3531_v32, 0.0  ;;  %v3266_v57 = vmul.f32 2.0, %v3079_v62  ;;  %v3081_v14 = vpop.f32.mrb[189].mxu1 }
 0x549   :  { %v3821_v61 = vmin.f32 %v3820_v8, %v3658_v10  ;;  %v3660_v1 = vmax.f32 %v3532_v38, 0.0  ;;  %v3267_v56 = vmul.f32 2.0, %v3081_v14  ;;  %v3083_v27 = vpop.f32.mrb[190].mxu1 }
 0x54a   :  { %v3785_v17 = vmin.f32 %v3784_v23, %v3659_v26  ;;  %v3394_v12 = vsub.f32 %v6656_v3, %v3266_v57  ;;  %v3268_v50 = vmul.f32 2.0, %v3083_v27  ;;  %v3085_v24 = vpop.f32.mrb[191].mxu1 }
 0x54b   :  { %v3822_v40 = vmin.f32 %v3821_v61, %v3660_v1  ;;  %v3395_v6 = vsub.f32 %v6656_v3, %v3267_v56  ;;  %v3269_v18 = vmul.f32 2.0, %v3085_v24 }
 0x54c   :  { %v3533_v36 = vadd.f32 %v6428_v51, %v3394_v12  ;;  %v3396_v63 = vsub.f32 %v6690_v13, %v3268_v50 }
 0x54d   :  { %v3534_v52 = vadd.f32 %v6436_v42, %v3395_v6  ;;  %v3397_v54 = vsub.f32 %v6690_v13, %v3269_v18 }
 0x54e   :  { %v3661_v49 = vmax.f32 %v3533_v36, 0.0  ;;  %v3535_v43 = vadd.f32 %v6428_v51, %v3396_v63 }
 0x54f   :  { %v3662_v45 = vmax.f32 %v3534_v52, 0.0  ;;  %v3536_v4 = vadd.f32 %v6436_v42, %v3397_v54  ;;  %v3089_v55 = vpop.f32.mrb[192].mxu1 }
 0x550   :  { %v3786_v20 = vmin.f32 %v3785_v17, %v3661_v49  ;;  %v3663_v3 = vmax.f32 %v3535_v43, 0.0  ;;  %v3270_v28 = vmul.f32 2.0, %v3089_v55  ;;  %v3091_v5 = vpop.f32.mrb[193].mxu1  ;;  %v6772_v17 = vpop.xlane.xlu1 %2679 }
 0x551   :  { %v3823_v2 = vmin.f32 %v3822_v40, %v3662_v45  ;;  %v3664_v47 = vmax.f32 %v3536_v4, 0.0  ;;  %v3271_v48 = vmul.f32 2.0, %v3091_v5  ;;  %v3093_v19 = vpop.f32.mrb[194].mxu1 }
 0x552   :  { %v3787_v41 = vmin.f32 %v3786_v20, %v3663_v3  ;;  %v3398_v13 = vsub.f32 %v6649_v21, %v3270_v28  ;;  %v3272_v60 = vmul.f32 2.0, %v3093_v19  ;;  %v3095_v22 = vpop.f32.mrb[195].mxu1 }
 0x553   :  { %v3824_v35 = vmin.f32 %v3823_v2, %v3664_v47  ;;  %v3399_v59 = vsub.f32 %v6649_v21, %v3271_v48  ;;  %v3273_v33 = vmul.f32 2.0, %v3095_v22 }
 0x554   :  { %v3537_v8 = vadd.f32 %v6428_v51, %v3398_v13  ;;  %v3400_v34 = vsub.f32 %v6666_v58, %v3272_v60  ;;  %v2676_v20 = vpop.xlane.xlu1 %2675 }
 0x555   :  { %v3538_v9 = vadd.f32 %v6436_v42, %v3399_v59  ;;  %v3401_v29 = vsub.f32 %v6666_v58, %v3273_v33 }
 0x556   :  { %v3665_v7 = vmax.f32 %v3537_v8, 0.0  ;;  %v3539_v53 = vadd.f32 %v6428_v51, %v3400_v34 }
 0x557   :  { %v3666_v15 = vmax.f32 %v3538_v9, 0.0  ;;  %v3540_v32 = vadd.f32 %v6436_v42, %v3401_v29  ;;  %v3099_v10 = vpop.f32.mrb[196].mxu1 }
 0x558   :  { %v3788_v38 = vmin.f32 %v3787_v41, %v3665_v7  ;;  %v3667_v21 = vmax.f32 %v3539_v53, 0.0  ;;  %v3274_v62 = vmul.f32 2.0, %v3099_v10  ;;  %v3101_v23 = vpop.f32.mrb[197].mxu1  ;;  %v6788_v9 = vpop.xlane.xlu1 %2685 }
 0x559   :  { %v3825_v26 = vmin.f32 %v3824_v35, %v3666_v15  ;;  %v3668_v57 = vmax.f32 %v3540_v32, 0.0  ;;  %v3275_v14 = vmul.f32 2.0, %v3101_v23  ;;  %v3103_v61 = vpop.f32.mrb[198].mxu1 }
 0x55a   :  { %v3789_v1 = vmin.f32 %v3788_v38, %v3667_v21  ;;  %v3402_v56 = vsub.f32 %v6724_v16, %v3274_v62  ;;  %v3276_v27 = vmul.f32 2.0, %v3103_v61  ;;  %v3105_v58 = vpop.f32.mrb[199].mxu1 }
 0x55b   :  { %v3826_v12 = vmin.f32 %v3825_v26, %v3668_v57  ;;  %v3403_v50 = vsub.f32 %v6724_v16, %v3275_v14  ;;  %v3277_v24 = vmul.f32 2.0, %v3105_v58 }
 0x55c   :  { %v3541_v40 = vadd.f32 %v6428_v51, %v3402_v56  ;;  %v3404_v6 = vsub.f32 %v6749_v25, %v3276_v27 }
 0x55d   :  { %v3542_v18 = vadd.f32 %v6436_v42, %v3403_v50  ;;  %v3405_v36 = vsub.f32 %v6749_v25, %v3277_v24 }
 0x55e   :  { %v3669_v63 = vmax.f32 %v3541_v40, 0.0  ;;  %v3543_v52 = vadd.f32 %v6428_v51, %v3404_v6 }
 0x55f   :  { %v3670_v54 = vmax.f32 %v3542_v18, 0.0  ;;  %v3544_v49 = vadd.f32 %v6436_v42, %v3405_v36  ;;  %v3109_v43 = vpop.f32.mrb[200].mxu1 }
 0x560   :  { %v3790_v45 = vmin.f32 %v3789_v1, %v3669_v63  ;;  %v3671_v4 = vmax.f32 %v3543_v52, 0.0  ;;  %v3278_v55 = vmul.f32 2.0, %v3109_v43  ;;  %v3111_v16 = vpop.f32.mrb[201].mxu1 }
 0x561   :  { %v3827_v3 = vmin.f32 %v3826_v12, %v3670_v54  ;;  %v3672_v28 = vmax.f32 %v3544_v49, 0.0  ;;  %v3279_v5 = vmul.f32 2.0, %v3111_v16  ;;  %v3113_v2 = vpop.f32.mrb[202].mxu1  ;;  %v2682_v12 = vpop.xlane.xlu1 %2681 }
 0x562   :  { %v3791_v47 = vmin.f32 %v3790_v45, %v3671_v4  ;;  %v3406_v48 = vsub.f32 %v6711_v31, %v3278_v55  ;;  %v3280_v25 = vmul.f32 2.0, %v3113_v2  ;;  %v3115_v19 = vpop.f32.mrb[203].mxu1 }
 0x563   :  { %v3828_v41 = vmin.f32 %v3827_v3, %v3672_v28  ;;  %v3407_v13 = vsub.f32 %v6711_v31, %v3279_v5  ;;  %v3281_v60 = vmul.f32 2.0, %v3115_v19 }
 0x564   :  { %v3545_v22 = vadd.f32 %v6428_v51, %v3406_v48  ;;  %v3408_v35 = vsub.f32 %v6740_v11, %v3280_v25 }
 0x565   :  { %v3546_v59 = vadd.f32 %v6436_v42, %v3407_v13  ;;  %v3409_v33 = vsub.f32 %v6740_v11, %v3281_v60  ;;  %v6798_v5 = vpop.xlane.xlu1 %2687 }
 0x566   :  { %v3673_v8 = vmax.f32 %v3545_v22, 0.0  ;;  %v3547_v34 = vadd.f32 %v6428_v51, %v3408_v35 }
 0x567   :  { %v3674_v29 = vmax.f32 %v3546_v59, 0.0  ;;  %v3548_v7 = vadd.f32 %v6436_v42, %v3409_v33  ;;  %v3119_v53 = vpop.f32.mrb[204].mxu1 }
 0x568   :  { %v3792_v15 = vmin.f32 %v3791_v47, %v3673_v8  ;;  %v3675_v31 = vmax.f32 %v3547_v34, 0.0  ;;  %v3282_v32 = vmul.f32 2.0, %v3119_v53  ;;  %v3121_v10 = vpop.f32.mrb[205].mxu1 }
 0x569   :  { %v3829_v38 = vmin.f32 %v3828_v41, %v3674_v29  ;;  %v3676_v21 = vmax.f32 %v3548_v7, 0.0  ;;  %v3283_v62 = vmul.f32 2.0, %v3121_v10  ;;  %v3123_v23 = vpop.f32.mrb[206].mxu1  ;;  %v2684_v7 = vpop.xlane.xlu1 %2683 }
 0x56a   :  { %v3793_v26 = vmin.f32 %v3792_v15, %v3675_v31  ;;  %v3410_v11 = vsub.f32 %v6765_v0, %v3282_v32  ;;  %v3284_v57 = vmul.f32 2.0, %v3123_v23  ;;  %v3125_v14 = vpop.f32.mrb[207].mxu1 }
 0x56b   :  { %v3830_v61 = vmin.f32 %v3829_v38, %v3676_v21  ;;  %v3411_v1 = vsub.f32 %v6765_v0, %v3283_v62  ;;  %v3285_v56 = vmul.f32 2.0, %v3125_v14 }
 0x56c   :  { %v3549_v27 = vadd.f32 %v6428_v51, %v3410_v11  ;;  %v3412_v58 = vsub.f32 %v2676_v20, %v3284_v57 }
 0x56d   :  { %v3550_v50 = vadd.f32 %v6436_v42, %v3411_v1  ;;  %v3413_v24 = vsub.f32 %v2676_v20, %v3285_v56 }
 0x56e   :  { %v3677_v40 = vmax.f32 %v3549_v27, 0.0  ;;  %v3551_v6 = vadd.f32 %v6428_v51, %v3412_v58  ;;  %v6810_v27 = vpop.xlane.xlu1 %2693 }
 0x56f   :  { %v3678_v18 = vmax.f32 %v3550_v50, 0.0  ;;  %v3552_v36 = vadd.f32 %v6436_v42, %v3413_v24  ;;  %v3129_v63 = vpop.f32.mrb[208].mxu1 }
 0x570   :  { %v3794_v52 = vmin.f32 %v3793_v26, %v3677_v40  ;;  %v3679_v54 = vmax.f32 %v3551_v6, 0.0  ;;  %v3286_v49 = vmul.f32 2.0, %v3129_v63  ;;  %v3131_v43 = vpop.f32.mrb[209].mxu1 }
 0x571   :  { %v3831_v0 = vmin.f32 %v3830_v61, %v3678_v18  ;;  %v3680_v45 = vmax.f32 %v3552_v36, 0.0  ;;  %v3287_v4 = vmul.f32 2.0, %v3131_v43  ;;  %v3133_v55 = vpop.f32.mrb[210].mxu1 }
 0x572   :  { %v3795_v16 = vmin.f32 %v3794_v52, %v3679_v54  ;;  %v3414_v3 = vsub.f32 %v6758_v46, %v3286_v49  ;;  %v3288_v28 = vmul.f32 2.0, %v3133_v55  ;;  %v3135_v20 = vpop.f32.mrb[211].mxu1 }
 0x573   :  { %v3832_v2 = vmin.f32 %v3831_v0, %v3680_v45  ;;  %v3415_v47 = vsub.f32 %v6758_v46, %v3287_v4  ;;  %v3289_v48 = vmul.f32 2.0, %v3135_v20  ;;  %v2690_v20 = vpop.xlane.xlu1 %2689 }
 0x574   :  { %v3553_v25 = vadd.f32 %v6428_v51, %v3414_v3  ;;  %v3416_v19 = vsub.f32 %v6772_v17, %v3288_v28 }
 0x575   :  { %v3554_v41 = vadd.f32 %v6436_v42, %v3415_v47  ;;  %v3417_v13 = vsub.f32 %v6772_v17, %v3289_v48 }
 0x576   :  { %v3681_v60 = vmax.f32 %v3553_v25, 0.0  ;;  %v3555_v22 = vadd.f32 %v6428_v51, %v3416_v19 }
 0x577   :  { %v3682_v35 = vmax.f32 %v3554_v41, 0.0  ;;  %v3556_v59 = vadd.f32 %v6436_v42, %v3417_v13  ;;  %v3139_v33 = vpop.f32.mrb[212].mxu1 }
 0x578   :  { %v3796_v8 = vmin.f32 %v3795_v16, %v3681_v60  ;;  %v3683_v34 = vmax.f32 %v3555_v22, 0.0  ;;  %v3290_v29 = vmul.f32 2.0, %v3139_v33  ;;  %v3141_v46 = vpop.f32.mrb[213].mxu1 }
 0x579   :  { %v3833_v53 = vmin.f32 %v3832_v2, %v3682_v35  ;;  %v3684_v15 = vmax.f32 %v3556_v59, 0.0  ;;  %v3291_v31 = vmul.f32 2.0, %v3141_v46  ;;  %v3143_v32 = vpop.f32.mrb[214].mxu1 }
 0x57a   :  { %v3797_v10 = vmin.f32 %v3796_v8, %v3683_v34  ;;  %v3418_v38 = vsub.f32 %v2682_v12, %v3290_v29  ;;  %v3292_v21 = vmul.f32 2.0, %v3143_v32  ;;  %v3145_v17 = vpop.f32.mrb[215].mxu1 }
 0x57b   :  { %v3834_v62 = vmin.f32 %v3833_v53, %v3684_v15  ;;  %v3419_v23 = vsub.f32 %v2682_v12, %v3291_v31  ;;  %v3293_v26 = vmul.f32 2.0, %v3145_v17 }
 0x57c   :  { %v3557_v11 = vadd.f32 %v6428_v51, %v3418_v38  ;;  %v3420_v57 = vsub.f32 %v2684_v7, %v3292_v21 }
 0x57d   :  { %v3558_v14 = vadd.f32 %v6436_v42, %v3419_v23  ;;  %v3421_v61 = vsub.f32 %v2684_v7, %v3293_v26 }
 0x57e   :  { %v3685_v1 = vmax.f32 %v3557_v11, 0.0  ;;  %v3559_v56 = vadd.f32 %v6428_v51, %v3420_v57 }
 0x57f   :  { %v3686_v58 = vmax.f32 %v3558_v14, 0.0  ;;  %v3560_v50 = vadd.f32 %v6436_v42, %v3421_v61  ;;  %v3149_v24 = vpop.f32.mrb[216].mxu1 }
 0x580   :  { %v3798_v40 = vmin.f32 %v3797_v10, %v3685_v1  ;;  %v3687_v6 = vmax.f32 %v3559_v56, 0.0  ;;  %v3294_v18 = vmul.f32 2.0, %v3149_v24  ;;  %v3151_v12 = vpop.f32.mrb[217].mxu1 }
 0x581   :  { %v3835_v36 = vmin.f32 %v3834_v62, %v3686_v58  ;;  %v3688_v63 = vmax.f32 %v3560_v50, 0.0  ;;  %v3295_v52 = vmul.f32 2.0, %v3151_v12  ;;  %v3153_v54 = vpop.f32.mrb[218].mxu1 }
 0x582   :  { %v3799_v49 = vmin.f32 %v3798_v40, %v3687_v6  ;;  %v3422_v43 = vsub.f32 %v6788_v9, %v3294_v18  ;;  %v3296_v0 = vmul.f32 2.0, %v3153_v54  ;;  %v3155_v45 = vpop.f32.mrb[219].mxu1 }
 0x583   :  { %v3836_v4 = vmin.f32 %v3835_v36, %v3688_v63  ;;  %v3423_v55 = vsub.f32 %v6788_v9, %v3295_v52  ;;  %v3297_v16 = vmul.f32 2.0, %v3155_v45 }
 0x584   :  { %v3561_v3 = vadd.f32 %v6428_v51, %v3422_v43  ;;  %v3424_v28 = vsub.f32 %v6798_v5, %v3296_v0 }
 0x585   :  { %v3562_v2 = vadd.f32 %v6436_v42, %v3423_v55  ;;  %v3425_v47 = vsub.f32 %v6798_v5, %v3297_v16  ;;  %v2692_v5 = vpop.xlane.xlu1 %2691 }
 0x586   :  { %v3689_v48 = vmax.f32 %v3561_v3, 0.0  ;;  %v3563_v25 = vadd.f32 %v6428_v51, %v3424_v28 }
 0x587   :  { %v3690_v19 = vmax.f32 %v3562_v2, 0.0  ;;  %v3564_v41 = vadd.f32 %v6436_v42, %v3425_v47  ;;  %v3159_v13 = vpop.f32.mrb[220].mxu1 }
 0x588   :  { %v3800_v60 = vmin.f32 %v3799_v49, %v3689_v48  ;;  %v3691_v22 = vmax.f32 %v3563_v25, 0.0  ;;  %v3298_v9 = vmul.f32 2.0, %v3159_v13  ;;  %v3161_v35 = vpop.f32.mrb[221].mxu1  ;;  %v3849_v13 = vadd.f32 1.0, %v6662_v39 }
 0x589   :  { %v3837_v59 = vmin.f32 %v3836_v4, %v3690_v19  ;;  %v3692_v33 = vmax.f32 %v3564_v41, 0.0  ;;  %v3299_v8 = vmul.f32 2.0, %v3161_v35  ;;  %v3163_v34 = vpop.f32.mrb[222].mxu1  ;;  %v2696_v63 = vpop.xlane.xlu1 %2695 }
 0x58a   :  { %v3801_v29 = vmin.f32 %v3800_v60, %v3691_v22  ;;  %v3426_v46 = vsub.f32 %v2690_v20, %v3298_v9  ;;  %v3300_v7 = vmul.f32 2.0, %v3163_v34  ;;  %v3165_v53 = vpop.f32.mrb[223].mxu1  ;;  %v3861_v22 = vadd.f32 0.0001, %v6662_v39 }
 0x58b   :  { %v3838_v15 = vmin.f32 %v3837_v59, %v3692_v33  ;;  %v3427_v31 = vsub.f32 %v2690_v20, %v3299_v8  ;;  %v3301_v32 = vmul.f32 2.0, %v3165_v53  ;;  %v4864_v33 = vmov 1983009808  }
 0x58c   :  { %v3565_v10 = vadd.f32 %v6428_v51, %v3426_v46  ;;  %v3428_v38 = vsub.f32 %v2692_v5, %v3300_v7  ;;  %v4070_v8 = vunpack.c.l.s4 %v4864_v33  ;;  %4745 = vlog2.f32 %v3849_v13 }
 0x58d   :  { %v3566_v21 = vadd.f32 %v6436_v42, %v3427_v31  ;;  %v3429_v17 = vsub.f32 %v2692_v5, %v3301_v32  ;;  %4747 = vlog2.f32 %v3861_v22 }
 0x58e   :  { %v3693_v62 = vmax.f32 %v3565_v10, 0.0  ;;  %v3567_v23 = vadd.f32 %v6428_v51, %v3428_v38  ;;  %v4071_v53 = vunpack.c.0.s8 %v4070_v8 }
 0x58f   :  { %v3694_v26 = vmax.f32 %v3566_v21, 0.0  ;;  %v3568_v11 = vadd.f32 %v6436_v42, %v3429_v17  ;;  %v3169_v57 = vpop.f32.mrb[224].mxu1 }
 0x590   :  { %v3802_v14 = vmin.f32 %v3801_v29, %v3693_v62  ;;  %v3695_v61 = vmax.f32 %v3567_v23, 0.0  ;;  %v3302_v1 = vmul.f32 2.0, %v3169_v57  ;;  %v3171_v56 = vpop.f32.mrb[225].mxu1  ;;  %v4074_v17 = vsub.s32 %v4071_v53, %v5522_v30 }
 0x591   :  { %v3839_v58 = vmin.f32 %v3838_v15, %v3694_v26  ;;  %v3696_v50 = vmax.f32 %v3568_v11, 0.0  ;;  %v3303_v24 = vmul.f32 2.0, %v3171_v56  ;;  %v3173_v40 = vpop.f32.mrb[226].mxu1 }
 0x592   :  { %v3803_v6 = vmin.f32 %v3802_v14, %v3695_v61  ;;  %v3430_v18 = vsub.f32 %v6810_v27, %v3302_v1  ;;  %v3304_v12 = vmul.f32 2.0, %v3173_v40  ;;  %v3175_v36 = vpop.f32.mrb[227].mxu1  ;;  %v4075_v11 = vrot.slane %v4068_v37, %v4074_v17 }
 0x593   :  { %v3840_v52 = vmin.f32 %v3839_v58, %v3696_v50  ;;  %v3431_v54 = vsub.f32 %v6810_v27, %v3303_v24  ;;  %v3305_v49 = vmul.f32 2.0, %v3175_v36 }
 0x594   :  { %v3569_v43 = vadd.f32 %v6428_v51, %v3430_v18  ;;  %v3432_v0 = vsub.f32 %v2696_v63, %v3304_v12 }
 0x595   :  { %v3570_v45 = vadd.f32 %v6436_v42, %v3431_v54  ;;  %v3433_v4 = vsub.f32 %v2696_v63, %v3305_v49 }
 0x596   :  { %v3697_v55 = vmax.f32 %v3569_v43, 0.0  ;;  %v3571_v16 = vadd.f32 %v6428_v51, %v3432_v0  ;;  %v3850_v51 = vadd.f32 1.0, %v6664_v44  ;;  %v4746_v23 = vpop.eup %4745 }
 0x597   :  { %v3698_v3 = vmax.f32 %v3570_v45, 0.0  ;;  %v3572_v28 = vadd.f32 %v6436_v42, %v3433_v4  ;;  %v3862_v42 = vadd.f32 0.0001, %v6664_v44  ;;  %v4748_v26 = vpop.eup %4747  ;;  %v3854_v30 = vmul.f32 0.6931472, %v4746_v23 }
 0x598   :  { %v3804_v20 = vmin.f32 %v3803_v6, %v3697_v55  ;;  %v3699_v2 = vmax.f32 %v3571_v16, 0.0  ;;  %4749 = vlog2.f32 %v3850_v51  ;;  %v3866_v56 = vmul.f32 0.6931472, %v4748_v26 }
 0x599   :  { %v3841_v47 = vmin.f32 %v3840_v52, %v3698_v3  ;;  %v3700_v48 = vmax.f32 %v3572_v28, 0.0  ;;  %4751 = vlog2.f32 %v3862_v42 }
 0x59a   :  { %v3805_v25 = vmin.f32 %v3804_v20, %v3699_v2  ;;  %v3873_v12 = vsub.f32 %v3854_v30, %v3866_v56 }
 0x59b   :  { %v3842_v19 = vmin.f32 %v3841_v47, %v3700_v48 }
 0x59c   :  { %v3806_v27 = vrot.slane %v3805_v25, 4  ;;  %v3877_v0 = vpack.c.bf16 %v3873_v12, %v3873_v12 }
 0x59d   :  { %v3843_v41 = vrot.slane %v3842_v19, 4 }
 0x59e   :  { %v3807_v60 = vmin.f32 %v3805_v25, %v3806_v27  ;;  %v3917_v3 = vunpack.c.l.b16 %v3877_v0 }
 0x59f   :  { %v3844_v9 = vmin.f32 %v3842_v19, %v3843_v41 }
 0x5a0   :  { %v3808_v35 = vrot.slane %v3807_v60, 2 }
 0x5a1   :  { %v3845_v59 = vrot.slane %v3844_v9, 2 }
 0x5a2   :  { %v3809_v34 = vmin.f32 %v3807_v60, %v3808_v35  ;;  %v4750_v14 = vpop.eup %4749 }
 0x5a3   :  { %v3846_v29 = vmin.f32 %v3844_v9, %v3845_v59  ;;  %v4752_v61 = vpop.eup %4751  ;;  %v3856_v24 = vmul.f32 0.6931472, %v4750_v14 }
 0x5a4   :  { %v3810_v46 = vrot.slane %v3809_v34, 1  ;;  %v3868_v40 = vmul.f32 0.6931472, %v4752_v61 }
 0x5a5   :  { %v3847_v7 = vrot.slane %v3846_v29, 1 }
 0x5a6   :  { %v3811_v5 = vmin.f32 %v3809_v34, %v3810_v46  ;;  %v3874_v63 = vsub.f32 %v3856_v24, %v3868_v40 }
 0x5a7   :  { %v3848_v15 = vmin.f32 %v3846_v29, %v3847_v7 }
 0x5a8   :  { %v3851_v31 = vadd.f32 1.0, %v3811_v5  ;;  %v3863_v32 = vadd.f32 0.0001, %v3811_v5  ;;  %v3878_v4 = vpack.c.bf16 %v3874_v63, %v3874_v63 }
 0x5a9   :  { %v4076_v10 = vcombine.low %v3811_v5, %v3848_v15  ;;  %v3852_v38 = vadd.f32 1.0, %v3848_v15  ;;  %v3864_v21 = vadd.f32 0.0001, %v3848_v15 }
 0x5aa   :  { %4753 = vlog2.f32 %v3851_v31  ;;  %v3918_v20 = vunpack.c.l.b16 %v3878_v4 }
 0x5ab   :  { %4755 = vlog2.f32 %v3863_v32  ;;  %v4083_v62 = vrot.slane %v4076_v10, %v4074_v17 }
 0x5ac   :  { %4757 = vlog2.f32 %v3852_v38 }
 0x5ad   :  { %4759 = vlog2.f32 %v3864_v21  ;;  %v4088_v57 = vrot.slane %v4083_v62, 7 }
 0x5af   :  { %v4089_v1 = vsel %vm3921_vm2, %v4088_v57, %v4075_v11 }
 0x5b0   :  { %v4091_v58 = vsel %vm4090_vm3, %v4088_v57, %v4089_v1 }
 0x5b1   :  { %v4093_v50 = vsel %vm4092_vm4, %v4088_v57, %v4091_v58 }
 0x5b2   :  { %v4095_v6 = vsel %vm4094_vm5, %v4088_v57, %v4093_v50 }
 0x5b3   :  { %4097 = vst [vmem:[#allocation8] sm:$0xf] %v4095_v6 }
 0x5b4   :  { %v4754_v18 = vpop.eup %4753 }
 0x5b5   :  { %v4756_v39 = vpop.eup %4755  ;;  %v3858_v44 = vmul.f32 0.6931472, %v4754_v18 }
 0x5b6   :  { %v4758_v37 = vpop.eup %4757  ;;  %v3870_v36 = vmul.f32 0.6931472, %v4756_v39 }
 0x5b7   :  { %v4760_v52 = vpop.eup %4759  ;;  %v3860_v54 = vmul.f32 0.6931472, %v4758_v37 }
 0x5b8   :  { %v3872_v49 = vmul.f32 0.6931472, %v4760_v52  ;;  %v3875_v43 = vsub.f32 %v3858_v44, %v3870_v36 }
 0x5ba   :  { %v3876_v45 = vsub.f32 %v3860_v54, %v3872_v49  ;;  %v3879_v55 = vpack.c.bf16 %v3875_v43, %v3875_v43 }
 0x5bc   :  { %v3880_v16 = vpack.c.bf16 %v3876_v45, %v3876_v45  ;;  %v3919_v28 = vunpack.c.l.b16 %v3879_v55 }
 0x5be   :  { %v3920_v2 = vunpack.c.l.b16 %v3880_v16  ;;  %v3922_v47 = vsel %vm3921_vm2, %v3919_v28, %v3917_v3 }
 0x5bf   :  { %v3924_v19 = vpack.c.b16 %v3922_v47, %v3922_v47 }
 0x5c0   :  { %v3923_v48 = vsel %vm3921_vm2, %v3920_v2, %v3918_v20 }
 0x5c1   :  { %v3925_v25 = vpack.c.b16 %v3923_v48, %v3923_v48 }
 0x5c3   :  { %4056 = vmatprep.mubr.bf16.mxu0 %v3925_v25 }
 0x5c4   :  { %4057 = vmatmul.mubr.bf16.vlgmr.msra.gmra.mrb[220].mxu0 %v3924_v19 }
 0x5c5   :  { %4817 = shalt.err (!%p4814_p6)
}
 0x5c6   :  { %s4818_s16 = scalar_lea.hbm %s6874_s8, 64 }
 0x5c7   :  { %p4819_p7 = scmp.ne.s32.totalorder %s6874_s8, %s4818_s16  ;;  %p4822_p8 = scmp.lt.u32.totalorder %s4818_s16, %s6874_s8 }
 0x5c9   :  { %p4824_p9 = pnand %p4822_p8, %p4819_p7 }
 0x5cb   :  { %4827 = shalt.err (!%p4824_p9)
}
 0x5cc   :  { %4118 = dma.vmem_to_hbm [thread:$0]  %s4116_s30, 64, %s6874_s8, [#allocation9]  }
 0x5cd   :  { %s4866_s22 = smov [#allocation7]  }
 0x5ce   :  { %s4105_s23 = sshll.u32 %s4866_s22, 4  ;;  %s4106_s23 = int_to_ptr.vmem [resolvable:$true] %s4105_s23 }
 0x5cf   :  { %s4828_s24 = scalar_lea.vmem %s4106_s23, 32  ;;  %p4833_p11 = scmp.lt.s32.totalorder %s4106_s23, %s4106_s23 }
 0x5d0   :  { %p4829_p10 = scmp.ne.s32.totalorder %s4106_s23, %s4828_s24  ;;  %p4834_p12 = scmp.lt.s32.totalorder %s4828_s24, %s4828_s24 }
 0x5d2   :  { %p4835_p13 = por %p4834_p12, %p4833_p11 }
 0x5d4   :  { %p4836_p0 = pnand %p4835_p13, %p4829_p10 }
 0x697   :  { %v4312_v27 = vpop.f32.mrb[220].mxu0 }
 0x698   :  { %v4313_v41 = vpop.f32.mrb[221].mxu0 }
 0x699   :  { %v4314_v13 = vadd.f32 %v4313_v41, %v4312_v27  ;;  %v4315_v60 = vpop.f32.mrb[222].mxu0 }
 0x69a   :  { %v4316_v22 = vpop.f32.mrb[223].mxu0 }
 0x69b   :  { %4098 = vst [vmem:[#allocation7] sm:$0x3] %v4314_v13 }
 0x69c   :  { %4839 = shalt.err (!%p4836_p0)
}
 0x69d   :  { %s4840_s8 = scalar_lea.hbm %s6873_s7, 32 }
 0x69e   :  { %p4841_p1 = scmp.ne.s32.totalorder %s6873_s7, %s4840_s8  ;;  %p4844_p2 = scmp.lt.u32.totalorder %s4840_s8, %s6873_s7 }
 0x6a0   :  { %p4846_p3 = pnand %p4844_p2, %p4841_p1 }
 0x6a2   :  { %4849 = shalt.err (!%p4846_p3)
}
 0x6a3   :  { %4108 = dma.vmem_to_hbm [thread:$0]  %s4106_s23, 32, %s6873_s7, [#allocation4]  }
 0x6a4   :  { %4854 = dma.done.wait [#allocation4], 32  }
 0x6a5   :  { %4855 = vsyncadd [#allocation4], 4294967264 }
 0x6a6   :  { %4856 = dma.done.wait [#allocation9], 64  }
 0x6a7   :  { %4857 = vsyncadd [#allocation9], 4294967232 }
 0x6a8   :  { %4125 = vsyncpa [#allocation3], 1 }
 0x6a9   :  { %4126 = vsyncpa [#allocation6], 1 }
 0x6aa   :  { %4127 = vsyncpa [#allocation4], 1 }
 0x6ab   :  { %4128 = vsyncpa [#allocation9], 1 }

</bundles_post_ra>
